<compile_context>
chip_gen: v5e
topology: v5e:2x2
jax: 0.10.0
libtpu: 0.0.40
codegen_flags: <defaults>
</compile_context>

<pallas_src>
import jax
import jax.numpy as jnp
from jax import lax
from jax.experimental import pallas as pl
from jax.experimental.pallas import tpu as pltpu


def _upsample_lanes(a, factor):
    """Nearest-neighbour upsample along the last (lane) axis.

    O(T) broadcast + reshape (per perf review) instead of an O(T^2)
    selection-matrix matmul.
    """
    if factor == 1:
        return a
    r, t = a.shape
    return jnp.broadcast_to(a[:, :, None], (r, t, factor)).reshape(r, t * factor)


def _make_decoder_kernel(block_b, kernel_size, scale_factor):
    pad = (kernel_size - 1) // 2
    # Remaining matmuls are tiny (contraction <= K*C_in); HIGHEST is essentially
    # free here and keeps fp32 parity with the PyTorch reference.
    HIGH = lax.Precision.HIGHEST

    def kernel(x_ref, aux_ref, w_aux_ref, b_aux_ref, w_conv_ref, b_conv_ref,
               w_lin_ref, b_lin_ref, y_ref, out_ref, hpad_ref):
        f32 = jnp.float32
        t2 = aux_ref.shape[-1]

        # Small weights: load once per grid step, hoisted out of the batch loop.
        w_aux = w_aux_ref[...].astype(f32)     # (C_out, A)
        b_aux = b_aux_ref[...].astype(f32)     # (C_out, 1)
        w_conv = w_conv_ref[...].astype(f32)   # (C_out, K*C_in)
        b_conv = b_conv_ref[...].astype(f32)   # (C_out, 1)
        w_lin = w_lin_ref[...].astype(f32)     # (n_cls, C_out)
        b_lin = b_lin_ref[...].astype(f32)     # (n_cls, 1)

        # Zero the conv halo columns of the padded scratch; only the middle
        # [pad, pad + t2) region is rewritten per batch element below.
        if pad > 0:
            zeros_edge = jnp.zeros((hpad_ref.shape[0], pad), f32)
            hpad_ref[:, pl.ds(0, pad)] = zeros_edge
            hpad_ref[:, pl.ds(t2 + pad, pad)] = zeros_edge

        for bt in range(block_b):                      # static, unrolled
            x = x_ref[bt].astype(f32)                  # (C_in, T)
            aux = aux_ref[bt].astype(f32)              # (A,   T2)

            # --- Upsample(x, scale=2, nearest): O(T) broadcast+reshape -------
            x_up = _upsample_lanes(x, 2)               # (C_in, T2)

            # --- 1x1 aux conv (channel matmul) + residual add ----------------
            aux_p = jnp.dot(w_aux, aux, preferred_element_type=f32,
                            precision=HIGH)
            h = x_up + aux_p + b_aux                   # (C_out, T2)

            # --- Conv1d ('same' padding) as ONE fused MXU matmul -------------
            # h is written once into a zero-padded VMEM scratch; the K shifted
            # taps are offset loads from that scratch, stacked along sublanes
            # so the conv is a single matmul with contraction K*C_in.
            hpad_ref[:, pl.ds(pad, t2)] = h
            taps = [hpad_ref[:, pl.ds(dk, t2)] for dk in range(kernel_size)]
            stacked = taps[0] if kernel_size == 1 else jnp.concatenate(taps, axis=0)
            y = jnp.dot(w_conv, stacked, preferred_element_type=f32,
                        precision=HIGH) + b_conv       # (C_out, T2)
            # Dropout2d(0.1) is identity at inference.
            # TODO(synk): training-mode channel dropout would use pltpu.prng_*.
            y_ref[bt] = y.astype(y_ref.dtype)

            # --- Linear over channels + softmax over classes -----------------
            logits = jnp.dot(w_lin, y, preferred_element_type=f32,
                             precision=HIGH) + b_lin   # (n_cls, T2)
            m = jnp.max(logits, axis=0, keepdims=True)
            e = jnp.exp(logits - m)
            # approximate reciprocal rides the otherwise-idle EUP slot.
            inv = pl.reciprocal(jnp.sum(e, axis=0, keepdims=True), approx=True)
            probs = e * inv                            # (n_cls, T2)

            # --- Upsample(x_out, scale_factor, nearest): O(T) ----------------
            out_ref[bt] = _upsample_lanes(probs, scale_factor).astype(out_ref.dtype)

    return kernel


def _auto_block_b(batch):
    """Largest divisor of `batch` <= 8 that still leaves >= 2 grid steps
    (keeps both v7x TensorCores busy via the 'parallel' batch axis)."""
    if batch < 2:
        return 1
    cap = max(1, min(8, batch // 2))
    return max(d for d in range(1, cap + 1) if batch % d == 0)


def decoder_tcfpn_forward(x, aux, params, *, kernel_size, scale_factor,
                          block_b=None):
    """Fused Pallas forward.  x: (B, C_in, T); aux: (B, A, 2T).  Returns (y, x_out)."""
    w_aux, b_aux, w_conv, b_conv, w_lin, b_lin = params
    B, c_in, t_in = x.shape
    c_out, a_in = w_aux.shape
    n_cls = w_lin.shape[0]
    scale_factor = int(scale_factor)
    assert c_in == c_out, "x + aux_conv(aux) requires in_channels == out_channels"
    assert kernel_size % 2 == 1, "'same' conv padding assumes an odd kernel_size"
    t2 = 2 * t_in
    assert aux.shape == (B, a_in, t2)
    t_out = t2 * scale_factor
    pad = (kernel_size - 1) // 2

    if block_b is None:
        block_b = _auto_block_b(B)
    assert B % block_b == 0
    grid_b = B // block_b

    # Weight layouts for clean in-kernel access (time stays on lanes); conv
    # weight flattened to (C_out, K*C_in) so the K taps fuse into one matmul.
    w_conv_flat = jnp.transpose(w_conv, (0, 2, 1)).reshape(c_out, kernel_size * c_in)
    b_aux2 = b_aux.reshape(c_out, 1)
    b_conv2 = b_conv.reshape(c_out, 1)
    b_lin2 = b_lin.reshape(n_cls, 1)

    kernel = _make_decoder_kernel(block_b, kernel_size, scale_factor)

    def whole(shape):
        n = len(shape)
        return pl.BlockSpec(shape, lambda b, _n=n: (0,) * _n)

    grid_spec = pltpu.PrefetchScalarGridSpec(
        num_scalar_prefetch=0,
        grid=(grid_b,),
        in_specs=[
            pl.BlockSpec((block_b, c_in, t_in), lambda b: (b, 0, 0)),
            pl.BlockSpec((block_b, a_in, t2), lambda b: (b, 0, 0)),
            whole((c_out, a_in)),
            whole((c_out, 1)),
            whole((c_out, kernel_size * c_in)),
            whole((c_out, 1)),
            whole((n_cls, c_out)),
            whole((n_cls, 1)),
        ],
        out_specs=[
            pl.BlockSpec((block_b, c_out, t2), lambda b: (b, 0, 0)),
            pl.BlockSpec((block_b, n_cls, t_out), lambda b: (b, 0, 0)),
        ],
        scratch_shapes=[pltpu.VMEM((c_out, t2 + 2 * pad), jnp.float32)],
    )

    # VMEM budget: double-buffered activation blocks + weights + in-kernel
    # transients with 2x headroom, clamped to [32 MiB, 56 MiB] so it is >= the
    # default scoped limit on v5e/v6e/v7x yet stays below v7x's 64 MiB per TC.
    fp = 4
    io_bytes = 2 * fp * block_b * (c_in * t_in + a_in * t2 + c_out * t2
                                   + n_cls * t_out)
    w_bytes = 2 * fp * (c_out * a_in + c_out * kernel_size * c_in
                        + n_cls * c_out + 2 * c_out + n_cls)
    tr_bytes = fp * ((kernel_size + 4) * c_out * t2 + 3 * n_cls * t2
                     + 2 * n_cls * t_out)
    vmem_limit = int(min(56 * 2**20,
                         max(32 * 2**20, 2 * (io_bytes + w_bytes + tr_bytes))))

    y, x_out = pl.pallas_call(
        kernel,
        out_shape=(
            jax.ShapeDtypeStruct((B, c_out, t2), x.dtype),
            jax.ShapeDtypeStruct((B, n_cls, t_out), x.dtype),
        ),
        grid_spec=grid_spec,
        compiler_params=pltpu.CompilerParams(
            dimension_semantics=("parallel",),
            vmem_limit_bytes=vmem_limit),
    )(x, aux, w_aux, b_aux2, w_conv_flat, b_conv2, w_lin, b_lin2)
    return y, x_out


def _reference(x, aux, params, *, kernel_size, scale_factor):
    """Pure-JAX reference matching PyTorch Decoder_TCFPN.forward (eval mode)."""
    w_aux, b_aux, w_conv, b_conv, w_lin, b_lin = params
    HIGH = lax.Precision.HIGHEST
    pad = (kernel_size - 1) // 2
    scale_factor = int(scale_factor)

    x_up = jnp.repeat(x, 2, axis=-1)
    aux_p = jnp.einsum('oa,bat->bot', w_aux, aux, precision=HIGH) + b_aux[None, :, None]
    h = x_up + aux_p
    t2 = h.shape[-1]
    h_pad = jnp.pad(h, ((0, 0), (0, 0), (pad, pad)))
    y = b_conv[None, :, None]
    for dk in range(kernel_size):
        y = y + jnp.einsum('oi,bit->bot', w_conv[:, :, dk],
                           h_pad[:, :, dk:dk + t2], precision=HIGH)
    logits = jnp.einsum('no,bot->bnt', w_lin, y, precision=HIGH) + b_lin[None, :, None]
    probs = jax.nn.softmax(logits, axis=1)
    x_out = jnp.repeat(probs, scale_factor, axis=-1)
    return y, x_out


if __name__ == "__main__":
    key = jax.random.PRNGKey(0)
    # Small but lane-friendly shapes: T=64 -> hidden T2=128 and output
    # T_out=256 are multiples of 128 (unmasked, lane-dense stores).
    B, C, A, K, NCLS, SCALE, T = 2, 8, 6, 3, 8, 2, 64
    ks = jax.random.split(key, 8)
    x = jax.random.normal(ks[0], (B, C, T), dtype=jnp.float32)
    aux = jax.random.normal(ks[1], (B, A, 2 * T), dtype=jnp.float32)
    sw = 0.3
    params = (
        sw * jax.random.normal(ks[2], (C, A), dtype=jnp.float32),     # aux_conv w (out, in)
        sw * jax.random.normal(ks[3], (C,), dtype=jnp.float32),       # aux_conv b
        sw * jax.random.normal(ks[4], (C, C, K), dtype=jnp.float32),  # conv w (out, in, K)
        sw * jax.random.normal(ks[5], (C,), dtype=jnp.float32),       # conv b
        sw * jax.random.normal(ks[6], (NCLS, C), dtype=jnp.float32),  # linear w
        sw * jax.random.normal(ks[7], (NCLS,), dtype=jnp.float32),    # linear b
    )

    y, x_out = decoder_tcfpn_forward(x, aux, params, kernel_size=K, scale_factor=SCALE)
    y = jax.block_until_ready(y)
    x_out = jax.block_until_ready(x_out)

    y_ref, x_out_ref = _reference(x, aux, params, kernel_size=K, scale_factor=SCALE)

    assert y.shape == y_ref.shape and x_out.shape == x_out_ref.shape
    assert jnp.allclose(y, y_ref, atol=1e-3, rtol=1e-3), "y mismatch vs reference"
    # Slightly looser tolerance for x_out: the softmax denominator uses the
    # approximate (EUP) reciprocal.
    assert jnp.allclose(x_out, x_out_ref, atol=2e-3, rtol=2e-3), "x_out mismatch vs reference"

    print("KERNEL_OK")
</pallas_src>

<mosaic_0001>
module attributes {stable_mosaic.version = 11 : i64} {
  func.func @kernel(%arg0: i32, %arg1: memref<1x8x64xf32, #tpu.memory_space<vmem>>, %arg2: memref<1x6x128xf32, #tpu.memory_space<vmem>>, %arg3: memref<8x6xf32, #tpu.memory_space<vmem>>, %arg4: memref<8x1xf32, #tpu.memory_space<vmem>>, %arg5: memref<8x24xf32, #tpu.memory_space<vmem>>, %arg6: memref<8x1xf32, #tpu.memory_space<vmem>>, %arg7: memref<8x8xf32, #tpu.memory_space<vmem>>, %arg8: memref<8x1xf32, #tpu.memory_space<vmem>>, %arg9: memref<1x8x128xf32, #tpu.memory_space<vmem>>, %arg10: memref<1x8x256xf32, #tpu.memory_space<vmem>>, %arg11: memref<8x130xf32, #tpu.memory_space<vmem>>) attributes {dimension_semantics = [#tpu.dimension_semantics<parallel>], iteration_bounds = array<i64: 2>, scalar_prefetch = 0 : i64, scratch_operands = 1 : i64, tpu.core_type = #tpu.core_type<tc>, window_params = [{transform_indices = @transform_0, window_bounds = array<i64: 1, 8, 64>}, {transform_indices = @transform_1, window_bounds = array<i64: 1, 6, 128>}, {pipeline_mode = #tpu.pipeline_mode<synchronous>, transform_indices = @transform_2, window_bounds = array<i64: 8, 6>}, {pipeline_mode = #tpu.pipeline_mode<synchronous>, transform_indices = @transform_3, window_bounds = array<i64: 8, 1>}, {pipeline_mode = #tpu.pipeline_mode<synchronous>, transform_indices = @transform_4, window_bounds = array<i64: 8, 24>}, {pipeline_mode = #tpu.pipeline_mode<synchronous>, transform_indices = @transform_5, window_bounds = array<i64: 8, 1>}, {pipeline_mode = #tpu.pipeline_mode<synchronous>, transform_indices = @transform_6, window_bounds = array<i64: 8, 8>}, {pipeline_mode = #tpu.pipeline_mode<synchronous>, transform_indices = @transform_7, window_bounds = array<i64: 8, 1>}, {transform_indices = @transform_8, window_bounds = array<i64: 1, 8, 128>}, {transform_indices = @transform_9, window_bounds = array<i64: 1, 8, 256>}]} {
    %c0 = arith.constant 0 : index
    %c0_0 = arith.constant 0 : index
    %0 = vector.load %arg3[%c0, %c0_0] : memref<8x6xf32, #tpu.memory_space<vmem>>, vector<8x6xf32>
    %c0_1 = arith.constant 0 : index
    %c0_2 = arith.constant 0 : index
    %1 = vector.load %arg4[%c0_1, %c0_2] : memref<8x1xf32, #tpu.memory_space<vmem>>, vector<8x1xf32>
    %c0_3 = arith.constant 0 : index
    %c0_4 = arith.constant 0 : index
    %2 = vector.load %arg5[%c0_3, %c0_4] : memref<8x24xf32, #tpu.memory_space<vmem>>, vector<8x24xf32>
    %c0_5 = arith.constant 0 : index
    %c0_6 = arith.constant 0 : index
    %3 = vector.load %arg6[%c0_5, %c0_6] : memref<8x1xf32, #tpu.memory_space<vmem>>, vector<8x1xf32>
    %c0_7 = arith.constant 0 : index
    %c0_8 = arith.constant 0 : index
    %4 = vector.load %arg7[%c0_7, %c0_8] : memref<8x8xf32, #tpu.memory_space<vmem>>, vector<8x8xf32>
    %c0_9 = arith.constant 0 : index
    %c0_10 = arith.constant 0 : index
    %5 = vector.load %arg8[%c0_9, %c0_10] : memref<8x1xf32, #tpu.memory_space<vmem>>, vector<8x1xf32>
    %cst = arith.constant 0.000000e+00 : f32
    %6 = vector.broadcast %cst : f32 to vector<8x1xf32>
    %c0_11 = arith.constant 0 : index
    %c0_12 = arith.constant 0 : index
    %7 = vector.load %arg11[%c0_11, %c0_12] : memref<8x130xf32, #tpu.memory_space<vmem>>, vector<8x1xf32>
    tpu.vector_store %arg11[%c0_11, %c0_12], %6 {strides = array<i32>} : memref<8x130xf32, #tpu.memory_space<vmem>>, vector<8x1xf32>,
    %c0_13 = arith.constant 0 : index
    %c129 = arith.constant 129 : index
    %8 = vector.load %arg11[%c0_13, %c129] : memref<8x130xf32, #tpu.memory_space<vmem>>, vector<8x1xf32>
    tpu.vector_store %arg11[%c0_13, %c129], %6 {strides = array<i32>} : memref<8x130xf32, #tpu.memory_space<vmem>>, vector<8x1xf32>,
    %c0_14 = arith.constant 0 : index
    %c0_15 = arith.constant 0 : index
    %c0_16 = arith.constant 0 : index
    %9 = vector.load %arg1[%c0_14, %c0_15, %c0_16] : memref<1x8x64xf32, #tpu.memory_space<vmem>>, vector<1x8x64xf32>
    %10 = vector.shape_cast %9 : vector<1x8x64xf32> to vector<8x64xf32>
    %c0_17 = arith.constant 0 : index
    %c0_18 = arith.constant 0 : index
    %c0_19 = arith.constant 0 : index
    %11 = vector.load %arg2[%c0_17, %c0_18, %c0_19] : memref<1x6x128xf32, #tpu.memory_space<vmem>>, vector<1x6x128xf32>
    %12 = vector.shape_cast %11 : vector<1x6x128xf32> to vector<6x128xf32>
    %13 = vector.shape_cast %10 : vector<8x64xf32> to vector<8x64x1xf32>
    %14 = vector.shape_cast %13 : vector<8x64x1xf32> to vector<8x64x1xf32>
    %15 = vector.broadcast %14 : vector<8x64x1xf32> to vector<8x64x2xf32>
    %16 = vector.shape_cast %15 : vector<8x64x2xf32> to vector<8x128xf32>
    %cst_20 = arith.constant dense<0.000000e+00> : vector<8x128xf32>
    %17 = tpu.matmul %0, %12, %cst_20 {dimension_numbers = #tpu.dot_dimension_numbers<[1], [0], [0], [1], [0, 0, 1, 1], [], []>, precision = #tpu.contract_precision<fp32>} : vector<8x6xf32>, vector<6x128xf32>, vector<8x128xf32> -> vector<8x128xf32>
    %18 = arith.addf %16, %17 : vector<8x128xf32>
    %19 = vector.broadcast %1 : vector<8x1xf32> to vector<8x128xf32>
    %20 = arith.addf %18, %19 : vector<8x128xf32>
    %c0_21 = arith.constant 0 : index
    %c1 = arith.constant 1 : index
    %21 = vector.load %arg11[%c0_21, %c1] : memref<8x130xf32, #tpu.memory_space<vmem>>, vector<8x128xf32>
    tpu.vector_store %arg11[%c0_21, %c1], %20 {strides = array<i32>} : memref<8x130xf32, #tpu.memory_space<vmem>>, vector<8x128xf32>,
    %c0_22 = arith.constant 0 : index
    %c0_23 = arith.constant 0 : index
    %22 = vector.load %arg11[%c0_22, %c0_23] : memref<8x130xf32, #tpu.memory_space<vmem>>, vector<8x128xf32>
    %c0_24 = arith.constant 0 : index
    %c1_25 = arith.constant 1 : index
    %23 = vector.load %arg11[%c0_24, %c1_25] : memref<8x130xf32, #tpu.memory_space<vmem>>, vector<8x128xf32>
    %c0_26 = arith.constant 0 : index
    %c2 = arith.constant 2 : index
    %24 = vector.load %arg11[%c0_26, %c2] : memref<8x130xf32, #tpu.memory_space<vmem>>, vector<8x128xf32>
    %25 = tpu.concatenate %22, %23, %24 in 0 : vector<8x128xf32>, vector<8x128xf32>, vector<8x128xf32> -> vector<24x128xf32>
    %cst_27 = arith.constant dense<0.000000e+00> : vector<8x128xf32>
    %26 = tpu.matmul %2, %25, %cst_27 {dimension_numbers = #tpu.dot_dimension_numbers<[1], [0], [0], [1], [0, 0, 1, 1], [], []>, precision = #tpu.contract_precision<fp32>} : vector<8x24xf32>, vector<24x128xf32>, vector<8x128xf32> -> vector<8x128xf32>
    %27 = vector.broadcast %3 : vector<8x1xf32> to vector<8x128xf32>
    %28 = arith.addf %26, %27 : vector<8x128xf32>
    %c0_28 = arith.constant 0 : index
    %c0_29 = arith.constant 0 : index
    %c0_30 = arith.constant 0 : index
    %29 = vector.load %arg9[%c0_28, %c0_29, %c0_30] : memref<1x8x128xf32, #tpu.memory_space<vmem>>, vector<1x8x128xf32>
    %30 = vector.shape_cast %29 : vector<1x8x128xf32> to vector<8x128xf32>
    %31 = vector.shape_cast %28 : vector<8x128xf32> to vector<1x8x128xf32>
    tpu.vector_store %arg9[%c0_28, %c0_29, %c0_30], %31 {strides = array<i32>} : memref<1x8x128xf32, #tpu.memory_space<vmem>>, vector<1x8x128xf32>,
    %cst_31 = arith.constant dense<0.000000e+00> : vector<8x128xf32>
    %32 = tpu.matmul %4, %28, %cst_31 {dimension_numbers = #tpu.dot_dimension_numbers<[1], [0], [0], [1], [0, 0, 1, 1], [], []>, precision = #tpu.contract_precision<fp32>} : vector<8x8xf32>, vector<8x128xf32>, vector<8x128xf32> -> vector<8x128xf32>
    %33 = vector.broadcast %5 : vector<8x1xf32> to vector<8x128xf32>
    %34 = arith.addf %32, %33 : vector<8x128xf32>
    %cst_32 = arith.constant dense<0xFF800000> : vector<128xf32>
    %35 = vector.multi_reduction <maximumf>, %34, %cst_32 [0] : vector<8x128xf32> to vector<128xf32>
    %36 = vector.shape_cast %35 : vector<128xf32> to vector<1x128xf32>
    %37 = vector.broadcast %36 : vector<1x128xf32> to vector<8x128xf32>
    %38 = arith.subf %34, %37 : vector<8x128xf32>
    %39 = math.exp %38 : vector<8x128xf32>
    %cst_33 = arith.constant dense<0.000000e+00> : vector<128xf32>
    %40 = vector.multi_reduction <add>, %39, %cst_33 [0] : vector<8x128xf32> to vector<128xf32>
    %41 = vector.shape_cast %40 : vector<128xf32> to vector<1x128xf32>
    %42 = tpu.reciprocal %41 {approx = true} : vector<1x128xf32> -> vector<1x128xf32>
    %43 = vector.broadcast %42 : vector<1x128xf32> to vector<8x128xf32>
    %44 = arith.mulf %39, %43 : vector<8x128xf32>
    %45 = vector.shape_cast %44 : vector<8x128xf32> to vector<8x128x1xf32>
    %46 = vector.shape_cast %45 : vector<8x128x1xf32> to vector<8x128x1xf32>
    %47 = vector.broadcast %46 : vector<8x128x1xf32> to vector<8x128x2xf32>
    %48 = vector.shape_cast %47 : vector<8x128x2xf32> to vector<8x256xf32>
    %c0_34 = arith.constant 0 : index
    %c0_35 = arith.constant 0 : index
    %c0_36 = arith.constant 0 : index
    %49 = vector.load %arg10[%c0_34, %c0_35, %c0_36] : memref<1x8x256xf32, #tpu.memory_space<vmem>>, vector<1x8x256xf32>
    %50 = vector.shape_cast %49 : vector<1x8x256xf32> to vector<8x256xf32>
    %51 = vector.shape_cast %48 : vector<8x256xf32> to vector<1x8x256xf32>
    tpu.vector_store %arg10[%c0_34, %c0_35, %c0_36], %51 {strides = array<i32>} : memref<1x8x256xf32, #tpu.memory_space<vmem>>, vector<1x8x256xf32>,
    return
  }
  func.func @transform_0(%arg0: i32) -> (i32, i32, i32) {
    %c0_i32 = arith.constant 0 : i32
    %c0_i32_0 = arith.constant 0 : i32
    %c0_i32_1 = arith.constant 0 : i32
    return %arg0, %c0_i32, %c0_i32_0 : i32, i32, i32
  }
  func.func @transform_1(%arg0: i32) -> (i32, i32, i32) {
    %c0_i32 = arith.constant 0 : i32
    %c0_i32_0 = arith.constant 0 : i32
    %c0_i32_1 = arith.constant 0 : i32
    return %arg0, %c0_i32, %c0_i32_0 : i32, i32, i32
  }
  func.func @transform_2(%arg0: i32) -> (i32, i32) {
    %c0_i32 = arith.constant 0 : i32
    %c0_i32_0 = arith.constant 0 : i32
    %c0_i32_1 = arith.constant 0 : i32
    return %c0_i32, %c0_i32_0 : i32, i32
  }
  func.func @transform_3(%arg0: i32) -> (i32, i32) {
    %c0_i32 = arith.constant 0 : i32
    %c0_i32_0 = arith.constant 0 : i32
    %c0_i32_1 = arith.constant 0 : i32
    return %c0_i32, %c0_i32_0 : i32, i32
  }
  func.func @transform_4(%arg0: i32) -> (i32, i32) {
    %c0_i32 = arith.constant 0 : i32
    %c0_i32_0 = arith.constant 0 : i32
    %c0_i32_1 = arith.constant 0 : i32
    return %c0_i32, %c0_i32_0 : i32, i32
  }
  func.func @transform_5(%arg0: i32) -> (i32, i32) {
    %c0_i32 = arith.constant 0 : i32
    %c0_i32_0 = arith.constant 0 : i32
    %c0_i32_1 = arith.constant 0 : i32
    return %c0_i32, %c0_i32_0 : i32, i32
  }
  func.func @transform_6(%arg0: i32) -> (i32, i32) {
    %c0_i32 = arith.constant 0 : i32
    %c0_i32_0 = arith.constant 0 : i32
    %c0_i32_1 = arith.constant 0 : i32
    return %c0_i32, %c0_i32_0 : i32, i32
  }
  func.func @transform_7(%arg0: i32) -> (i32, i32) {
    %c0_i32 = arith.constant 0 : i32
    %c0_i32_0 = arith.constant 0 : i32
    %c0_i32_1 = arith.constant 0 : i32
    return %c0_i32, %c0_i32_0 : i32, i32
  }
  func.func @transform_8(%arg0: i32) -> (i32, i32, i32) {
    %c0_i32 = arith.constant 0 : i32
    %c0_i32_0 = arith.constant 0 : i32
    %c0_i32_1 = arith.constant 0 : i32
    return %arg0, %c0_i32, %c0_i32_0 : i32, i32, i32
  }
  func.func @transform_9(%arg0: i32) -> (i32, i32, i32) {
    %c0_i32 = arith.constant 0 : i32
    %c0_i32_0 = arith.constant 0 : i32
    %c0_i32_1 = arith.constant 0 : i32
    return %arg0, %c0_i32, %c0_i32_0 : i32, i32, i32
  }
}

</mosaic_0001>

<bundles_post_ra>
// kernel: tpu_custom_call.1
= control target key start
LH: loop header
LB: loop body
LE: loop exit
PB: predicated region body
PF: predicated region fallthrough
CT: control target
= control target key end

     0   :  { %s9683_s0 = inlined_call_operand.vmem [shape: f32[2,8,64], index: 0, kind: input, shape index: {}]   ;;  %s9684_s1 = inlined_call_operand.vmem [shape: f32[2,6,128], index: 1, kind: input, shape index: {}]   ;;  %s9685_s2 = inlined_call_operand.vmem [shape: f32[8,6], index: 2, kind: input, shape index: {}]   ;;  %s9686_s3 = inlined_call_operand.vmem [shape: f32[8,1], index: 3, kind: input, shape index: {}]   ;;  %s9687_s4 = inlined_call_operand.vmem [shape: f32[8,24], index: 4, kind: input, shape index: {}]   ;;  %s9688_s5 = inlined_call_operand.vmem [shape: f32[8,1], index: 5, kind: input, shape index: {}]   ;;  %s9689_s6 = inlined_call_operand.vmem [shape: f32[8,8], index: 6, kind: input, shape index: {}]   ;;  %s9690_s7 = inlined_call_operand.vmem [shape: f32[8,1], index: 7, kind: input, shape index: {}]   ;;  %s9691_s8 = inlined_call_operand.hbm [shape: f32[2,8,128], index: 8, kind: output, shape index: {0}]   ;;  %s9692_s9 = inlined_call_operand.hbm [shape: f32[2,8,256], index: 9, kind: output, shape index: {1}]  }
   0x1   :  { %9978 = sst [smem:[#allocation88_spill]] %s9683_s0 }
   0x2   :  { %9979 = sst [smem:[#allocation89_spill]] %s9684_s1 }
   0x3   :  { %9980 = sst [smem:[#allocation90_spill]] %s9685_s2 }
   0x4   :  { %9981 = sst [smem:[#allocation91_spill]] %s9686_s3 }
   0x5   :  { %9982 = sst [smem:[#allocation92_spill]] %s9687_s4 }
   0x6   :  { %9983 = sst [smem:[#allocation93_spill]] %s9688_s5 }
   0x7   :  { %9984 = sst [smem:[#allocation94_spill]] %s9689_s6 }
   0x8   :  { %9985 = sst [smem:[#allocation95_spill]] %s9690_s7 }
   0x9   :  { %9986 = sst [smem:[#allocation96_spill]] %s9691_s8 }
   0xa   :  { %9987 = sst [smem:[#allocation97_spill]] %s9692_s9 }
   0xb   :  { %15 = vsyncpa [#allocation4], 0 }
   0xc   :  { %17 = vsyncpa [#allocation4 + $0x1], 0 }
   0xd   :  { %18 = vsyncpa [#allocation6], 0 }
   0xe   :  { %20 = vsyncpa [#allocation6 + $0x1], 0  ;;  %s6448_s30 = smov 0   ;;  %s6450_s10 = smov 0  }
   0xf   :  { %s6452_s11 = smov 0   ;;  %s6454_s12 = smov 0  }
  0x10 LB: > { %9988 = sst [smem:[#allocation9_spill]] %s6315_s30  ;;  %s6469_s13 = sadd.s32 4294967295, %s6327_s12   ;;  %s6327_s12 = sphi %s6454_s12, %s10391_s12   ;;  %s6323_s11 = sphi %s6452_s11, %s10394_s11   ;;  %s6319_s10 = sphi %s6450_s10, %s10393_s10   ;;  %s6315_s30 = sphi %s6448_s30, %s10392_s30  }
  0x11   : > { %9989 = sst [smem:[#allocation10_spill]] %s6319_s10  ;;  %s5911_s14 = sadd.s32 4294967294, %s6327_s12  }
  0x12   : > { %9990 = sst [smem:[#allocation11_spill]] %s6323_s11  ;;  %s6473_s15 = sadd.s32 1, %s6327_s12  }
  0x13   : > { %9991 = sst [smem:[#allocation12_spill]] %s6327_s12  ;;  %s211_s16 = sadd.s32 1, %s6323_s11 }
  0x14   : > { %9992 = sst [smem:[#allocation13_spill]] %s6469_s13  ;;  %s208_s17 = ssub.s32 %s6327_s12, %s6473_s15 }
  0x15   : > { %9993 = sst [smem:[#allocation14_spill]] %s6473_s15  ;;  %p221_p0 = scmp.ne.s32.totalorder %s6323_s11, %s6319_s10 }
  0x16   : > { %p209_p1 = scmp.eq.s32.totalorder %s208_s17, 0  ;;  %p222_p2 = scmp.eq.s32.totalorder %s6469_s13, 1 }
  0x17   : > { %p227_p3 = scmp.ne.s32.totalorder %s6319_s10, %s6315_s30  ;;  %p228_p4 = scmp.eq.s32.totalorder %s5911_s14, 1 }
  0x18   : > { %s6484_s18 = scalar_select %p209_p1, %s6323_s11, %s211_s16  }
  0x19   : > { %p6486_p5 = por %p222_p2, %p221_p0  ;;  %p6490_p6 = por %p228_p4, %p227_p3 }
  0x1a   : > { %9994 = sst [smem:[#allocation15_spill]] %s6484_s18  ;;  %p5914_p7 = scmp.ge.s32.totalorder %s6327_s12, 1 }
  0x1b   : > { %s9995_s19 = scalar_select %p6486_p5, 1, 0 }
  0x1c   : > { %s9997_s20 = scalar_select %p6490_p6, 1, 0 }
  0x1d   : > { %9996 = sst [smem:[#allocation16_spill]] %s9995_s19  ;;  %p304_p8 = scmp.lt.s32.totalorder %s6327_s12, 3 }
  0x1e   : > { %9998 = sst [smem:[#allocation17_spill]] %s9997_s20 }
  0x1f   : > { %p305_p9 = pnand %p5914_p7, %p304_p8 }
  0x21   : > { %308 = sbr.rel (%p305_p9) target bundleno = 2711 (0xa97), region = 52 }
  0x26   : > { %v369_v0 = vlaneseq  ;;  %p348_p10 = scmp.lt.s32.totalorder %s6469_s13, 1  ;;  %s10002_s0 = sld [smem:[#allocation88_spill]]  ;;  %vm761_vm0 = vcmask 1047556   ;;  %vm1913_vm1 = vcmask 48128   ;;  %vm2038_vm2 = vcmask 1045504  }
  0x27   : > { %s9954_s26 = smov 10   ;;  %s9957_s27 = smov 4   ;;  %vm1909_vm3 = vcmask 15360   ;;  %vm1911_vm4 = vcmask 31744   ;;  %vm1915_vm5 = vcmask 64512   ;;  %vm1917_vm6 = vcmask 80896  }
  0x28   : > { %v6497_v1 = vshrl.u32 %v369_v0, 7  ;;  %s6500_s21 = scalar_select %p348_p10, %s6469_s13, 1  ;;  %vm9977_vm7 = vcmask 97280   ;;  %vm9847_vm8 = vcmask 113664   ;;  %vm9841_vm9 = vcmask 130048  }
  0x29   : > { %s9956_s28 = smov 2   ;;  %s9732_s29 = smov 16   ;;  %vm9835_vm10 = vcmask 146432   ;;  %vm9832_vm11 = vcmask 162816   ;;  %vm9830_vm12 = vcmask 179200   ;;  %vm1931_vm13 = vcmask 195584  }
  0x2a   : > { %9999 = vst [vmem:[#allocation18_spill] sm:$0xff] %v6497_v1  ;;  %v6503_v2 = vadd.s32 32, %v6497_v1  ;;  %v6506_v3 = vadd.s32 16, %v6497_v1  ;;  %s5917_s22 = sshll.u32 %s6500_s21, 3  ;;  %v6525_v7 = vadd.s32 8, %v6497_v1  ;;  %v6528_v8 = vadd.s32 40, %v6497_v1 }
  0x2b   : > { %v6531_v9 = vadd.s32 24, %v6497_v1  ;;  %v6540_v11 = vadd.s32 56, %v6497_v1  ;;  %v6543_v12 = vadd.s32 48, %v6497_v1  ;;  %s9953_s14 = smov 8   ;;  %s9958_s16 = smov 6   ;;  %vm9831_vm14 = vcmask 211968  }
  0x2c   : > { %10000 = vst [vmem:[#allocation19_spill] sm:$0xff] %v6503_v2  ;;  %s351_s25 = scalar_lea.vmem %s10002_s0, %s5917_s22  ;;  %6062 = vset.pattern.permute.xlu0 %v6503_v2  ;;  %6042 = vset.pattern.permute.xlu2 %v6503_v2  ;;  %s9724_s17 = smov 22   ;;  %vm9833_vm15 = vcmask 228352  }
  0x2d   : > { %10001 = vst [vmem:[#allocation20_spill] sm:$0xff] %v6506_v3  ;;  %6040 = vset.pattern.permute.xlu1 %v6506_v3  ;;  %v6517_v4 = vld [vmem:[%s351_s25] sm:$0xff]  ;;  %s9730_s23 = smov 14   ;;  %s9955_s24 = smov 12  }
  0x2e   : > { %v6520_v5 = vperm.slane %v6517_v4, 3  ;;  %v368_v6 = vperm.slane %v6517_v4, 0  ;;  %10003 = vst [vmem:[#allocation21_spill] sm:$0xff] %v6525_v7  ;;  %v6537_v10 = vperm.slane %v6517_v4, 4  ;;  %v417_v13 = vperm.slane %v6517_v4, 1  ;;  %s9726_s25 = smov 28  }
  0x2f   : > { %10004 = vst [vmem:[#allocation22_spill] sm:$0xff] %v6528_v8  ;;  %v6555_v14 = vperm.slane %v6517_v4, 5  ;;  %v6564_v15 = vperm.slane %v6517_v4, 6  ;;  %v466_v16 = vperm.slane %v6517_v4, 2  ;;  %v6578_v17 = vperm.slane %v6517_v4, 7  ;;  %s10032_s1 = sld [smem:[#allocation89_spill]] }
  0x30   : > { %10005 = vst [vmem:[#allocation23_spill] sm:$0xff] %v6531_v9  ;;  %s10033_s2 = sld [smem:[#allocation90_spill]]  ;;  %s9788_s21 = smov 94  }
  0x31   : > { %10006 = vst [vmem:[#allocation24_spill] sm:$0xff] %v6540_v11  ;;  %s10040_s3 = sld [smem:[#allocation91_spill]]  ;;  %s10133_s0 = smov 32  }
  0x32   : > { %10007 = vst [vmem:[#allocation25_spill] sm:$0xff] %v6543_v12  ;;  %s10041_s5 = sld [smem:[#allocation93_spill]]  ;;  %s10141_s18 = smov 52  }
  0x33   : > { %s10043_s7 = sld [smem:[#allocation95_spill]]  ;;  %s10142_s11 = smov 50  }
  0x34   : > { %544 = vperm.xlu0 %6062, %v6520_v5   ;;  %397 = vperm.xlu2 %6042, %v368_v6   ;;  %s10045_s4 = sld [smem:[#allocation92_spill]]  ;;  %s10144_s15 = smov 58  }
  0x35   : > { %385 = vperm.xlu1 %6040, %v368_v6   ;;  %s10046_s6 = sld [smem:[#allocation94_spill]]  ;;  %s10145_s20 = smov 56  }
  0x36   : > { %s10147_s30 = smov 66   ;;  %s10148_s12 = smov 64  }
  0x37   : > { %s10149_s9 = smov 62   ;;  %s10152_s19 = smov 72  }
  0x38   : > { %s10153_s8 = smov 70   ;;  %s10155_s13 = smov 78  }
  0x3c   : > { %6063 = vset.pattern.permute.xlu0 %v6525_v7  ;;  %6043 = vset.pattern.permute.xlu2 %v6528_v8 }
  0x3d   : > { %6041 = vset.pattern.permute.xlu1 %v6531_v9 }
  0x44   : > { %379 = vperm.xlu0 %6063, %v368_v6   ;;  %403 = vperm.xlu2 %6043, %v368_v6  }
  0x45   : > { %391 = vperm.xlu1 %6041, %v368_v6  }
  0x4c   : > { %575 = vperm.xlu0 %6063, %v6537_v10   ;;  %6045 = vset.pattern.permute.xlu2 %v6540_v11 }
  0x4d   : > { %6044 = vset.pattern.permute.xlu1 %v6543_v12 }
  0x54   : > { %6072 = vset.pattern.permute.xlu0 %v6543_v12  ;;  %415 = vperm.xlu2 %6045, %v368_v6  }
  0x55   : > { %409 = vperm.xlu1 %6044, %v368_v6  }
  0x5c   : > { %605 = vperm.xlu0 %6072, %v6537_v10   ;;  %6047 = vset.pattern.permute.xlu2 %v6506_v3 }
  0x5d   : > { %6046 = vset.pattern.permute.xlu1 %v6525_v7 }
  0x64   : > { %6077 = vset.pattern.permute.xlu0 %v6531_v9  ;;  %434 = vperm.xlu2 %6047, %v417_v13  }
  0x65   : > { %428 = vperm.xlu1 %6046, %v417_v13  }
  0x6c   : > { %636 = vperm.xlu0 %6077, %v6555_v14   ;;  %6049 = vset.pattern.permute.xlu2 %v6503_v2 }
  0x6d   : > { %6048 = vset.pattern.permute.xlu1 %v6531_v9 }
  0x74   : > { %6078 = vset.pattern.permute.xlu0 %v6497_v1  ;;  %446 = vperm.xlu2 %6049, %v417_v13  }
  0x75   : > { %440 = vperm.xlu1 %6048, %v417_v13  }
  0x7c   : > { %373 = vperm.xlu0 %6078, %v368_v6   ;;  %6051 = vset.pattern.permute.xlu2 %v6540_v11 }
  0x7d   : > { %6050 = vset.pattern.permute.xlu1 %v6543_v12 }
  0x84   : > { %422 = vperm.xlu0 %6078, %v417_v13   ;;  %464 = vperm.xlu2 %6051, %v417_v13  }
  0x85   : > { %458 = vperm.xlu1 %6050, %v417_v13  }
  0x8c   : > { %667 = vperm.xlu0 %6078, %v6564_v15   ;;  %6053 = vset.pattern.permute.xlu2 %v6525_v7 }
  0x8d   : > { %6052 = vset.pattern.permute.xlu1 %v6497_v1 }
  0x8e   : > { %v6615_v18 = vpop.permute.xlu2 %397 }
  0x94   : > { %6083 = vset.pattern.permute.xlu0 %v6528_v8  ;;  %477 = vperm.xlu2 %6053, %v466_v16  }
  0x95   : > { %471 = vperm.xlu1 %6052, %v466_v16  }
  0x9c   : > { %452 = vperm.xlu0 %6083, %v417_v13   ;;  %6055 = vset.pattern.permute.xlu2 %v6503_v2 }
  0x9d   : > { %6054 = vset.pattern.permute.xlu1 %v6531_v9 }
  0x9e   : > { %v6619_v19 = vpop.permute.xlu2 %403 }
  0x9f   : > { %10008 = vst [vmem:[#allocation26_spill] sm:$0xff] %v6619_v19 }
  0xa4   : > { %697 = vperm.xlu0 %6083, %v6564_v15   ;;  %495 = vperm.xlu2 %6055, %v466_v16  }
  0xa5   : > { %489 = vperm.xlu1 %6054, %v466_v16  }
  0xa6   : > { %v6693_v43 = vpop.permute.xlu0 %544 }
  0xa7   : > { %v6631_v22 = vpop.permute.xlu1 %385 }
  0xac   : > { %6088 = vset.pattern.permute.xlu0 %v6506_v3  ;;  %6057 = vset.pattern.permute.xlu2 %v6543_v12 }
  0xad   : > { %6056 = vset.pattern.permute.xlu1 %v6528_v8 }
  0xae   : > { %v6623_v20 = vpop.permute.xlu2 %415 }
  0xaf   : > { %10009 = vst [vmem:[#allocation27_spill] sm:$0xff] %v6623_v20 }
  0xb4   : > { %483 = vperm.xlu0 %6088, %v466_v16   ;;  %507 = vperm.xlu2 %6057, %v466_v16  }
  0xb5   : > { %501 = vperm.xlu1 %6056, %v466_v16  }
  0xb6   : > { %v6703_v47 = vpop.permute.xlu0 %379 }
  0xb7   : > { %v6637_v24 = vpop.permute.xlu1 %391 }
  0xbc   : > { %728 = vperm.xlu0 %6088, %v6578_v17   ;;  %6059 = vset.pattern.permute.xlu2 %v6525_v7 }
  0xbd   : > { %6058 = vset.pattern.permute.xlu1 %v6497_v1 }
  0xbe   : > { %v6627_v21 = vpop.permute.xlu2 %434  ;;  %v6710_v50 = vpop.permute.xlu0 %575 }
  0xc4   : > { %6093 = vset.pattern.permute.xlu0 %v6540_v11  ;;  %526 = vperm.xlu2 %6059, %v6520_v5  }
  0xc5   : > { %520 = vperm.xlu1 %6058, %v6520_v5  }
  0xc7   : > { %v6643_v26 = vpop.permute.xlu1 %409 }
  0xc8   : > { %10011 = vst [vmem:[#allocation29_spill] sm:$0xff] %v6643_v26 }
  0xcc   : > { %513 = vperm.xlu0 %6093, %v466_v16   ;;  %6061 = vset.pattern.permute.xlu2 %v6531_v9 }
  0xcd   : > { %6060 = vset.pattern.permute.xlu1 %v6506_v3 }
  0xce   : > { %v6633_v23 = vpop.permute.xlu2 %446  ;;  %v6716_v53 = vpop.permute.xlu0 %605 }
  0xcf   : > { %10017 = vst [vmem:[#allocation35_spill] sm:$0xff] %v6716_v53 }
  0xd4   : > { %538 = vperm.xlu2 %6061, %v6520_v5   ;;  %758 = vperm.xlu0 %6093, %v6578_v17  }
  0xd5   : > { %532 = vperm.xlu1 %6060, %v6520_v5  }
  0xd7   : > { %v6647_v27 = vpop.permute.xlu1 %428 }
  0xdc   : > { %6065 = vset.pattern.permute.xlu2 %v6543_v12 }
  0xdd   : > { %6064 = vset.pattern.permute.xlu1 %v6528_v8 }
  0xde   : > { %v6640_v25 = vpop.permute.xlu2 %464  ;;  %v6722_v56 = vpop.permute.xlu0 %636 }
  0xdf   : > { %10010 = vst [vmem:[#allocation28_spill] sm:$0xff] %v6640_v25 }
  0xe4   : > { %556 = vperm.xlu2 %6065, %v6520_v5  }
  0xe5   : > { %550 = vperm.xlu1 %6064, %v6520_v5  }
  0xe7   : > { %v6653_v29 = vpop.permute.xlu1 %440 }
  0xec   : > { %6067 = vset.pattern.permute.xlu2 %v6497_v1 }
  0xed   : > { %6066 = vset.pattern.permute.xlu1 %v6540_v11 }
  0xee   : > { %v6649_v28 = vpop.permute.xlu2 %477  ;;  %v374_v60 = vpop.permute.xlu0 %373 }
  0xf4   : > { %569 = vperm.xlu2 %6067, %v6537_v10  }
  0xf5   : > { %562 = vperm.xlu1 %6066, %v6520_v5  }
  0xf6   : > { %v423_v63 = vpop.permute.xlu0 %422 }
  0xf7   : > { %v6659_v31 = vpop.permute.xlu1 %458  ;;  %v775_v13 = vrot.slane %v423_v63, 4 }
  0xf8   : > { %10012 = vst [vmem:[#allocation30_spill] sm:$0xff] %v6659_v31 }
  0xfc   : > { %6069 = vset.pattern.permute.xlu2 %v6531_v9 }
  0xfd   : > { %6068 = vset.pattern.permute.xlu1 %v6506_v3 }
  0xfe   : > { %v6655_v30 = vpop.permute.xlu2 %495  ;;  %v668_v6 = vpop.permute.xlu0 %667 }
  0xff   : > { %v785_v20 = vrot.slane %v668_v6, 4 }
 0x104   : > { %587 = vperm.xlu2 %6069, %v6537_v10  }
 0x105   : > { %581 = vperm.xlu1 %6068, %v6537_v10  }
 0x107   : > { %v6665_v33 = vpop.permute.xlu1 %471 }
 0x10c   : > { %6071 = vset.pattern.permute.xlu2 %v6528_v8 }
 0x10d   : > { %6070 = vset.pattern.permute.xlu1 %v6503_v2 }
 0x10e   : > { %v6661_v32 = vpop.permute.xlu2 %507 }
 0x10f   : > { %10013 = vst [vmem:[#allocation31_spill] sm:$0xff] %v6661_v32 }
 0x114   : > { %599 = vperm.xlu2 %6071, %v6537_v10  }
 0x115   : > { %593 = vperm.xlu1 %6070, %v6537_v10  }
 0x117   : > { %v6671_v35 = vpop.permute.xlu1 %489 }
 0x11c   : > { %6074 = vset.pattern.permute.xlu2 %v6497_v1 }
 0x11d   : > { %6073 = vset.pattern.permute.xlu1 %v6540_v11 }
 0x11e   : > { %v6667_v34 = vpop.permute.xlu2 %526 }
 0x124   : > { %618 = vperm.xlu2 %6074, %v6555_v14  }
 0x125   : > { %611 = vperm.xlu1 %6073, %v6537_v10  }
 0x127   : > { %v6677_v37 = vpop.permute.xlu1 %501 }
 0x12c   : > { %6076 = vset.pattern.permute.xlu2 %v6506_v3 }
 0x12d   : > { %6075 = vset.pattern.permute.xlu1 %v6525_v7 }
 0x12e   : > { %v6673_v36 = vpop.permute.xlu2 %538 }
 0x134   : > { %630 = vperm.xlu2 %6076, %v6555_v14  }
 0x135   : > { %624 = vperm.xlu1 %6075, %v6555_v14  }
 0x137   : > { %v521_v39 = vpop.permute.xlu1 %520 }
 0x138   : > { %v773_v16 = vrot.slane %v521_v39, 4 }
 0x13c   : > { %6080 = vset.pattern.permute.xlu2 %v6528_v8 }
 0x13d   : > { %6079 = vset.pattern.permute.xlu1 %v6503_v2 }
 0x13e   : > { %v6679_v38 = vpop.permute.xlu2 %556 }
 0x13f   : > { %10014 = vst [vmem:[#allocation32_spill] sm:$0xff] %v6679_v38 }
 0x144   : > { %648 = vperm.xlu2 %6080, %v6555_v14  }
 0x145   : > { %642 = vperm.xlu1 %6079, %v6555_v14  }
 0x147   : > { %v6687_v41 = vpop.permute.xlu1 %532 }
 0x14c   : > { %6082 = vset.pattern.permute.xlu2 %v6540_v11 }
 0x14d   : > { %6081 = vset.pattern.permute.xlu1 %v6543_v12 }
 0x14e   : > { %v6683_v40 = vpop.permute.xlu2 %569 }
 0x154   : > { %660 = vperm.xlu2 %6082, %v6555_v14  }
 0x155   : > { %654 = vperm.xlu1 %6081, %v6555_v14   ;;  %v6329_v14 = vmov 1983009808  }
 0x157   : > { %v6695_v44 = vpop.permute.xlu1 %550 }
 0x15c   : > { %6085 = vset.pattern.permute.xlu2 %v6506_v3  ;;  %v760_v3 = vrot.slane %v6665_v33, 4 }
 0x15d   : > { %6084 = vset.pattern.permute.xlu1 %v6525_v7 }
 0x15e   : > { %v6689_v42 = vpop.permute.xlu2 %587 }
 0x164   : > { %679 = vperm.xlu2 %6085, %v6564_v15  }
 0x165   : > { %673 = vperm.xlu1 %6084, %v6564_v15  }
 0x167   : > { %v6701_v46 = vpop.permute.xlu1 %562 }
 0x168   : > { %10016 = vst [vmem:[#allocation34_spill] sm:$0xff] %v6701_v46  ;;  %v786_v46 = vsel %vm761_vm0, %v785_v20, %v6683_v40 }
 0x16c   : > { %6087 = vset.pattern.permute.xlu2 %v6503_v2 }
 0x16d   : > { %6086 = vset.pattern.permute.xlu1 %v6531_v9 }
 0x16e   : > { %v6697_v45 = vpop.permute.xlu2 %599 }
 0x16f   : > { %10015 = vst [vmem:[#allocation33_spill] sm:$0xff] %v6697_v45 }
 0x174   : > { %691 = vperm.xlu2 %6087, %v6564_v15  }
 0x175   : > { %685 = vperm.xlu1 %6086, %v6564_v15  }
 0x177   : > { %v6708_v49 = vpop.permute.xlu1 %581 }
 0x17c   : > { %6090 = vset.pattern.permute.xlu2 %v6540_v11  ;;  %v776_v11 = vsel %vm761_vm0, %v521_v39, %v775_v13  ;;  %v762_v39 = vsel %vm761_vm0, %v760_v3, %v374_v60 }
 0x17d   : > { %6089 = vset.pattern.permute.xlu1 %v6543_v12 }
 0x17e   : > { %v6705_v48 = vpop.permute.xlu2 %618 }
 0x184   : > { %709 = vperm.xlu2 %6090, %v6564_v15  }
 0x185   : > { %703 = vperm.xlu1 %6089, %v6564_v15   ;;  %v766_v15 = vunpack.c.l.s4 %v6329_v14 }
 0x187   : > { %v6714_v52 = vpop.permute.xlu1 %593 }
 0x18c   : > { %6092 = vset.pattern.permute.xlu2 %v6525_v7 }
 0x18d   : > { %6091 = vset.pattern.permute.xlu1 %v6497_v1 }
 0x18e   : > { %v6712_v51 = vpop.permute.xlu2 %630 }
 0x194   : > { %722 = vperm.xlu2 %6092, %v6578_v17  }
 0x195   : > { %716 = vperm.xlu1 %6091, %v6578_v17  }
 0x197   : > { %v6718_v54 = vpop.permute.xlu1 %611 }
 0x198   : > { %10018 = vst [vmem:[#allocation36_spill] sm:$0xff] %v6718_v54  ;;  %v885_v54 = vrot.slane %v6667_v34, 4 }
 0x19c   : > { %6095 = vset.pattern.permute.xlu2 %v6503_v2  ;;  %v6750_v2 = vpop.permute.xlu0 %452 }
 0x19d   : > { %6094 = vset.pattern.permute.xlu1 %v6531_v9  ;;  %v774_v9 = vsel %vm761_vm0, %v773_v16, %v423_v63 }
 0x19e   : > { %v6720_v55 = vpop.permute.xlu2 %648 }
 0x1a4   : > { %740 = vperm.xlu2 %6095, %v6578_v17   ;;  %v6789_v31 = vpop.permute.xlu0 %697 }
 0x1a5   : > { %734 = vperm.xlu1 %6094, %v6578_v17  }
 0x1a7   : > { %v6724_v57 = vpop.permute.xlu1 %624 }
 0x1ac   : > { %6097 = vset.pattern.permute.xlu2 %v6543_v12  ;;  %v763_v12 = vrot.slane %v374_v60, 4  ;;  %v799_v60 = vrot.slane %v6705_v48, 4 }
 0x1ad   : > { %6096 = vset.pattern.permute.xlu1 %v6528_v8  ;;  %v6745_v8 = vunpack.c.0.s8 %v766_v15  ;;  %v6330_v15 = vmov 1934713408  }
 0x1ae   : > { %v6726_v58 = vpop.permute.xlu2 %660  ;;  %v764_v13 = vsel %vm761_vm0, %v6665_v33, %v763_v12  ;;  %v814_v16 = vunpack.c.l.s4 %v6330_v15 }
 0x1af   : > { %10019 = vst [vmem:[#allocation37_spill] sm:$0xff] %v6726_v58  ;;  %v6753_v7 = vperm.slane %v776_v11, %v6745_v8  ;;  %v780_v25 = vperm.slane %v774_v9, %v6745_v8  ;;  %v787_v58 = vrot.slane %v6683_v40, 4  ;;  %v768_v3 = vperm.slane %v762_v39, %v6745_v8 }
 0x1b0   : > { %v6771_v12 = vperm.slane %v764_v13, %v6745_v8  ;;  %v6777_v15 = vunpack.c.0.s8 %v814_v16  ;;  %v792_v40 = vperm.slane %v786_v46, %v6745_v8  ;;  %v873_v13 = vrot.slane %v6649_v28, 4 }
 0x1b1   : > { %v821_v11 = vrot.slane %v6753_v7, 4  ;;  %v809_v33 = vrot.slane %v780_v25, 4  ;;  %v788_v20 = vsel %vm761_vm0, %v668_v6, %v787_v58  ;;  %v811_v53 = vrot.slane %v768_v3, 4 }
 0x1b2   : > { %v835_v32 = vrot.slane %v792_v40, 4 }
 0x1b3   : > { %v822_v39 = vsel %vm761_vm0, %v821_v11, %v6771_v12  ;;  %v810_v46 = vsel %vm761_vm0, %v809_v33, %v768_v3  ;;  %v796_v11 = vperm.slane %v788_v20, %v6745_v8  ;;  %v812_v3 = vsel %vm761_vm0, %v780_v25, %v811_v53 }
 0x1b4   : > { %752 = vperm.xlu2 %6097, %v6578_v17   ;;  %v820_v25 = vperm.slane %v812_v3, %v6777_v15 }
 0x1b5   : > { %746 = vperm.xlu1 %6096, %v6578_v17  }
 0x1b7   : > { %v6728_v59 = vpop.permute.xlu1 %642 }
 0x1bd   : > { %6100 = vset.pattern.permute.xlu1 %v6497_v1 }
 0x1be   : > { %v6730_v61 = vpop.permute.xlu2 %679 }
 0x1c7   : > { %v6732_v62 = vpop.permute.xlu1 %654 }
 0x1c8   : > { %10020 = vst [vmem:[#allocation38_spill] sm:$0xff] %v6732_v62 }
 0x1ce   : > { %v6734_v0 = vpop.permute.xlu2 %691 }
 0x1d7   : > { %v6736_v4 = vpop.permute.xlu1 %673 }
 0x1d8   : > { %v897_v9 = vrot.slane %v6736_v4, 4 }
 0x1de   : > { %v6738_v5 = vpop.permute.xlu2 %709 }
 0x1df   : > { %10021 = vst [vmem:[#allocation39_spill] sm:$0xff] %v6738_v5  ;;  %v886_v5 = vsel %vm761_vm0, %v885_v54, %v6647_v27 }
 0x1e0   : > { %v892_v6 = vperm.slane %v886_v5, %v6745_v8  ;;  %v6805_v5 = vperm.slane %v810_v46, %v6777_v15 }
 0x1e7   : > { %v6740_v10 = vpop.permute.xlu1 %685 }
 0x1ee   : > { %v6742_v17 = vpop.permute.xlu2 %722 }
 0x1ef   : > { %v909_v1 = vrot.slane %v6742_v17, 4 }
 0x1f1   : > { %v910_v63 = vsel %vm761_vm0, %v909_v1, %v6724_v57 }
 0x1f2   : > { %v6774_v1 = vperm.slane %v910_v63, %v6745_v8  ;;  %v898_v63 = vsel %vm761_vm0, %v897_v9, %v6710_v50  ;;  %v828_v9 = vperm.slane %v822_v39, %v6777_v15 }
 0x1f4   : > { %v945_v54 = vrot.slane %v6774_v1, 4 }
 0x1f7   : > { %v6755_v14 = vpop.permute.xlu1 %703 }
 0x1f8   : > { %10022 = vst [vmem:[#allocation40_spill] sm:$0xff] %v6755_v14 }
 0x207   : > { %v717_v62 = vpop.permute.xlu1 %716 }
 0x208   : > { %v797_v38 = vrot.slane %v717_v62, 4  ;;  %v800_v16 = vsel %vm761_vm0, %v717_v62, %v799_v60  ;;  %v904_v62 = vperm.slane %v898_v63, %v6745_v8  ;;  %v867_v63 = vrot.slane %v828_v9, 4 }
 0x209   : > { %v808_v58 = vperm.slane %v800_v16, %v6745_v8  ;;  %v874_v16 = vsel %vm761_vm0, %v873_v13, %v6703_v47  ;;  %v921_v13 = vrot.slane %v892_v6, 4 }
 0x20a   : > { %v798_v26 = vsel %vm761_vm0, %v797_v38, %v6705_v48  ;;  %v946_v48 = vsel %vm761_vm0, %v945_v54, %v904_v62  ;;  %v880_v45 = vperm.slane %v874_v16, %v6745_v8  ;;  %v875_v54 = vrot.slane %v6703_v47, 4 }
 0x20b   : > { %v804_v60 = vperm.slane %v798_v26, %v6745_v8  ;;  %v845_v14 = vrot.slane %v808_v58, 4  ;;  %v899_v16 = vrot.slane %v6710_v50, 4 }
 0x20c   : > { %v923_v3 = vrot.slane %v880_v45, 4  ;;  %v922_v47 = vsel %vm761_vm0, %v921_v13, %v880_v45  ;;  %v876_v50 = vsel %vm761_vm0, %v6649_v28, %v875_v54  ;;  %v947_v13 = vrot.slane %v904_v62, 4 }
 0x20d   : > { %v833_v33 = vrot.slane %v804_v60, 4  ;;  %v846_v20 = vsel %vm761_vm0, %v845_v14, %v796_v11  ;;  %v836_v38 = vsel %vm761_vm0, %v804_v60, %v835_v32  ;;  %v6820_v32 = vperm.slane %v946_v48, %v6777_v15 }
 0x20e   : > { %v852_v39 = vperm.slane %v846_v20, %v6777_v15  ;;  %v844_v26 = vperm.slane %v836_v38, %v6777_v15  ;;  %v859_v60 = vrot.slane %v6805_v5, 4  ;;  %v911_v38 = vrot.slane %v6724_v57, 4 }
 0x20f   : > { %v834_v53 = vsel %vm761_vm0, %v833_v33, %v792_v40  ;;  %v6827_v33 = vpop.permute.xlu0 %483  ;;  %v900_v48 = vsel %vm761_vm0, %v6736_v4, %v899_v16  ;;  %v823_v57 = vrot.slane %v6771_v12, 4  ;;  %v887_v16 = vrot.slane %v6647_v27, 4 }
 0x210   : > { %v868_v46 = vsel %vm761_vm0, %v852_v39, %v867_v63  ;;  %v861_v19 = vrot.slane %v844_v26, 4  ;;  %v6817_v14 = vperm.slane %v834_v53, %v6777_v15  ;;  %v847_v63 = vrot.slane %v796_v11, 4 }
 0x211   : > { %1674 = vrot.lane.b32.xlu0 %v868_v46, %s9954_s26  ;;  %v912_v53 = vsel %vm761_vm0, %v6742_v17, %v911_v38  ;;  %v6843_v46 = vperm.slane %v922_v47, %v6777_v15  ;;  %v865_v45 = vrot.slane %v852_v39, 4  ;;  %v6847_v4 = vperm.slane %v900_v48, %v6745_v8 }
 0x212   : > { %v862_v40 = vsel %vm761_vm0, %v861_v19, %v820_v25  ;;  %v860_v20 = vsel %vm761_vm0, %v6817_v14, %v859_v60  ;;  %v969_v19 = vrot.slane %v6820_v32, 4  ;;  %v924_v60 = vsel %vm761_vm0, %v892_v6, %v923_v3 }
 0x213   : > { %1662 = vrot.lane.b32.xlu2 %v862_v40, %s9957_s27  ;;  %1658 = vrot.lane.b32.xlu1 %v860_v20, %s9956_s28  ;;  %v997_v28 = vrot.slane %v6687_v41, 4  ;;  %v848_v17 = vsel %vm761_vm0, %v808_v58, %v847_v63  ;;  %v824_v39 = vsel %vm761_vm0, %v6753_v7, %v823_v57  ;;  %v6858_v12 = vperm.slane %v912_v53, %v6745_v8 }
 0x214   : > { %v970_v11 = vsel %vm761_vm0, %v969_v19, %v6843_v46  ;;  %v863_v62 = vrot.slane %v820_v25, 4  ;;  %v948_v27 = vsel %vm761_vm0, %v6774_v1, %v947_v13  ;;  %v884_v6 = vperm.slane %v876_v50, %v6745_v8 }
 0x215   : > { %v866_v54 = vsel %vm761_vm0, %v865_v45, %v828_v9  ;;  %v6866_v40 = vperm.slane %v924_v60, %v6777_v15  ;;  %v888_v7 = vsel %vm761_vm0, %v6667_v34, %v887_v16  ;;  %v959_v3 = vrot.slane %v6847_v4, 4 }
 0x216   : > { %v864_v25 = vsel %vm761_vm0, %v844_v26, %v863_v62  ;;  %v856_v1 = vperm.slane %v848_v17, %v6777_v15  ;;  %v998_v9 = vsel %vm761_vm0, %v997_v28, %v6627_v21  ;;  %v956_v47 = vperm.slane %v948_v27, %v6777_v15 }
 0x217   : > { %v729_v58 = vpop.permute.xlu0 %728  ;;  %v832_v34 = vperm.slane %v824_v39, %v6777_v15  ;;  %v960_v38 = vsel %vm761_vm0, %v6858_v12, %v959_v3  ;;  %v985_v48 = vrot.slane %v6827_v33, 4  ;;  %v1023_v26 = vrot.slane %v6712_v51, 4 }
 0x218   : > { %v1021_v20 = vrot.slane %v729_v58, 4  ;;  %v1009_v19 = vrot.slane %v6730_v61, 4  ;;  %v975_v50 = vrot.slane %v6866_v40, 4  ;;  %v935_v63 = vrot.slane %v884_v6, 4 }
 0x219   : > { %1686 = vrot.lane.b32.xlu0 %v970_v11, %s9732_s29  ;;  %v896_v53 = vperm.slane %v888_v7, %v6745_v8  ;;  %v6887_v45 = vperm.slane %v998_v9, %v6745_v8  ;;  %v869_v57 = vrot.slane %v856_v1, 4  ;;  %v871_v16 = vrot.slane %v832_v34, 4  ;;  %s9756_s29 = smov 24  }
 0x21a   : > { %v1022_v13 = vsel %vm761_vm0, %v1021_v20, %v6712_v51  ;;  %v976_v60 = vsel %vm761_vm0, %v956_v47, %v975_v50  ;;  %v6893_v28 = vperm.slane %v960_v38, %v6777_v15  ;;  %v986_v11 = vsel %vm761_vm0, %v985_v48, %v6631_v22 }
 0x21b   : > { %1670 = vrot.lane.b32.xlu2 %v866_v54, %s9953_s14  ;;  %1666 = vrot.lane.b32.xlu1 %v864_v25, %s9958_s16  ;;  %v1024_v17 = vsel %vm761_vm0, %v729_v58, %v1023_v26  ;;  %v1010_v39 = vsel %vm761_vm0, %v1009_v19, %v6708_v49  ;;  %v872_v62 = vsel %vm761_vm0, %v856_v1, %v871_v16  ;;  %v1033_v51 = vrot.slane %v6887_v45, 4 }
 0x21c   : > { %v6904_v27 = vperm.slane %v1022_v13, %v6745_v8  ;;  %v870_v54 = vsel %vm761_vm0, %v869_v57, %v832_v34  ;;  %v936_v7 = vsel %vm761_vm0, %v896_v53, %v935_v63  ;;  %v933_v3 = vrot.slane %v896_v53, 4 }
 0x21d   : > { %v1011_v58 = vrot.slane %v6708_v49, 4  ;;  %v957_v25 = vrot.slane %v6858_v12, 4  ;;  %v981_v1 = vrot.slane %v6893_v28, 4  ;;  %v6914_v20 = vperm.slane %v986_v11, %v6745_v8 }
 0x21e   : > { %v6917_v9 = vperm.slane %v1024_v17, %v6745_v8  ;;  %v6920_v34 = vperm.slane %v1010_v39, %v6745_v8  ;;  %v999_v38 = vrot.slane %v6627_v21, 4  ;;  %v6926_v12 = vperm.slane %v936_v7, %v6777_v15 }
 0x21f   : > { %v1012_v49 = vsel %vm761_vm0, %v6730_v61, %v1011_v58  ;;  %v973_v48 = vrot.slane %v956_v47, 4  ;;  %v1057_v26 = vrot.slane %v6904_v27, 4  ;;  %v1034_v19 = vsel %vm761_vm0, %v1033_v51, %v6914_v20 }
 0x220   : > { %v1000_v50 = vsel %vm761_vm0, %v6687_v41, %v999_v38  ;;  %v982_v63 = vsel %vm761_vm0, %v981_v1, %v6926_v12  ;;  %v934_v21 = vsel %vm761_vm0, %v933_v3, %v884_v6  ;;  %v958_v61 = vsel %vm761_vm0, %v957_v25, %v6847_v4 }
 0x221   : > { %1698 = vrot.lane.b32.xlu0 %v976_v60, %s9724_s17  ;;  %v1069_v53 = vrot.slane %v6917_v9, 4  ;;  %v1020_v47 = vperm.slane %v1012_v49, %v6745_v8  ;;  %v971_v57 = vrot.slane %v6843_v46, 4  ;;  %v1058_v41 = vsel %vm761_vm0, %v1057_v26, %v6920_v34  ;;  %s9728_s17 = smov 20  }
 0x222   : > { %v974_v13 = vsel %vm761_vm0, %v973_v48, %v6866_v40  ;;  %v1040_v6 = vperm.slane %v1034_v19, %v6777_v15  ;;  %v1008_v60 = vperm.slane %v1000_v50, %v6745_v8  ;;  %v964_v16 = vperm.slane %v958_v61, %v6777_v15 }
 0x223   : > { %1682 = vrot.lane.b32.xlu2 %v872_v62, %s9730_s23  ;;  %1678 = vrot.lane.b32.xlu1 %v870_v54, %s9955_s24  ;;  %v972_v4 = vsel %vm761_vm0, %v6820_v32, %v971_v57  ;;  %v987_v46 = vrot.slane %v6631_v22, 4  ;;  %v1064_v11 = vperm.slane %v1058_v41, %v6777_v15  ;;  %v940_v40 = vperm.slane %v934_v21, %v6777_v15  ;;  %v735_v54 = vpop.permute.xlu1 %734  ;;  %s9738_s23 = smov 26  }
 0x224   : > { %v1070_v17 = vsel %vm761_vm0, %v1069_v53, %v1020_v47  ;;  %v1083_v62 = vrot.slane %v1040_v6, 4  ;;  %v1045_v51 = vrot.slane %v1008_v60, 4  ;;  %v977_v32 = vrot.slane %v964_v16, 4 }
 0x225   : > { %v988_v39 = vsel %vm761_vm0, %v6827_v33, %v987_v46  ;;  %v1121_v7 = vrot.slane %v6740_v10, 4  ;;  %v979_v3 = vrot.slane %v940_v40, 4  ;;  %v6962_v58 = vperm.slane %v1070_v17, %v6777_v15 }
 0x226   : > { %v1084_v22 = vsel %vm761_vm0, %v1064_v11, %v1083_v62  ;;  %v996_v25 = vperm.slane %v988_v39, %v6745_v8  ;;  %v1133_v1 = vrot.slane %v735_v54, 4  ;;  %v978_v38 = vsel %vm761_vm0, %v977_v32, %v940_v40 }
 0x227   : > { %v980_v33 = vsel %vm761_vm0, %v964_v16, %v979_v3  ;;  %v1059_v48 = vrot.slane %v6920_v34, 4  ;;  %v1122_v26 = vsel %vm761_vm0, %v1121_v7, %v6689_v42  ;;  %v1089_v19 = vrot.slane %v6962_v58, 4 }
 0x228   : > { %v1046_v49 = vsel %vm761_vm0, %v1045_v51, %v996_v25  ;;  %v1047_v50 = vrot.slane %v996_v25, 4  ;;  %v1097_v21 = vrot.slane %v6671_v35, 4  ;;  %v1134_v61 = vsel %vm761_vm0, %v1133_v1, %v6722_v56  ;;  %v7009_v51 = vpop.permute.xlu2 %740 }
 0x229   : > { %1710 = vrot.lane.b32.xlu0 %v982_v63, %s9726_s25  ;;  %s9952_s25 = smov 18   ;;  %v1071_v63 = vrot.slane %v1020_v47, 4  ;;  %v6979_v53 = vperm.slane %v1046_v49, %v6777_v15  ;;  %v1081_v57 = vrot.slane %v1064_v11, 4  ;;  %v1035_v34 = vrot.slane %v6914_v20, 4 }
 0x22a   : > { %v1048_v41 = vsel %vm761_vm0, %v1008_v60, %v1047_v50  ;;  %v1060_v16 = vsel %vm761_vm0, %v6904_v27, %v1059_v48  ;;  %v6992_v46 = vperm.slane %v1134_v61, %v6745_v8  ;;  %v983_v20 = vrot.slane %v6926_v12, 4 }
 0x22b   : > { %1694 = vrot.lane.b32.xlu2 %v974_v13, %s9728_s17  ;;  %1690 = vrot.lane.b32.xlu1 %v972_v4, %s9952_s25  ;;  %s9734_s17 = smov 34   ;;  %v6984_v13 = vperm.slane %v1122_v26, %v6745_v8  ;;  %v1109_v4 = vrot.slane %v6673_v36, 4  ;;  %v1090_v47 = vsel %vm761_vm0, %v1089_v19, %v6979_v53  ;;  %v1072_v60 = vsel %vm761_vm0, %v6917_v9, %v1071_v63 }
 0x22c   : > { %v1036_v11 = vsel %vm761_vm0, %v6887_v45, %v1035_v34  ;;  %v1111_v40 = vrot.slane %v6653_v29, 4  ;;  %v1098_v17 = vsel %vm761_vm0, %v1097_v21, %v6637_v24  ;;  %v1082_v27 = vsel %vm761_vm0, %v1081_v57, %v1040_v6 }
 0x22d   : > { %v7005_v39 = vperm.slane %v1048_v41, %v6777_v15  ;;  %v1135_v62 = vrot.slane %v6722_v56, 4  ;;  %v1171_v12 = vrot.slane %v6984_v13, 4  ;;  %v984_v45 = vsel %vm761_vm0, %v6893_v28, %v983_v20 }
 0x22e   : > { %v1068_v9 = vperm.slane %v1060_v16, %v6777_v15  ;;  %v1110_v6 = vsel %vm761_vm0, %v1109_v4, %v6653_v29  ;;  %v1112_v32 = vsel %vm761_vm0, %v6673_v36, %v1111_v40  ;;  %v1080_v56 = vperm.slane %v1072_v60, %v6777_v15 }
 0x22f   : > { %v1044_v7 = vperm.slane %v1036_v11, %v6777_v15  ;;  %v1172_v28 = vsel %vm761_vm0, %v6992_v46, %v1171_v12  ;;  %v1245_v3 = vrot.slane %v7009_v51, 4  ;;  %v1136_v25 = vsel %vm761_vm0, %v735_v54, %v1135_v62 }
 0x230   : > { %v1095_v29 = vrot.slane %v7005_v39, 4  ;;  %v1116_v36 = vperm.slane %v1110_v6, %v6745_v8  ;;  %v7030_v1 = vperm.slane %v1112_v32, %v6745_v8  ;;  %v7035_v26 = vperm.slane %v1172_v28, %v6777_v15 }
 0x231   : > { %1722 = vrot.lane.b32.xlu0 %v1084_v22, %s9734_s17  ;;  %s9736_s17 = smov 40   ;;  %v1104_v22 = vperm.slane %v1098_v17, %v6745_v8  ;;  %v1087_v48 = vrot.slane %v1044_v7, 4  ;;  %v7038_v50 = vperm.slane %v1136_v25, %v6745_v8  ;;  %v1123_v63 = vrot.slane %v6689_v42, 4 }
 0x232   : > { %v1096_v49 = vsel %vm761_vm0, %v1080_v56, %v1095_v29  ;;  %v1157_v61 = vrot.slane %v7030_v1, 4  ;;  %v1233_v41 = vrot.slane %v6734_v0, 4  ;;  %v1169_v42 = vrot.slane %v6992_v46, 4 }
 0x233   : > { %1706 = vrot.lane.b32.xlu2 %v980_v33, %s9738_s23  ;;  %1702 = vrot.lane.b32.xlu1 %v978_v38, %s9756_s29  ;;  %s9742_s23 = smov 30   ;;  %v1085_v33 = vrot.slane %v1068_v9, 4  ;;  %v1099_v38 = vrot.slane %v6637_v24, 4  ;;  %v1147_v19 = vrot.slane %v1104_v22, 4  ;;  %v1246_v24 = vsel %vm761_vm0, %v1245_v3, %v6728_v59  ;;  %s9786_s29 = smov 48  }
 0x234   : > { %v1088_v21 = vsel %vm761_vm0, %v1068_v9, %v1087_v48  ;;  %v1197_v4 = vrot.slane %v7035_v26, 4  ;;  %v1145_v16 = vrot.slane %v1116_v36, 4  ;;  %v7061_v20 = vperm.slane %v1246_v24, %v6745_v8 }
 0x235   : > { %v1100_v54 = vsel %vm761_vm0, %v6671_v35, %v1099_v38  ;;  %v1086_v57 = vsel %vm761_vm0, %v1085_v33, %v1044_v7  ;;  %v1148_v34 = vsel %vm761_vm0, %v1116_v36, %v1147_v19  ;;  %v1124_v35 = vsel %vm761_vm0, %v6740_v10, %v1123_v63 }
 0x236   : > { %v1181_v60 = vrot.slane %v7038_v50, 4  ;;  %v1221_v11 = vrot.slane %v6693_v43, 4  ;;  %v7066_v10 = vperm.slane %v1148_v34, %v6777_v15  ;;  %v1093_v46 = vrot.slane %v1080_v56, 4 }
 0x237   : > { %v7069_v40 = vperm.slane %v1124_v35, %v6745_v8  ;;  %v1234_v62 = vsel %vm761_vm0, %v1233_v41, %v6714_v52  ;;  %v1281_v9 = vrot.slane %v7061_v20, 4  ;;  %v1091_v6 = vrot.slane %v6979_v53, 4 }
 0x238   : > { %v1198_v12 = vsel %vm761_vm0, %v1197_v4, %v7066_v10  ;;  %v1146_v56 = vsel %vm761_vm0, %v1145_v16, %v1104_v22  ;;  %v1222_v7 = vsel %vm761_vm0, %v1221_v11, %v6633_v23  ;;  %v1094_v28 = vsel %vm761_vm0, %v1093_v46, %v7005_v39 }
 0x239   : > { %1734 = vrot.lane.b32.xlu0 %v1090_v47, %s9736_s17  ;;  %s9740_s17 = smov 32   ;;  %v7058_v47 = vperm.slane %v1100_v54, %v6745_v8  ;;  %v1182_v32 = vsel %vm761_vm0, %v1181_v60, %v7069_v40  ;;  %v1240_v3 = vperm.slane %v1234_v62, %v6745_v8  ;;  %v1092_v53 = vsel %vm761_vm0, %v6962_v58, %v1091_v6 }
 0x23a   : > { %v1188_v39 = vperm.slane %v1182_v32, %v6777_v15  ;;  %v1152_v29 = vperm.slane %v1146_v56, %v6777_v15  ;;  %v1228_v36 = vperm.slane %v1222_v7, %v6745_v8  ;;  %v1235_v24 = vrot.slane %v6714_v52, 4 }
 0x23b   : > { %1718 = vrot.lane.b32.xlu2 %v1082_v27, %s9740_s17  ;;  %1714 = vrot.lane.b32.xlu1 %v984_v45, %s9742_s23  ;;  %s9744_s17 = smov 46   ;;  %s9746_s23 = smov 38   ;;  %v1158_v17 = vsel %vm761_vm0, %v1157_v61, %v7058_v47  ;;  %v1209_v27 = vrot.slane %v6655_v30, 4  ;;  %v1170_v45 = vsel %vm761_vm0, %v1169_v42, %v6984_v13  ;;  %v1282_v33 = vsel %vm761_vm0, %v1281_v9, %v1240_v3 }
 0x23c   : > { %v1164_v13 = vperm.slane %v1158_v17, %v6777_v15  ;;  %v1176_v25 = vperm.slane %v1170_v45, %v6777_v15  ;;  %v1195_v19 = vrot.slane %v1152_v29, 4  ;;  %v7106_v54 = vperm.slane %v1282_v33, %v6777_v15  ;;  %v747_v17 = vpop.permute.xlu1 %746 }
 0x23d   : > { %v1210_v22 = vsel %vm761_vm0, %v1209_v27, %v6615_v18  ;;  %v1257_v63 = vrot.slane %v1228_v36, 4  ;;  %v1247_v41 = vrot.slane %v6728_v59, 4  ;;  %v1236_v35 = vsel %vm761_vm0, %v6734_v0, %v1235_v24 }
 0x23e   : > { %v1203_v38 = vrot.slane %v1164_v13, 4  ;;  %v1193_v58 = vrot.slane %v1176_v25, 4  ;;  %v1305_v52 = vrot.slane %v7106_v54, 4  ;;  %v1211_v42 = vrot.slane %v6615_v18, 4 }
 0x23f   : > { %v1183_v4 = vrot.slane %v7069_v40, 4  ;;  %v1248_v16 = vsel %vm761_vm0, %v7009_v51, %v1247_v41  ;;  %v1201_v11 = vrot.slane %v1188_v39, 4  ;;  %v1159_v59 = vrot.slane %v7058_v47, 4  ;;  %v10024_v41 = vld [vmem:[#allocation33_spill] sm:$0xff] }
 0x240   : > { %v1204_v48 = vsel %vm761_vm0, %v1188_v39, %v1203_v38  ;;  %v7128_v0 = vperm.slane %v1236_v35, %v6745_v8  ;;  %v1283_v46 = vrot.slane %v1240_v3, 4  ;;  %v1212_v18 = vsel %vm761_vm0, %v6655_v30, %v1211_v42 }
 0x241   : > { %1746 = vrot.lane.b32.xlu0 %v1096_v49, %s9744_s17  ;;  %s9748_s17 = smov 36   ;;  %v1216_v49 = vperm.slane %v1210_v22, %v6745_v8  ;;  %v1333_v40 = vrot.slane %v6695_v44, 4  ;;  %v1184_v62 = vsel %vm761_vm0, %v7038_v50, %v1183_v4  ;;  %v1160_v47 = vsel %vm761_vm0, %v7030_v1, %v1159_v59 }
 0x242   : > { %v1199_v45 = vrot.slane %v7066_v10, 4  ;;  %v1284_v30 = vsel %vm761_vm0, %v7061_v20, %v1283_v46  ;;  %v1223_v9 = vrot.slane %v6633_v23, 4  ;;  %v1357_v6 = vrot.slane %v747_v17, 4 }
 0x243   : > { %1730 = vrot.lane.b32.xlu2 %v1088_v21, %s9746_s23  ;;  %1726 = vrot.lane.b32.xlu1 %v1086_v57, %s9748_s17  ;;  %s9750_s23 = smov 52   ;;  %s9752_s17 = smov 44   ;;  %v1196_v21 = vsel %vm761_vm0, %v1176_v25, %v1195_v19  ;;  %v1259_v61 = vrot.slane %v1216_v49, 4  ;;  %v1194_v57 = vsel %vm761_vm0, %v1193_v58, %v1152_v29  ;;  %v1258_v34 = vsel %vm761_vm0, %v1257_v63, %v1216_v49  ;;  %v10023_v19 = vld [vmem:[#allocation26_spill] sm:$0xff] }
 0x244   : > { %v7124_v60 = vperm.slane %v1258_v34, %v6777_v15  ;;  %v1202_v32 = vsel %vm761_vm0, %v1201_v11, %v1164_v13  ;;  %v1220_v1 = vperm.slane %v1212_v18, %v6745_v8  ;;  %v1295_v56 = vrot.slane %v7128_v0, 4  ;;  %v7203_v11 = vpop.permute.xlu2 %752 }
 0x245   : > { %v1260_v27 = vsel %vm761_vm0, %v1228_v36, %v1259_v61  ;;  %v1200_v10 = vsel %vm761_vm0, %v7035_v26, %v1199_v45  ;;  %v1192_v20 = vperm.slane %v1184_v62, %v6777_v15  ;;  %v1334_v23 = vsel %vm761_vm0, %v1333_v40, %v6750_v2 }
 0x246   : > { %v1306_v51 = vsel %vm761_vm0, %v1305_v52, %v7124_v60  ;;  %v7150_v50 = vperm.slane %v1260_v27, %v6777_v15  ;;  %v1292_v7 = vperm.slane %v1284_v30, %v6777_v15  ;;  %v1224_v3 = vsel %vm761_vm0, %v6693_v43, %v1223_v9 }
 0x247   : > { %v1321_v26 = vrot.slane %v6677_v37, 4  ;;  %v1271_v22 = vrot.slane %v1220_v1, 4  ;;  %v1345_v39 = vrot.slane %v6789_v31, 4  ;;  %v7173_v29 = vperm.slane %v1334_v23, %v6745_v8 }
 0x248   : > { %v1311_v25 = vrot.slane %v7150_v50, 4  ;;  %v1205_v36 = vrot.slane %v1192_v20, 4  ;;  %v1359_v33 = vrot.slane %v6720_v55, 4  ;;  %v1232_v58 = vperm.slane %v1224_v3, %v6745_v8 }
 0x249   : > { %1758 = vrot.lane.b32.xlu0 %v1198_v12, %s9750_s23  ;;  %s9754_s23 = smov 42   ;;  %v7141_v12 = vperm.slane %v1248_v16, %v6745_v8  ;;  %v1322_v63 = vsel %vm761_vm0, %v1321_v26, %v10023_v19  ;;  %v1369_v61 = vrot.slane %v7173_v29, 4  ;;  %v1346_v35 = vsel %vm761_vm0, %v1345_v39, %v10024_v41  ;;  %v10025_v26 = vld [vmem:[#allocation40_spill] sm:$0xff]  ;;  %v10026_v39 = vld [vmem:[#allocation31_spill] sm:$0xff] }
 0x24a   : > { %v1312_v38 = vsel %vm761_vm0, %v1292_v7, %v1311_v25  ;;  %v1360_v24 = vsel %vm761_vm0, %v747_v17, %v1359_v33  ;;  %v1272_v34 = vsel %vm761_vm0, %v1232_v58, %v1271_v22  ;;  %v1347_v52 = vrot.slane %v10024_v41, 4 }
 0x24b   : > { %1742 = vrot.lane.b32.xlu2 %v1094_v28, %s9752_s17  ;;  %1738 = vrot.lane.b32.xlu1 %v1092_v53, %s9754_s23  ;;  %s9758_s17 = smov 58   ;;  %s9760_s23 = smov 50   ;;  %v1168_v28 = vperm.slane %v1160_v47, %v6777_v15  ;;  %v1296_v13 = vsel %vm761_vm0, %v7141_v12, %v1295_v56  ;;  %v1358_v53 = vsel %vm761_vm0, %v1357_v6, %v6720_v55  ;;  %v1293_v42 = vrot.slane %v7141_v12, 4 }
 0x24c   : > { %v7178_v43 = vperm.slane %v1296_v13, %v6777_v15  ;;  %v1269_v4 = vrot.slane %v1232_v58, 4  ;;  %v7201_v16 = vperm.slane %v1322_v63, %v6745_v8  ;;  %v7206_v59 = vperm.slane %v1360_v24, %v6745_v8  ;;  %v7263_v63 = vpop.permute.xlu0 %513 }
 0x24d   : > { %v1207_v49 = vrot.slane %v1168_v28, 4  ;;  %v7210_v17 = vperm.slane %v1272_v34, %v6777_v15  ;;  %v1309_v27 = vrot.slane %v1292_v7, 4  ;;  %v7213_v18 = vperm.slane %v1346_v35, %v6745_v8 }
 0x24e   : > { %v1370_v40 = vsel %vm761_vm0, %v1369_v61, %v7201_v16  ;;  %v1348_v62 = vsel %vm761_vm0, %v6789_v31, %v1347_v52  ;;  %v1294_v12 = vsel %vm761_vm0, %v1293_v42, %v7128_v0  ;;  %v1270_v45 = vsel %vm761_vm0, %v1269_v4, %v1220_v1 }
 0x24f   : > { %v1208_v55 = vsel %vm761_vm0, %v1192_v20, %v1207_v49  ;;  %v1405_v30 = vrot.slane %v7206_v59, 4  ;;  %v1307_v9 = vrot.slane %v7124_v60, 4  ;;  %v1323_v31 = vrot.slane %v10023_v19, 4  ;;  %v10027_v49 = vld [vmem:[#allocation29_spill] sm:$0xff] }
 0x250   : > { %v1310_v6 = vsel %vm761_vm0, %v1309_v27, %v7150_v50  ;;  %v1356_v1 = vperm.slane %v1348_v62, %v6745_v8  ;;  %v1300_v56 = vperm.slane %v1294_v12, %v6777_v15  ;;  %v1276_v20 = vperm.slane %v1270_v45, %v6777_v15 }
 0x251   : > { %1770 = vrot.lane.b32.xlu0 %v1204_v48, %s9758_s17  ;;  %s9762_s17 = smov 64   ;;  %v7182_v48 = vperm.slane %v1358_v53, %v6745_v8  ;;  %v1308_v60 = vsel %vm761_vm0, %v7106_v54, %v1307_v9  ;;  %v1457_v53 = vrot.slane %v10025_v26, 4  ;;  %v1469_v33 = vrot.slane %v7203_v11, 4 }
 0x252   : > { %v1406_v7 = vsel %vm761_vm0, %v1405_v30, %v1356_v1  ;;  %v1313_v3 = vrot.slane %v1300_v56, 4  ;;  %v1315_v25 = vrot.slane %v1276_v20, 4  ;;  %v1435_v58 = vrot.slane %v10027_v49, 4 }
 0x253   : > { %1754 = vrot.lane.b32.xlu2 %v1196_v21, %s9760_s23  ;;  %1750 = vrot.lane.b32.xlu1 %v1194_v57, %s9786_s29  ;;  %s9764_s23 = smov 56   ;;  %v1335_v21 = vrot.slane %v6750_v2, 4  ;;  %v1206_v57 = vsel %vm761_vm0, %v1205_v36, %v1168_v28  ;;  %v1317_v2 = vrot.slane %v7178_v43, 4  ;;  %v1393_v46 = vrot.slane %v7182_v48, 4  ;;  %s355_s29 = scalar_lea.vmem %s10032_s1, %s5917_s22 }
 0x254   : > { %v7256_v22 = vperm.slane %v1406_v7, %v6777_v15  ;;  %v1433_v36 = vrot.slane %v10026_v39, 4  ;;  %v1314_v24 = vsel %vm761_vm0, %v1313_v3, %v1276_v20  ;;  %v1319_v35 = vrot.slane %v7210_v17, 4  ;;  %s9790_s22 = smov 86   ;;  %s10134_s1 = smov 42  }
 0x255   : > { %v1318_v47 = vsel %vm761_vm0, %v1317_v2, %v7210_v17  ;;  %v1371_v42 = vrot.slane %v7201_v16, 4  ;;  %v10030_v2 = vld [vmem:[#allocation32_spill] sm:$0xff]  ;;  %v1407_v12 = vrot.slane %v1356_v1, 4 }
 0x256   : > { %v1425_v41 = vrot.slane %v7256_v22, 4  ;;  %v1434_v52 = vsel %vm761_vm0, %v1433_v36, %v10027_v49  ;;  %v1445_v4 = vrot.slane %v10030_v2, 4  ;;  %v1320_v7 = vsel %vm761_vm0, %v7178_v43, %v1319_v35 }
 0x259   : > { %1782 = vrot.lane.b32.xlu0 %v1306_v51, %s9762_s17  ;;  %s9766_s17 = smov 54   ;;  %v1336_v51 = vsel %vm761_vm0, %v6695_v44, %v1335_v21  ;;  %v1394_v44 = vsel %vm761_vm0, %v1393_v46, %v7213_v18  ;;  %v10028_v21 = vld [vmem:[#allocation30_spill] sm:$0xff] }
 0x25a   : > { %v1344_v0 = vperm.slane %v1336_v51, %v6745_v8  ;;  %v1400_v50 = vperm.slane %v1394_v44, %v6777_v15  ;;  %v1447_v61 = vrot.slane %v10028_v21, 4  ;;  %v10031_v51 = vld [vmem:[#allocation38_spill] sm:$0xff] }
 0x25b   : > { %1766 = vrot.lane.b32.xlu2 %v1202_v32, %s9764_s23  ;;  %1762 = vrot.lane.b32.xlu1 %v1200_v10, %s9766_s17  ;;  %s9768_s23 = smov 70   ;;  %s9770_s17 = smov 62   ;;  %v7235_v32 = vperm.slane %v1370_v40, %v6777_v15  ;;  %v1324_v10 = vsel %vm761_vm0, %v6677_v37, %v1323_v31  ;;  %v1395_v40 = vrot.slane %v7213_v18, 4  ;;  %v1470_v62 = vsel %vm761_vm0, %v1469_v33, %v10031_v51  ;;  %v356_v31 = vld [vmem:[%s10033_s2] sm:$0xff] }
 0x25c   : > { %v1332_v54 = vperm.slane %v1324_v10, %v6745_v8  ;;  %v1381_v13 = vrot.slane %v1344_v0, 4  ;;  %v1417_v17 = vrot.slane %v1400_v50, 4  ;;  %v1448_v16 = vsel %vm761_vm0, %v10030_v2, %v1447_v61  ;;  %s10135_s2 = smov 40  }
 0x25d   : > { %v1419_v28 = vrot.slane %v7235_v32, 4  ;;  %v1372_v18 = vsel %vm761_vm0, %v7173_v29, %v1371_v42  ;;  %v1396_v44 = vsel %vm761_vm0, %v7182_v48, %v1395_v40  ;;  %v1408_v29 = vsel %vm761_vm0, %v7206_v59, %v1407_v12  ;;  %v10034_v40 = vld [vmem:[#allocation39_spill] sm:$0xff] }
 0x25e   : > { %v1383_v19 = vrot.slane %v1332_v54, 4  ;;  %v2036_v1 = vsel %vm1913_vm1, %v356_v31, 0  ;;  %v1418_v48 = vsel %vm761_vm0, %v1417_v17, %v7235_v32  ;;  %v1404_v59 = vperm.slane %v1396_v44, %v6777_v15  ;;  %v10035_v17 = vld [vmem:[#allocation34_spill] sm:$0xff] }
 0x25f   : > { %v1420_v37 = vsel %vm761_vm0, %v1400_v50, %v1419_v28  ;;  %v7319_v10 = vand.u32 4294901760, %v2036_v1  ;;  %v7321_v50 = vpop.permute.xlu0 %758  ;;  %v1446_v32 = vsel %vm761_vm0, %v1445_v4, %v10028_v21  ;;  %v7350_v33 = vperm.slane %v1448_v16, %v6745_v8 }
 0x260   : > { %v1384_v46 = vsel %vm761_vm0, %v1344_v0, %v1383_v19  ;;  %v367_v0 = vld [vmem:[%s355_s29] sm:$0x3f]  ;;  %s9882_s29 = smov 78   ;;  %v1421_v21 = vrot.slane %v1404_v59, 4  ;;  %v1557_v16 = vrot.slane %v10035_v17, 4 }
 0x261   : > { %1794 = vrot.lane.b32.xlu0 %v1312_v38, %s9768_s23  ;;  %s9772_s23 = smov 60   ;;  %v1316_v38 = vsel %vm761_vm0, %v1300_v56, %v1315_v25  ;;  %v7302_v9 = vperm.slane %v1384_v46, %v6777_v15  ;;  %v2040_v56 = vsel %vm2038_vm2, %v367_v0, 0  ;;  %v2060_v43 = vsub.f32 %v2036_v1, %v7319_v10 }
 0x262   : > { %v7328_v28 = vand.u32 4294901760, %v2040_v56  ;;  %v1493_v46 = vrot.slane %v7350_v33, 4  ;;  %vm9834_vm2 = vcmask 244736  }
 0x263   : > { %1778 = vrot.lane.b32.xlu2 %v1208_v55, %s9770_s17  ;;  %1774 = vrot.lane.b32.xlu1 %v1206_v57, %s9772_s23  ;;  %s9774_s17 = smov 76   ;;  %s9776_s23 = smov 68   ;;  %v1382_v55 = vsel %vm761_vm0, %v1381_v13, %v1332_v54  ;;  %v10029_v57 = vld [vmem:[#allocation35_spill] sm:$0xff]  ;;  %v1471_v54 = vrot.slane %v10031_v51, 4  ;;  %v7335_v13 = vperm.slane %v1408_v29, %v6777_v15  ;;  %v1431_v19 = vrot.slane %v7302_v9, 4 }
 0x264   : > { %v1458_v34 = vsel %vm761_vm0, %v1457_v53, %v10029_v57  ;;  %v1459_v3 = vrot.slane %v10029_v57, 4  ;;  %v7340_v53 = vperm.slane %v1434_v52, %v6745_v8  ;;  %v2084_v36 = vsub.f32 %v2040_v56, %v7328_v28  ;;  %2058 = vmatpush.msra.mxu0 %v7328_v28  ;;  %2134 = vmatpush.msra.mxu3 %v7328_v28 }
 0x265   : > { %v7295_v45 = vperm.slane %v1458_v34, %v6745_v8  ;;  %v1581_v34 = vrot.slane %v7321_v50, 4  ;;  %v1569_v51 = vrot.slane %v10034_v40, 4 }
 0x266   : > { %2111 = vmatpush.msra.mxu2 %v2084_v36  ;;  %v2085_v57 = vand.u32 4294901760, %v2084_v36  ;;  %v1483_v42 = vrot.slane %v7340_v53, 4  ;;  %v1460_v31 = vsel %vm761_vm0, %v10025_v26, %v1459_v3  ;;  %v10038_v3 = vld [vmem:[#allocation28_spill] sm:$0xff] }
 0x267   : > { %v1507_v20 = vrot.slane %v7295_v45, 4  ;;  %2114 = vmatmul.f32.vlgmr.msra.gmra.mxu2 %v2060_v43 }
 0x268   : > { %v2086_v4 = vsub.f32 %v2084_v36, %v2085_v57  ;;  %2160 = vmatpush.msrb.mxu0 %v2085_v57 }
 0x269   : > { %1806 = vrot.lane.b32.xlu0 %v1318_v47, %s9774_s17  ;;  %s9778_s17 = smov 66   ;;  %v7285_v47 = vperm.slane %v1382_v55, %v6777_v15  ;;  %v1452_v55 = vperm.slane %v1446_v32, %v6745_v8 }
 0x26b   : > { %1790 = vrot.lane.b32.xlu2 %v1310_v6, %s9776_s23  ;;  %1786 = vrot.lane.b32.xlu1 %v1308_v60, %s9778_s17  ;;  %s9780_s23 = smov 82   ;;  %s9782_s17 = smov 74   ;;  %v1426_v30 = vsel %vm761_vm0, %v1425_v41, %v7285_v47  ;;  %v7310_v6 = vperm.slane %v1470_v62, %v6745_v8  ;;  %v1380_v60 = vperm.slane %v1372_v18, %v6777_v15  ;;  %v2087_v18 = vand.u32 4294901760, %v2086_v4 }
 0x26c   : > { %v1432_v41 = vsel %vm761_vm0, %v7335_v13, %v1431_v19  ;;  %v1484_v12 = vsel %vm761_vm0, %v1452_v55, %v1483_v42  ;;  %v1427_v19 = vrot.slane %v7285_v47, 4 }
 0x26d   : > { %v7248_v23 = vpop.permute.xlu2 %1662  ;;  %v1508_v25 = vsel %vm761_vm0, %v7310_v6, %v1507_v20  ;;  %v1423_v61 = vrot.slane %v1380_v60, 4  ;;  %v1505_v29 = vrot.slane %v7310_v6, 4  ;;  %2088 = vmatpush.msra.mxu1 %v2087_v18  ;;  %v10037_v20 = vld [vmem:[#allocation36_spill] sm:$0xff]  ;;  %v7398_v6 = vperm.slane %v1484_v12, %v6777_v15 }
 0x26e   : > { %v7360_v35 = vperm.slane %v1508_v25, %v6777_v15  ;;  %v1570_v26 = vsel %vm761_vm0, %v1569_v51, %v10037_v20  ;;  %2090 = vmatmul.f32.vlgmr.msra.gmra.mxu1 %v7319_v10  ;;  %v1558_v25 = vsel %vm761_vm0, %v1557_v16, %v10038_v3  ;;  %v1428_v47 = vsel %vm761_vm0, %v7256_v22, %v1427_v19  ;;  %v10039_v22 = vld [vmem:[#allocation27_spill] sm:$0xff] }
 0x26f   : > { %v1424_v62 = vsel %vm761_vm0, %v1404_v59, %v1423_v61  ;;  %v1429_v59 = vrot.slane %v7335_v13, 4  ;;  %2182 = vmatpush.msrb.mxu1 %v7328_v28  ;;  %v1506_v13 = vsel %vm761_vm0, %v1505_v29, %v7295_v45  ;;  %v1564_v61 = vperm.slane %v1558_v25, %v6745_v8 }
 0x270   : > { %v1533_v0 = vrot.slane %v7360_v35, 4 }
 0x271   : > { %1818 = vrot.lane.b32.xlu0 %v1420_v37, %s9780_s23  ;;  %s9784_s23 = smov 72   ;;  %v1593_v51 = vrot.slane %v1564_v61, 4 }
 0x272   : > { %v1534_v36 = vsel %vm761_vm0, %v1533_v0, %v7398_v6 }
 0x273   : > { %1802 = vrot.lane.b32.xlu2 %v1316_v38, %s9782_s17  ;;  %1798 = vrot.lane.b32.xlu1 %v1314_v24, %s9784_s23  ;;  %s9794_s17 = smov 88   ;;  %s9800_s23 = smov 80   ;;  %v1472_v38 = vsel %vm761_vm0, %v7203_v11, %v1471_v54  ;;  %v2061_v24 = vand.u32 4294901760, %v2060_v43  ;;  %v1436_v11 = vsel %vm761_vm0, %v10026_v39, %v1435_v58  ;;  %v1422_v58 = vsel %vm761_vm0, %v1421_v21, %v1380_v60 }
 0x274   : > { %v7368_v2 = vperm.slane %v1472_v38, %v6745_v8  ;;  %v7388_v1 = vperm.slane %v1436_v11, %v6745_v8  ;;  %v7406_v54 = vperm.slane %v1460_v31, %v6745_v8  ;;  %v7418_v38 = vperm.slane %v1570_v26, %v6745_v8 }
 0x275   : > { %v7279_v27 = vpop.permute.xlu2 %1670  ;;  %v2062_v52 = vsub.f32 %v2060_v43, %v2061_v24  ;;  %2138 = vmatmul.f32.vlgmr.msra.gmra.mxu3 %v2061_v24  ;;  %v1430_v21 = vsel %vm761_vm0, %v1429_v59, %v7302_v9 }
 0x276   : > { %v1517_v60 = vrot.slane %v7368_v2, 4  ;;  %v1494_v43 = vsel %vm761_vm0, %v1493_v46, %v7388_v1  ;;  %2184 = vmatmul.f32.vlgmr.msrb.gmra.mxu1 %v7319_v10  ;;  %v1619_v26 = vrot.slane %v7418_v38, 4  ;;  %v1495_v19 = vrot.slane %v7388_v1, 4 }
 0x277   : > { %v2063_v49 = vand.u32 4294901760, %v2062_v52  ;;  %v7430_v45 = vperm.slane %v1494_v43, %v6777_v15  ;;  %v1519_v43 = vrot.slane %v7406_v54, 4  ;;  %v1535_v1 = vrot.slane %v7398_v6, 4 }
 0x278   : > { %v1518_v28 = vsel %vm761_vm0, %v1517_v60, %v7406_v54 }
 0x279   : > { %1830 = vrot.lane.b32.xlu0 %v1426_v30, %s9794_s17  ;;  %v10036_v30 = vld [vmem:[#allocation37_spill] sm:$0xff]  ;;  %2064 = vmatmul.f32.vlgmr.msra.gmra.mxu0 %v2063_v49  ;;  %s9798_s17 = smov 90   ;;  %v1524_v9 = vperm.slane %v1518_v28, %v6777_v15  ;;  %v1539_v46 = vrot.slane %v7430_v45, 4  ;;  %v1571_v49 = vrot.slane %v10037_v20, 4  ;;  %v1520_v54 = vsel %vm761_vm0, %v7368_v2, %v1519_v43 }
 0x27a   : > { %v1582_v44 = vsel %vm761_vm0, %v1581_v34, %v10036_v30  ;;  %v857_v2 = vrot.slane %v6817_v14, 4  ;;  %v1536_v6 = vsel %vm761_vm0, %v7360_v35, %v1535_v1 }
 0x27b   : > { %1814 = vrot.lane.b32.xlu2 %v1418_v48, %s9800_s23  ;;  %1810 = vrot.lane.b32.xlu1 %v1320_v7, %s9882_s29  ;;  %v1481_v48 = vrot.slane %v1452_v55, 4  ;;  %v7403_v32 = vperm.slane %v1582_v44, %v6745_v8  ;;  %v1545_v55 = vrot.slane %v7263_v63, 4  ;;  %v1540_v16 = vsel %vm761_vm0, %v1524_v9, %v1539_v46  ;;  %s9824_s23 = smov 96   ;;  %s6397_s29 = smov 127  }
 0x27c   : > { %v1572_v44 = vsel %vm761_vm0, %v10034_v40, %v1571_v49 }
 0x27d   : > { %v7342_v37 = vpop.permute.xlu2 %1682  ;;  %v1482_v24 = vsel %vm761_vm0, %v1481_v48, %v7340_v53  ;;  %v1617_v57 = vrot.slane %v7403_v32, 4  ;;  %v1512_v53 = vperm.slane %v1506_v13, %v6777_v15  ;;  %v1546_v42 = vsel %vm761_vm0, %v1545_v55, %v10039_v22 }
 0x27e   : > { %v1552_v18 = vperm.slane %v1546_v42, %v6745_v8  ;;  %v1583_v48 = vrot.slane %v10036_v30, 4  ;;  %v7473_v40 = vperm.slane %v1572_v44, %v6745_v8  ;;  %v1537_v30 = vrot.slane %v1524_v9, 4 }
 0x27f   : > { %v1618_v11 = vsel %vm761_vm0, %v1617_v57, %v7418_v38  ;;  %v1547_v13 = vrot.slane %v10039_v22, 4 }
 0x280   : > { %v7457_v12 = vperm.slane %v1618_v11, %v6777_v15  ;;  %v1594_v0 = vsel %vm761_vm0, %v1593_v51, %v1552_v18  ;;  %v1595_v20 = vrot.slane %v1552_v18, 4  ;;  %v1584_v38 = vsel %vm761_vm0, %v7321_v50, %v1583_v48 }
 0x281   : > { %1842 = vrot.lane.b32.xlu0 %v1432_v41, %s9788_s21  ;;  %s9826_s21 = smov 84   ;;  %v1488_v41 = vperm.slane %v1482_v24, %v6777_v15  ;;  %2162 = vmatmul.f32.vlgmr.msrb.gmra.mxu0 %v7319_v10  ;;  %v1559_v24 = vrot.slane %v10038_v3, 4  ;;  %v1496_v3 = vsel %vm761_vm0, %v7350_v33, %v1495_v19  ;;  %v1548_v50 = vsel %vm761_vm0, %v7263_v63, %v1547_v13 }
 0x282   : > { %v1641_v60 = vrot.slane %v7457_v12, 4  ;;  %v1596_v28 = vsel %vm761_vm0, %v1564_v61, %v1595_v20  ;;  %v1620_v61 = vsel %vm761_vm0, %v7403_v32, %v1619_v26  ;;  %v1538_v57 = vsel %vm761_vm0, %v1537_v30, %v7430_v45 }
 0x283   : > { %v7375_v39 = vpop.permute.xlu0 %1674  ;;  %1826 = vrot.lane.b32.xlu2 %v1424_v62, %s9790_s22  ;;  %1822 = vrot.lane.b32.xlu1 %v1422_v58, %s9826_s21  ;;  %s9792_s22 = smov 100   ;;  %v1529_v62 = vrot.slane %v1512_v53, 4  ;;  %v1531_v58 = vrot.slane %v1488_v41, 4  ;;  %v1528_v33 = vperm.slane %v1520_v54, %v6777_v15  ;;  %v1560_v14 = vsel %vm761_vm0, %v10035_v17, %v1559_v24  ;;  %s10123_s21 = smov 16  }
 0x284   : > { %v1628_v63 = vperm.slane %v1620_v61, %v6777_v15  ;;  %v1504_v32 = vperm.slane %v1496_v3, %v6777_v15  ;;  %v1556_v45 = vperm.slane %v1548_v50, %v6745_v8  ;;  %v858_v11 = vsel %vm761_vm0, %v857_v2, %v6805_v5 }
 0x285   : > { %v7391_v56 = vpop.permute.xlu2 %1694  ;;  %v7395_v7 = vpop.permute.xlu1 %1658  ;;  %v1532_v10 = vsel %vm761_vm0, %v1512_v53, %v1531_v58  ;;  %v1530_v29 = vsel %vm761_vm0, %v1529_v62, %v1488_v41  ;;  %v1592_v53 = vperm.slane %v1584_v38, %v6745_v8  ;;  %v1568_v42 = vperm.slane %v1560_v14, %v6745_v8 }
 0x286   : > { %v1910_v46 = vsel %vm1909_vm3, %v858_v11, %v7395_v7  ;;  %v1541_v51 = vrot.slane %v1528_v33, 4  ;;  %v1543_v49 = vrot.slane %v1504_v32, 4  ;;  %v1607_v58 = vrot.slane %v1556_v45, 4 }
 0x287   : > { %v1912_v5 = vsel %vm1911_vm4, %v1910_v46, %v7248_v23  ;;  %v1605_v48 = vrot.slane %v1568_v42, 4  ;;  %v1645_v26 = vrot.slane %v1628_v63, 4 }
 0x288   : > { %v1544_v18 = vsel %vm761_vm0, %v1528_v33, %v1543_v49  ;;  %v357_v33 = vld [vmem:[%s10040_s3] sm:$0xff]  ;;  %s10136_s3 = smov 38  }
 0x289   : > { %1854 = vrot.lane.b32.xlu0 %v1534_v36, %s9792_s22  ;;  %s9796_s22 = smov 92   ;;  %v7482_v36 = vperm.slane %v1594_v0, %v6777_v15  ;;  %v1629_v0 = vrot.slane %v1592_v53, 4 }
 0x28b   : > { %v7434_v34 = vpop.permute.xlu0 %1686  ;;  %1838 = vrot.lane.b32.xlu2 %v1430_v21, %s9796_s22  ;;  %1834 = vrot.lane.b32.xlu1 %v1428_v47, %s9798_s17  ;;  %s9802_s22 = smov 106   ;;  %s9806_s17 = smov 98   ;;  %v1642_v55 = vsel %vm761_vm0, %v1641_v60, %v7482_v36  ;;  %v1631_v21 = vrot.slane %v7473_v40, 4  ;;  %v1604_v47 = vperm.slane %v1596_v28, %v6777_v15  ;;  %v1630_v30 = vsel %vm761_vm0, %v1629_v0, %v7473_v40 }
 0x28c   : > { %v1606_v28 = vsel %vm761_vm0, %v1605_v48, %v1556_v45 }
 0x28d   : > { %v7444_v52 = vpop.permute.xlu2 %1706  ;;  %v7450_v4 = vpop.permute.xlu1 %1666  ;;  %v1632_v35 = vsel %vm761_vm0, %v1592_v53, %v1631_v21  ;;  %v1647_v17 = vrot.slane %v1604_v47, 4  ;;  %v1646_v38 = vsel %vm761_vm0, %v1645_v26, %v1604_v47 }
 0x28e   : > { %v1914_v7 = vsel %vm1913_vm1, %v1912_v5, %v7450_v4 }
 0x28f   : > { %v1648_v62 = vsel %vm761_vm0, %v1628_v63, %v1647_v17  ;;  %v1916_v60 = vsel %vm1915_vm5, %v1914_v7, %v7279_v27  ;;  %v1643_v27 = vrot.slane %v7482_v36, 4  ;;  %v1612_v36 = vperm.slane %v1606_v28, %v6777_v15 }
 0x290   : > { %v1918_v19 = vsel %vm1917_vm6, %v1916_v60, %v7375_v39  ;;  %v1636_v39 = vperm.slane %v1630_v30, %v6777_v15 }
 0x291   : > { %1866 = vrot.lane.b32.xlu0 %v1540_v16, %s9802_s22  ;;  %s9804_s22 = smov 112   ;;  %v7532_v16 = vperm.slane %v1632_v35, %v6777_v15  ;;  %v1644_v40 = vsel %vm761_vm0, %v7457_v12, %v1643_v27  ;;  %v1651_v61 = vrot.slane %v1612_v36, 4 }
 0x292   : > { %v1649_v12 = vrot.slane %v1636_v39, 4 }
 0x293   : > { %v7464_v31 = vpop.permute.xlu0 %1698  ;;  %1850 = vrot.lane.b32.xlu2 %v1532_v10, %s9806_s17  ;;  %1846 = vrot.lane.b32.xlu1 %v1530_v29, %s9824_s23  ;;  %s9810_s17 = smov 102   ;;  %v1542_v10 = vsel %vm761_vm0, %v1541_v51, %v1504_v32  ;;  %v1608_v29 = vsel %vm761_vm0, %v1568_v42, %v1607_v58  ;;  %v1653_v23 = vrot.slane %v7532_v16, 4  ;;  %v1652_v2 = vsel %vm761_vm0, %v1636_v39, %v1651_v61  ;;  %s6396_s23 = smov 1  }
 0x294   : > { %v1616_v20 = vperm.slane %v1608_v29, %v6777_v15  ;;  %v1650_v47 = vsel %vm761_vm0, %v1649_v12, %v1612_v36 }
 0x295   : > { %v7476_v59 = vpop.permute.xlu2 %1718  ;;  %v7479_v25 = vpop.permute.xlu1 %1678 }
 0x296   : > { %v1654_v13 = vsel %vm761_vm0, %v1653_v23, %v1616_v20  ;;  %v1920_v24 = vsel %vm9977_vm7, %v1918_v19, %v7479_v25  ;;  %v1655_v14 = vrot.slane %v1616_v20, 4 }
 0x297   : > { %v1922_v25 = vsel %vm9847_vm8, %v1920_v24, %v7342_v37  ;;  %vm9854_vm8 = vcmask 539648  }
 0x298   : > { %v1924_v1 = vsel %vm9841_vm9, %v1922_v25, %v7434_v34  ;;  %v1656_v45 = vsel %vm761_vm0, %v7532_v16, %v1655_v14  ;;  %v10042_v16 = vld [vmem:[#allocation21_spill] sm:$0xff]  ;;  %vm9848_vm9 = vcmask 441344  }
 0x299   : > { %1878 = vrot.lane.b32.xlu0 %v1642_v55, %s9804_s22  ;;  %s9808_s22 = smov 104   ;;  %v6391_v55 = vmov 0  }
 0x29a   : > { %6098 = vset.pattern.permute.xlu2 %v6391_v55  ;;  %6099 = vset.pattern.permute.xlu0 %v6391_v55 }
 0x29b   : > { %v7508_v9 = vpop.permute.xlu0 %1710  ;;  %1862 = vrot.lane.b32.xlu2 %v1538_v57, %s9808_s22  ;;  %1858 = vrot.lane.b32.xlu1 %v1536_v6, %s9810_s17  ;;  %s9812_s22 = smov 118   ;;  %s9814_s17 = smov 110  }
 0x29d   : > { %v7520_v41 = vpop.permute.xlu2 %1730  ;;  %v7525_v22 = vpop.permute.xlu1 %1690 }
 0x29e   : > { %v1926_v3 = vsel %vm9835_vm10, %v1924_v1, %v7525_v22  ;;  %vm9842_vm10 = vcmask 343040  }
 0x29f   : > { %v1928_v37 = vsel %vm9832_vm11, %v1926_v3, %v7391_v56  ;;  %vm9837_vm11 = vcmask 293888  }
 0x2a0   : > { %v1930_v53 = vsel %vm9830_vm12, %v1928_v37, %v7464_v31  ;;  %vm9836_vm12 = vcmask 261120  }
 0x2a1   : > { %1890 = vrot.lane.b32.xlu0 %v1648_v62, %s9812_s22  ;;  %s9816_s22 = smov 108  }
 0x2a3   : > { %v7540_v44 = vpop.permute.xlu0 %1722  ;;  %1874 = vrot.lane.b32.xlu2 %v1544_v18, %s9814_s17  ;;  %1870 = vrot.lane.b32.xlu1 %v1542_v10, %s9816_s22  ;;  %s9818_s17 = smov 124   ;;  %s9820_s22 = smov 116  }
 0x2a5   : > { %v1703_v4 = vpop.permute.xlu1 %1702  ;;  %v7550_v43 = vpop.permute.xlu2 %1742 }
 0x2a6   : > { %v1932_v6 = vsel %vm1931_vm13, %v1930_v53, %v1703_v4 }
 0x2a7   : > { %v1934_v56 = vsel %vm9831_vm14, %v1932_v6, %v7444_v52  ;;  %v359_v52 = vld [vmem:[%s10041_s5] sm:$0xff]  ;;  %vm9838_vm14 = vcmask 277504   ;;  %s10138_s5 = smov 46  }
 0x2a8   : > { %v1936_v31 = vsel %vm9833_vm15, %v1934_v56, %v7508_v9  ;;  %vm9839_vm15 = vcmask 310272  }
 0x2a9   : > { %1902 = vrot.lane.b32.xlu0 %v1654_v13, %s9818_s17  ;;  %s9822_s17 = smov 114  }
 0x2ab   : > { %v7563_v54 = vpop.permute.xlu0 %1734  ;;  %1886 = vrot.lane.b32.xlu2 %v1646_v38, %s9820_s22  ;;  %1882 = vrot.lane.b32.xlu1 %v1644_v40, %s9822_s17  ;;  %s9828_s22 = smov 122   ;;  %s9879_s17 = smov 120  }
 0x2ad   : > { %v1715_v21 = vpop.permute.xlu1 %1714  ;;  %v1755_v50 = vpop.permute.xlu2 %1754 }
 0x2ae   : > { %v1938_v11 = vsel %vm9834_vm2, %v1936_v31, %v1715_v21  ;;  %vm9840_vm2 = vcmask 326656  }
 0x2af   : > { %v1940_v22 = vsel %vm9836_vm12, %v1938_v11, %v7476_v59  ;;  %vm9843_vm12 = vcmask 359424  }
 0x2b0   : > { %v1942_v42 = vsel %vm9838_vm14, %v1940_v22, %v7540_v44  ;;  %vm9845_vm14 = vcmask 392192  }
 0x2b3   : > { %v1747_v57 = vpop.permute.xlu0 %1746  ;;  %1898 = vrot.lane.b32.xlu2 %v1652_v2, %s9828_s22  ;;  %1894 = vrot.lane.b32.xlu1 %v1650_v47, %s9879_s17  ;;  %s9959_s22 = smov 126  }
 0x2b5   : > { %v1727_v34 = vpop.permute.xlu1 %1726  ;;  %v1767_v63 = vpop.permute.xlu2 %1766 }
 0x2b6   : > { %v1944_v9 = vsel %vm9837_vm11, %v1942_v42, %v1727_v34  ;;  %vm9844_vm11 = vcmask 375808  }
 0x2b7   : > { %v1946_v62 = vsel %vm9839_vm15, %v1944_v9, %v7520_v41  ;;  %vm9846_vm15 = vcmask 408576  }
 0x2b8   : > { %v1948_v59 = vsel %vm9840_vm2, %v1946_v62, %v7563_v54  ;;  %vm9853_vm2 = vcmask 424960  }
 0x2bb   : > { %v1759_v32 = vpop.permute.xlu0 %1758  ;;  %2191 = vperm.xlu2 %6098, %v357_v33   ;;  %1906 = vrot.lane.b32.xlu1 %v1656_v45, %s9959_s22 }
 0x2bd   : > { %v1739_v35 = vpop.permute.xlu1 %1738  ;;  %v1779_v46 = vpop.permute.xlu2 %1778 }
 0x2be   : > { %v1950_v58 = vsel %vm9842_vm10, %v1948_v59, %v1739_v35  ;;  %vm9849_vm10 = vcmask 457728  }
 0x2bf   : > { %v1952_v7 = vsel %vm9843_vm12, %v1950_v58, %v7550_v43  ;;  %vm9850_vm12 = vcmask 474112  }
 0x2c0   : > { %v1954_v41 = vsel %vm9844_vm11, %v1952_v7, %v1747_v57  ;;  %vm9851_vm11 = vcmask 490496  }
 0x2c3   : > { %v1771_v17 = vpop.permute.xlu0 %1770  ;;  %2221 = vperm.xlu2 %6098, %v359_v52  }
 0x2c5   : > { %v1751_v51 = vpop.permute.xlu1 %1750  ;;  %v1791_v18 = vpop.permute.xlu2 %1790 }
 0x2c6   : > { %v1956_v10 = vsel %vm9845_vm14, %v1954_v41, %v1751_v51  ;;  %vm9852_vm14 = vcmask 506880  }
 0x2c7   : > { %v1958_v0 = vsel %vm9846_vm15, %v1956_v10, %v1755_v50  ;;  %vm9868_vm15 = vcmask 523264  }
 0x2c8   : > { %v1960_v48 = vsel %vm9853_vm2, %v1958_v0, %v1759_v32  ;;  %vm9860_vm2 = vcmask 637952  }
 0x2cb   : > { %v1783_v49 = vpop.permute.xlu0 %1782  ;;  %6101 = vset.pattern.permute.xlu2 %v10042_v16 }
 0x2cd   : > { %v1763_v5 = vpop.permute.xlu1 %1762  ;;  %v1803_v23 = vpop.permute.xlu2 %1802 }
 0x2ce   : > { %v1962_v60 = vsel %vm9848_vm9, %v1960_v48, %v1763_v5  ;;  %vm9855_vm9 = vcmask 556032  }
 0x2cf   : > { %v1964_v20 = vsel %vm9849_vm10, %v1962_v60, %v1767_v63  ;;  %vm9856_vm10 = vcmask 572416  }
 0x2d0   : > { %v1966_v43 = vsel %vm9850_vm12, %v1964_v20, %v1771_v17  ;;  %vm9857_vm12 = vcmask 588800  }
 0x2d3   : > { %v1795_v44 = vpop.permute.xlu0 %1794 }
 0x2d5   : > { %v1775_v29 = vpop.permute.xlu1 %1774  ;;  %v1815_v13 = vpop.permute.xlu2 %1814 }
 0x2d6   : > { %v1968_v30 = vsel %vm9851_vm11, %v1966_v43, %v1775_v29  ;;  %vm9859_vm11 = vcmask 605184  }
 0x2d7   : > { %v1970_v19 = vsel %vm9852_vm14, %v1968_v30, %v1779_v46  ;;  %vm9858_vm14 = vcmask 621568   ;;  %v6395_v46 = vmov 0.0  }
 0x2d8   : > { %v1972_v24 = vsel %vm9868_vm15, %v1970_v19, %v1783_v49  ;;  %vm364_vm15 = vcmask 15368  }
 0x2d9   : > { %365 = vst.msk [vmem:[#allocation2 + $0x8] sm:$0xff] %vm364_vm15, %v6395_v46  ;;  %vm2023_vm15 = vcmask 949248  }
 0x2db   : > { %v1807_v4 = vpop.permute.xlu0 %1806 }
 0x2dd   : > { %v1787_v26 = vpop.permute.xlu1 %1786  ;;  %v1827_v40 = vpop.permute.xlu2 %1826 }
 0x2de   : > { %v1974_v38 = vsel %vm9854_vm8, %v1972_v24, %v1787_v26  ;;  %vm9861_vm8 = vcmask 654336  }
 0x2df   : > { %v1976_v54 = vsel %vm9855_vm9, %v1974_v38, %v1791_v18  ;;  %vm9862_vm9 = vcmask 670720  }
 0x2e0   : > { %v1978_v36 = vsel %vm9856_vm10, %v1976_v54, %v1795_v44  ;;  %vm9863_vm10 = vcmask 687104  }
 0x2e3   : > { %v1819_v28 = vpop.permute.xlu0 %1818 }
 0x2e5   : > { %v1799_v27 = vpop.permute.xlu1 %1798  ;;  %v1839_v61 = vpop.permute.xlu2 %1838 }
 0x2e6   : > { %v1980_v55 = vsel %vm9857_vm12, %v1978_v36, %v1799_v27  ;;  %vm9865_vm12 = vcmask 703488  }
 0x2e7   : > { %v1982_v21 = vsel %vm9859_vm11, %v1980_v55, %v1803_v23  ;;  %vm9866_vm11 = vcmask 736256  }
 0x2e8   : > { %v1984_v12 = vsel %vm9858_vm14, %v1982_v21, %v1807_v4  ;;  %vm9864_vm14 = vcmask 719872  }
 0x2ea   : > { %v2115_v10 = vpop.f32.mrf.mxu2 }
 0x2eb   : > { %v1831_v25 = vpop.permute.xlu0 %1830  ;;  %v2091_v58 = vpop.f32.mrf.mxu1 }
 0x2ed   : > { %v1811_v39 = vpop.permute.xlu1 %1810  ;;  %v1851_v34 = vpop.permute.xlu2 %1850 }
 0x2ee   : > { %v1986_v3 = vsel %vm9860_vm2, %v1984_v12, %v1811_v39  ;;  %vm9867_vm2 = vcmask 752640   ;;  %v361_v12 = vld [vmem:[%s10043_s7] sm:$0xff]  ;;  %s10140_s7 = smov 54  }
 0x2ef   : > { %v1988_v50 = vsel %vm9861_vm8, %v1986_v3, %v1815_v13  ;;  %vm9870_vm8 = vcmask 769024  }
 0x2f0   : > { %v1990_v57 = vsel %vm9862_vm9, %v1988_v50, %v1819_v28  ;;  %vm9869_vm9 = vcmask 785408  }
 0x2f3   : > { %v1843_v2 = vpop.permute.xlu0 %1842  ;;  %v2185_v24 = vpop.f32.mrf.mxu1 }
 0x2f5   : > { %v1823_v1 = vpop.permute.xlu1 %1822  ;;  %v1863_v32 = vpop.permute.xlu2 %1862 }
 0x2f6   : > { %v1992_v47 = vsel %vm9863_vm10, %v1990_v57, %v1823_v1  ;;  %vm9871_vm10 = vcmask 801792   ;;  %v2065_v18 = vpop.f32.mrf.mxu0  ;;  %v10044_v1 = vld [vmem:[#allocation19_spill] sm:$0xff] }
 0x2f7   : > { %v1994_v53 = vsel %vm9865_vm12, %v1992_v47, %v1827_v40  ;;  %vm9872_vm12 = vcmask 834560   ;;  %v2092_v41 = vadd.f32 %v2091_v58, %v2065_v18 }
 0x2f8   : > { %v1996_v6 = vsel %vm9864_vm14, %v1994_v53, %v1831_v25  ;;  %vm9873_vm14 = vcmask 818176   ;;  %v2139_v60 = vpop.f32.mrf.mxu3 }
 0x2f9   : > { %v2116_v23 = vadd.f32 %v2115_v10, %v2092_v41  ;;  %v360_v41 = vld [vmem:[%s10046_s6] sm:$0xff]  ;;  %s10139_s6 = smov 44  }
 0x2fb   : > { %v1855_v33 = vpop.permute.xlu0 %1854  ;;  %v2140_v26 = vadd.f32 %v2139_v60, %v2116_v23 }
 0x2fd   : > { %v1835_v37 = vpop.permute.xlu1 %1834  ;;  %v1875_v42 = vpop.permute.xlu2 %1874 }
 0x2fe   : > { %v1998_v14 = vsel %vm9866_vm11, %v1996_v6, %v1835_v37  ;;  %vm2011_vm11 = vcmask 850944   ;;  %v2163_v30 = vpop.f32.mrf.mxu0 }
 0x2ff   : > { %v2000_v63 = vsel %vm9867_vm2, %v1998_v14, %v1839_v61  ;;  %vm362_vm2 = vcmask 7168   ;;  %v2164_v27 = vadd.f32 %v2163_v30, %v2140_v26 }
 0x300   : > { %v2002_v45 = vsel %vm9870_vm8, %v2000_v63, %v1843_v2  ;;  %363 = vst.msk [vmem:[#allocation2] sm:$0xff] %vm362_vm2, %v6395_v46  ;;  %vm9874_vm8 = vcmask 883712   ;;  %v358_v2 = vld [vmem:[%s10045_s4] sm:$0xff]  ;;  %s10137_s4 = smov 48  }
 0x301   : > { %v2186_v54 = vadd.f32 %v2185_v24, %v2164_v27  ;;  %v2225_v47 = vsel %vm1931_vm13, %v358_v2, 0 }
 0x302   : > { %v2246_v37 = vand.u32 4294901760, %v2225_v47 }
 0x303   : > { %v1867_v11 = vpop.permute.xlu0 %1866 }
 0x304   : > { %v2247_v14 = vsub.f32 %v2225_v47, %v2246_v37 }
 0x305   : > { %v1847_v56 = vpop.permute.xlu1 %1846  ;;  %v1887_v44 = vpop.permute.xlu2 %1886 }
 0x306   : > { %v2004_v31 = vsel %vm9869_vm9, %v2002_v45, %v1847_v56  ;;  %vm9875_vm9 = vcmask 867328   ;;  %v2248_v63 = vand.u32 4294901760, %v2247_v14 }
 0x307   : > { %v2006_v52 = vsel %vm9871_vm10, %v2004_v31, %v1851_v34  ;;  %vm9876_vm10 = vcmask 900096  }
 0x308   : > { %v2008_v22 = vsel %vm9873_vm14, %v2006_v52, %v1855_v33  ;;  %vm9877_vm14 = vcmask 932864   ;;  %v2249_v52 = vsub.f32 %v2247_v14, %v2248_v63 }
 0x30b   : > { %v1879_v62 = vpop.permute.xlu0 %1878 }
 0x30d   : > { %v1859_v35 = vpop.permute.xlu1 %1858  ;;  %v1899_v19 = vpop.permute.xlu2 %1898 }
 0x30e   : > { %v2010_v17 = vsel %vm9872_vm12, %v2008_v22, %v1859_v35  ;;  %vm9878_vm12 = vcmask 916480  }
 0x30f   : > { %v2012_v9 = vsel %vm2011_vm11, %v2010_v17, %v1863_v32 }
 0x310   : > { %v2014_v49 = vsel %vm9875_vm9, %v2012_v9, %v1867_v11  ;;  %vm2027_vm9 = vcmask 982016   ;;  %v2250_v9 = vand.u32 4294901760, %v2249_v52 }
 0x313   : > { %v1891_v48 = vpop.permute.xlu0 %1890 }
 0x315   : > { %v1871_v51 = vpop.permute.xlu1 %1870  ;;  %v2192_v25 = vpop.permute.xlu2 %2191 }
 0x316   : > { %v2016_v59 = vsel %vm9874_vm8, %v2014_v49, %v1871_v51  ;;  %vm2025_vm8 = vcmask 965632  }
 0x317   : > { %v2018_v5 = vsel %vm9876_vm10, %v2016_v59, %v1875_v42  ;;  %vm9881_vm10 = vcmask 998400  }
 0x318   : > { %v2020_v29 = vsel %vm9878_vm12, %v2018_v5, %v1879_v62  ;;  %vm2033_vm12 = vcmask 1031168  }
 0x31b   : > { %v1903_v38 = vpop.permute.xlu0 %1902 }
 0x31d   : > { %v1883_v7 = vpop.permute.xlu1 %1882  ;;  %v2222_v57 = vpop.permute.xlu2 %2221 }
 0x31e   : > { %v2022_v0 = vsel %vm9877_vm14, %v2020_v29, %v1883_v7  ;;  %vm2031_vm14 = vcmask 1014784  }
 0x31f   : > { %v2024_v4 = vsel %vm2023_vm15, %v2022_v0, %v1887_v44  ;;  %v2406_v44 = vsel %vm1915_vm5, %v360_v41, 0  ;;  %v10053_v41 = vld [vmem:[#allocation22_spill] sm:$0xff] }
 0x320   : > { %v2026_v43 = vsel %vm2025_vm8, %v2024_v4, %v1891_v48  ;;  %v2425_v10 = vand.u32 4294901760, %v2406_v44 }
 0x322   : > { %v2426_v0 = vsub.f32 %v2406_v44, %v2425_v10 }
 0x324   : > { %v2427_v26 = vand.u32 4294901760, %v2426_v0 }
 0x325   : > { %v1895_v20 = vpop.permute.xlu1 %1894 }
 0x326   : > { %v2028_v13 = vsel %vm2027_vm9, %v2026_v43, %v1895_v20 }
 0x327   : > { %v2030_v28 = vsel %vm9881_vm10, %v2028_v13, %v1899_v19  ;;  %vm2199_vm10 = vcmask 1047560   ;;  %v2428_v19 = vsub.f32 %v2426_v0, %v2427_v26 }
 0x328   : > { %v2032_v40 = vsel %vm2031_vm14, %v2030_v28, %v1903_v38 }
 0x329   : > { %v2429_v38 = vand.u32 4294901760, %v2428_v19 }
 0x32d   : > { %v1907_v39 = vpop.permute.xlu1 %1906 }
 0x32e   : > { %v2034_v36 = vsel %vm2033_vm12, %v2032_v40, %v1907_v39 }
 0x32f   : > { %v2188_v55 = vadd.f32 %v2186_v54, %v2034_v36 }
 0x331   : > { %v2194_v21 = vadd.f32 %v2192_v25, %v2188_v55 }
 0x333   : > { %2196 = vrot.lane.b32.xlu0 %v2194_v21, %s6396_s23  ;;  %s7674_s23 = sand.u32 1, %s6319_s10   ;;  %s10143_s10 = smov 60  }
 0x334   : > { %10047 = sst [smem:[#allocation41_spill]] %s7674_s23  ;;  %s5915_s17 = sshll.u32 %s7674_s23, 3 }
 0x335   : > { %s10157_s23 = smov 76  }
 0x33b   : > { %2402 = vperm.xlu0 %6099, %v361_v12  }
 0x343   : > { %6104 = vset.pattern.permute.xlu0 %v10044_v1 }
 0x3a5   : > { %v2197_v61 = vpop.permute.xlu0 %2196 }
 0x3a6   : > { %2200 = vst.msk [vmem:[#allocation2] sm:$0xff] %vm2199_vm10, %v2197_v61  ;;  %vm2210_vm10 = vcmask 1039360  }
 0x3a7   : > { %2201 = vst.msk [vmem:[#allocation2 + $0x8] sm:$0xff] %vm362_vm2, %v2197_v61  ;;  %vm10181_vm2 = vcmask 113664  }
 0x3ad   : > { %v2202_v3 = vld [vmem:[#allocation2] sm:$0xff]  ;;  %v7666_v34 = vpop.permute.xlu0 %2402 }
 0x3ae   : > { %v2203_v50 = vld [vmem:[#allocation2 + $0x8] sm:$0xff]  ;;  %2213 = vrot.lane.b32.xlu0 %v2202_v3, %s9959_s22  ;;  %2206 = vrot.lane.b32.xlu1 %v2202_v3, %s6397_s29  ;;  %v2244_v32 = vand.u32 4294901760, %v2202_v3 }
 0x3af   : > { %2208 = vrot.lane.b32.xlu2 %v2203_v50, %s6397_s29  ;;  %s7677_s29 = scalar_lea.vmem [#allocation3], %s5915_s17  ;;  %s10124_s17 = smov 14  }
 0x3b0   : > { %v2281_v17 = vsub.f32 %v2202_v3, %v2244_v32  ;;  %10048 = sst [smem:[#allocation42_spill]] %s7677_s29 }
 0x3b2   : > { %v2282_v62 = vand.u32 4294901760, %v2281_v17 }
 0x3b4   : > { %v2283_v5 = vsub.f32 %v2281_v17, %v2282_v62 }
 0x3b6   : > { %2215 = vrot.lane.b32.xlu1 %v2203_v50, %s9959_s22  ;;  %v2284_v7 = vand.u32 4294901760, %v2283_v5  ;;  %v10051_v5 = vld [vmem:[#allocation20_spill] sm:$0xff]  ;;  %s10132_s22 = smov 34  }
 0x409   : > { %v2209_v53 = vpop.permute.xlu2 %2208 }
 0x420   : > { %v2207_v6 = vpop.permute.xlu1 %2206  ;;  %v2214_v31 = vpop.permute.xlu0 %2213 }
 0x421   : > { %v2211_v33 = vsel %vm2210_vm10, %v2207_v6, %v2209_v53  ;;  %vm10185_vm10 = vcmask 130048  }
 0x422   : > { %v2242_v56 = vand.u32 4294901760, %v2211_v33 }
 0x424   : > { %v2275_v45 = vsub.f32 %v2211_v33, %v2242_v56 }
 0x426   : > { %v2276_v46 = vand.u32 4294901760, %v2275_v45 }
 0x428   : > { %v2216_v35 = vpop.permute.xlu1 %2215  ;;  %v2277_v59 = vsub.f32 %v2275_v45, %v2276_v46 }
 0x429   : > { %v2217_v11 = vsel %vm2033_vm12, %v2214_v31, %v2216_v35 }
 0x42a   : > { %v2240_v22 = vand.u32 4294901760, %v2217_v11  ;;  %v2278_v18 = vand.u32 4294901760, %v2277_v59 }
 0x42c   : > { %v2269_v42 = vsub.f32 %v2217_v11, %v2240_v22  ;;  %2241 = vmatpush.msrb.mxu2 %v2240_v22  ;;  %2333 = vmatpush.msra.mxu1 %v2240_v22 }
 0x42e   : > { %v2270_v51 = vand.u32 4294901760, %v2269_v42  ;;  %2243 = vmatpush.msrb.mxu2 %v2242_v56  ;;  %2306 = vmatpush.msra.mxu0 %v2269_v42 }
 0x42f   : > { %2335 = vmatpush.msra.mxu1 %v2242_v56 }
 0x430   : > { %2245 = vmatpush.msrb.mxu2 %v2244_v32  ;;  %2309 = vmatpush.msra.mxu0 %v2275_v45  ;;  %v2271_v49 = vsub.f32 %v2269_v42, %v2270_v51 }
 0x431   : > { %2337 = vmatpush.msra.mxu1 %v2244_v32  ;;  %2251 = vmatmul.f32.vlgmr.msrb.gmra.mxu2 %v2250_v9 }
 0x432   : > { %2361 = vmatpush.msra.mxu2 %v2270_v51  ;;  %2312 = vmatpush.msra.mxu0 %v2281_v17  ;;  %v2272_v58 = vand.u32 4294901760, %v2271_v49  ;;  %v10049_v49 = vld [vmem:[#allocation18_spill] sm:$0xff] }
 0x433   : > { %2315 = vmatmul.f32.vlgmr.msra.gmra.mxu0 %v2247_v14  ;;  %2341 = vmatmul.f32.vlgmr.msra.gmra.mxu1 %v2248_v63  ;;  %v7685_v59 = vadd.s32 72, %v10049_v49  ;;  %v7697_v44 = vadd.s32 64, %v10049_v49 }
 0x434   : > { %2365 = vmatpush.msra.mxu2 %v2276_v46  ;;  %2273 = vmatpush.msrb.mxu3 %v2272_v58  ;;  %v10050_v58 = vld [vmem:[#allocation23_spill] sm:$0xff] }
 0x436   : > { %2369 = vmatpush.msra.mxu2 %v2282_v62  ;;  %2279 = vmatpush.msrb.mxu3 %v2278_v18  ;;  %v7691_v18 = vadd.s32 112, %v10049_v49 }
 0x438   : > { %2285 = vmatpush.msrb.mxu3 %v2284_v7  ;;  %v10052_v7 = vld [vmem:[#allocation25_spill] sm:$0xff] }
 0x439   : > { %2287 = vmatmul.f32.vlgmr.msrb.gmra.mxu3 %v2246_v37  ;;  %2371 = vmatmul.f32.vlgmr.msra.gmra.mxu2 %v2246_v37 }
 0x43a   : > { %2389 = vmatpush.msra.mxu3 %v2240_v22 }
 0x43c   : > { %2391 = vmatpush.msra.mxu3 %v2242_v56 }
 0x43e   : > { %2393 = vmatpush.msra.mxu3 %v2244_v32 }
 0x441   : > { %2395 = vmatmul.f32.vlgmr.msra.gmra.mxu3 %v2246_v37 }
 0x4b0   : > { %v2316_v60 = vpop.f32.mrf.mxu0  ;;  %v2342_v20 = vpop.f32.mrf.mxu1 }
 0x4b4   : > { %v2252_v29 = vpop.f32.mrf.mxu2 }
 0x4b5   : > { %v2253_v23 = vadd.f32 %v2252_v29, %v2222_v57 }
 0x4bc   : > { %v2288_v48 = vpop.f32.mrf.mxu3  ;;  %v2372_v30 = vpop.f32.mrf.mxu2 }
 0x4bd   : > { %v2289_v4 = vadd.f32 %v2288_v48, %v2253_v23  ;;  %v7710_v23 = vadd.s32 80, %v10049_v49  ;;  %v7717_v48 = vadd.s32 104, %v10049_v49 }
 0x4bf   : > { %v2317_v43 = vadd.f32 %v2316_v60, %v2289_v4  ;;  %v7720_v60 = vadd.s32 96, %v10049_v49  ;;  %v7727_v4 = vadd.s32 120, %v10049_v49 }
 0x4c1   : > { %v2343_v13 = vadd.f32 %v2342_v20, %v2317_v43 }
 0x4c3   : > { %v2373_v27 = vadd.f32 %v2372_v30, %v2343_v13 }
 0x4c4   : > { %v2396_v28 = vpop.f32.mrf.mxu3 }
 0x4c5   : > { %v2397_v24 = vadd.f32 %v2396_v28, %v2373_v27 }
 0x4c7   : > { %v2423_v54 = vand.u32 4294901760, %v2397_v24  ;;  %2399 = vst [vmem:[%s7677_s29] sm:$0xff] %v2397_v24  ;;  %s10154_s29 = smov 68  }
 0x4c9   : > { %v2450_v40 = vsub.f32 %v2397_v24, %v2423_v54  ;;  %2424 = vmatpush.msrb.mxu0 %v2423_v54  ;;  %2500 = vmatpush.msrb.mxu3 %v2423_v54 }
 0x4ca   : > { %2430 = vmatmul.f32.vlgmr.msrb.gmra.mxu0 %v2429_v38  ;;  %2504 = vmatmul.f32.vlgmr.msrb.gmra.mxu3 %v2427_v26 }
 0x4cb   : > { %2477 = vmatpush.msrb.mxu2 %v2450_v40  ;;  %v2451_v39 = vand.u32 4294901760, %v2450_v40 }
 0x4cc   : > { %2480 = vmatmul.f32.vlgmr.msrb.gmra.mxu2 %v2426_v0  ;;  %v7707_v0 = vadd.s32 88, %v10049_v49 }
 0x4cd   : > { %2526 = vmatpush.msra.mxu0 %v2451_v39  ;;  %v2452_v36 = vsub.f32 %v2450_v40, %v2451_v39 }
 0x4cf   : > { %v2453_v55 = vand.u32 4294901760, %v2452_v36 }
 0x4d1   : > { %2454 = vmatpush.msrb.mxu1 %v2453_v55 }
 0x4d2   : > { %2456 = vmatmul.f32.vlgmr.msrb.gmra.mxu1 %v2425_v10  ;;  %2528 = vmatmul.f32.vlgmr.msra.gmra.mxu0 %v2425_v10 }
 0x4d3   : > { %2548 = vmatpush.msra.mxu1 %v2423_v54 }
 0x4da   : > { %2550 = vmatmul.f32.vlgmr.msra.gmra.mxu1 %v2425_v10  ;;  %v10054_v10 = vld [vmem:[#allocation24_spill] sm:$0xff] }
 0x547   : > { %v2431_v25 = vpop.f32.mrf.mxu0 }
 0x548   : > { %v2432_v21 = vadd.f32 %v2431_v25, %v7666_v34 }
 0x54d   : > { %v2505_v50 = vpop.f32.mrf.mxu3 }
 0x54f   : > { %v2457_v12 = vpop.f32.mrf.mxu1  ;;  %v2481_v61 = vpop.f32.mrf.mxu2 }
 0x550   : > { %v2458_v3 = vadd.f32 %v2457_v12, %v2432_v21  ;;  %v2529_v57 = vpop.f32.mrf.mxu0 }
 0x552   : > { %v2482_v2 = vadd.f32 %v2481_v61, %v2458_v3 }
 0x554   : > { %v2506_v47 = vadd.f32 %v2505_v50, %v2482_v2 }
 0x556   : > { %v2530_v37 = vadd.f32 %v2529_v57, %v2506_v47 }
 0x557   : > { %v2551_v53 = vpop.f32.mrf.mxu1 }
 0x558   : > { %v2552_v6 = vadd.f32 %v2551_v53, %v2530_v37 }
 0x55a   : > { %v2554_v33 = vrot.slane %v2552_v6, 4 }
 0x55c   : > { %v2555_v14 = vmax.f32 %v2552_v6, %v2554_v33 }
 0x55e   : > { %v2556_v56 = vrot.slane %v2555_v14, 2 }
 0x560   : > { %v2557_v63 = vmax.f32 %v2555_v14, %v2556_v56 }
 0x562   : > { %v2558_v32 = vrot.slane %v2557_v63, 1 }
 0x564   : > { %v2559_v45 = vmax.f32 %v2557_v63, %v2558_v32 }
 0x566   : > { %v2560_v31 = vsub.f32 %v2552_v6, %v2559_v45 }
 0x568   : > { %v2561_v35 = vmul.f32 1.442695, %v2560_v31 }
 0x56a   : > { %6229 = vpow2.f32 %v2561_v35 }
 0x570   : > { %v6230_v34 = vpop.eup %6229 }
 0x571   : > { %v2563_v11 = vrot.slane %v6230_v34, 4 }
 0x573   : > { %v2564_v52 = vadd.f32 %v6230_v34, %v2563_v11 }
 0x575   : > { %v2565_v22 = vrot.slane %v2564_v52, 2 }
 0x577   : > { %v2566_v17 = vadd.f32 %v2565_v22, %v2564_v52 }
 0x579   : > { %v2567_v42 = vrot.slane %v2566_v17, 1 }
 0x57b   : > { %v2568_v46 = vadd.f32 %v2567_v42, %v2566_v17 }
 0x57d   : > { %6231 = vrcp.f32 %v2568_v46 }
 0x583   : > { %v6232_v9 = vpop.eup %6231 }
 0x584   : > { %v7681_v51 = vmul.f32 %v6232_v9, %v6230_v34 }
 0x586   : > { %v2571_v62 = vperm.slane %v7681_v51, 0  ;;  %v7703_v29 = vperm.slane %v7681_v51, 1  ;;  %v7733_v20 = vperm.slane %v7681_v51, 2  ;;  %v7753_v26 = vperm.slane %v7681_v51, 3 }
 0x587   : > { %v7774_v43 = vperm.slane %v7681_v51, 4  ;;  %v7801_v30 = vperm.slane %v7681_v51, 5  ;;  %v7822_v13 = vperm.slane %v7681_v51, 6  ;;  %v7843_v19 = vperm.slane %v7681_v51, 7 }
 0x588   : > { %2600 = vperm.xlu0 %6104, %v2571_v62   ;;  %2582 = vperm.xlu2 %6101, %v2571_v62  }
 0x589   : > { %2576 = vperm.xlu1 %6100, %v2571_v62  }
 0x590   : > { %6109 = vset.pattern.permute.xlu0 %v7685_v59  ;;  %6103 = vset.pattern.permute.xlu2 %v10050_v58 }
 0x591   : > { %6102 = vset.pattern.permute.xlu1 %v10051_v5 }
 0x598   : > { %2630 = vperm.xlu0 %6109, %v2571_v62   ;;  %2594 = vperm.xlu2 %6103, %v2571_v62  }
 0x599   : > { %2588 = vperm.xlu1 %6102, %v2571_v62  }
 0x5a0   : > { %6114 = vset.pattern.permute.xlu0 %v7691_v18  ;;  %6106 = vset.pattern.permute.xlu2 %v10052_v7 }
 0x5a1   : > { %6105 = vset.pattern.permute.xlu1 %v10053_v41 }
 0x5a8   : > { %2660 = vperm.xlu0 %6114, %v2571_v62   ;;  %2612 = vperm.xlu2 %6106, %v2571_v62  }
 0x5a9   : > { %2606 = vperm.xlu1 %6105, %v2571_v62  }
 0x5b0   : > { %6119 = vset.pattern.permute.xlu0 %v10050_v58  ;;  %6108 = vset.pattern.permute.xlu2 %v7697_v44 }
 0x5b1   : > { %6107 = vset.pattern.permute.xlu1 %v10054_v10 }
 0x5b8   : > { %2691 = vperm.xlu0 %6119, %v7703_v29   ;;  %2624 = vperm.xlu2 %6108, %v2571_v62  }
 0x5b9   : > { %2618 = vperm.xlu1 %6107, %v2571_v62  }
 0x5c0   : > { %6124 = vset.pattern.permute.xlu0 %v7697_v44  ;;  %6111 = vset.pattern.permute.xlu2 %v7707_v0 }
 0x5c1   : > { %6110 = vset.pattern.permute.xlu1 %v7710_v23 }
 0x5c8   : > { %2721 = vperm.xlu0 %6124, %v7703_v29   ;;  %2642 = vperm.xlu2 %6111, %v2571_v62  }
 0x5c9   : > { %2636 = vperm.xlu1 %6110, %v2571_v62  }
 0x5d0   : > { %6129 = vset.pattern.permute.xlu0 %v7717_v48  ;;  %6113 = vset.pattern.permute.xlu2 %v7717_v48 }
 0x5d1   : > { %6112 = vset.pattern.permute.xlu1 %v7720_v60 }
 0x5d8   : > { %2751 = vperm.xlu0 %6129, %v7703_v29   ;;  %2654 = vperm.xlu2 %6113, %v2571_v62  }
 0x5d9   : > { %2648 = vperm.xlu1 %6112, %v2571_v62  }
 0x5e0   : > { %6134 = vset.pattern.permute.xlu0 %v10051_v5  ;;  %6116 = vset.pattern.permute.xlu2 %v10049_v49 }
 0x5e1   : > { %6115 = vset.pattern.permute.xlu1 %v7727_v4 }
 0x5e2   : > { %v7882_v27 = vpop.permute.xlu2 %2582 }
 0x5e8   : > { %2782 = vperm.xlu0 %6134, %v7733_v20   ;;  %2673 = vperm.xlu2 %6116, %v7703_v29  }
 0x5e9   : > { %2666 = vperm.xlu1 %6115, %v2571_v62  }
 0x5f0   : > { %6139 = vset.pattern.permute.xlu0 %v10054_v10  ;;  %6118 = vset.pattern.permute.xlu2 %v10051_v5 }
 0x5f1   : > { %6117 = vset.pattern.permute.xlu1 %v10042_v16 }
 0x5f2   : > { %v7888_v24 = vpop.permute.xlu2 %2594 }
 0x5f8   : > { %2812 = vperm.xlu0 %6139, %v7733_v20   ;;  %2685 = vperm.xlu2 %6118, %v7703_v29  }
 0x5f9   : > { %2679 = vperm.xlu1 %6117, %v7703_v29  }
 0x5fb   : > { %v7885_v28 = vpop.permute.xlu1 %2576 }
 0x600   : > { %6144 = vset.pattern.permute.xlu0 %v7720_v60  ;;  %6121 = vset.pattern.permute.xlu2 %v10053_v41 }
 0x601   : > { %6120 = vset.pattern.permute.xlu1 %v10044_v1 }
 0x602   : > { %v7894_v54 = vpop.permute.xlu2 %2612 }
 0x603   : > { %10055 = vst [vmem:[#allocation26_spill] sm:$0xff] %v7894_v54 }
 0x608   : > { %2842 = vperm.xlu0 %6144, %v7733_v20   ;;  %2703 = vperm.xlu2 %6121, %v7703_v29  }
 0x609   : > { %2697 = vperm.xlu1 %6120, %v7703_v29  }
 0x60b   : > { %v7891_v38 = vpop.permute.xlu1 %2588 }
 0x610   : > { %6149 = vset.pattern.permute.xlu0 %v10042_v16  ;;  %6123 = vset.pattern.permute.xlu2 %v10054_v10 }
 0x611   : > { %6122 = vset.pattern.permute.xlu1 %v10052_v7 }
 0x612   : > { %v7900_v39 = vpop.permute.xlu2 %2624 }
 0x613   : > { %10056 = vst [vmem:[#allocation33_spill] sm:$0xff] %v7900_v39 }
 0x618   : > { %2873 = vperm.xlu0 %6149, %v7753_v26   ;;  %2715 = vperm.xlu2 %6123, %v7703_v29  }
 0x619   : > { %2709 = vperm.xlu1 %6122, %v7703_v29  }
 0x61b   : > { %v7897_v40 = vpop.permute.xlu1 %2606 }
 0x620   : > { %6154 = vset.pattern.permute.xlu0 %v10052_v7  ;;  %6126 = vset.pattern.permute.xlu2 %v7710_v23 }
 0x621   : > { %6125 = vset.pattern.permute.xlu1 %v7685_v59 }
 0x622   : > { %v7906_v55 = vpop.permute.xlu2 %2642 }
 0x623   : > { %10058 = vst [vmem:[#allocation31_spill] sm:$0xff] %v7906_v55 }
 0x628   : > { %2903 = vperm.xlu0 %6154, %v7753_v26   ;;  %2733 = vperm.xlu2 %6126, %v7703_v29  }
 0x629   : > { %2727 = vperm.xlu1 %6125, %v7703_v29  }
 0x62b   : > { %v7903_v36 = vpop.permute.xlu1 %2618 }
 0x62c   : > { %10057 = vst [vmem:[#allocation40_spill] sm:$0xff] %v7903_v36 }
 0x630   : > { %6159 = vset.pattern.permute.xlu0 %v7707_v0  ;;  %6128 = vset.pattern.permute.xlu2 %v7720_v60 }
 0x631   : > { %6127 = vset.pattern.permute.xlu1 %v7707_v0 }
 0x632   : > { %v7912_v21 = vpop.permute.xlu2 %2654 }
 0x633   : > { %10060 = vst [vmem:[#allocation30_spill] sm:$0xff] %v7912_v21 }
 0x638   : > { %2933 = vperm.xlu0 %6159, %v7753_v26   ;;  %2745 = vperm.xlu2 %6128, %v7703_v29  }
 0x639   : > { %2739 = vperm.xlu1 %6127, %v7703_v29  }
 0x63b   : > { %v7909_v25 = vpop.permute.xlu1 %2636 }
 0x63c   : > { %10059 = vst [vmem:[#allocation29_spill] sm:$0xff] %v7909_v25 }
 0x640   : > { %6164 = vset.pattern.permute.xlu0 %v10049_v49  ;;  %6131 = vset.pattern.permute.xlu2 %v7727_v4 }
 0x641   : > { %6130 = vset.pattern.permute.xlu1 %v7691_v18 }
 0x642   : > { %v7918_v61 = vpop.permute.xlu2 %2673 }
 0x643   : > { %v3361_v54 = vrot.slane %v7918_v61, 4 }
 0x648   : > { %2964 = vperm.xlu0 %6164, %v7774_v43   ;;  %2763 = vperm.xlu2 %6131, %v7703_v29  }
 0x649   : > { %2757 = vperm.xlu1 %6130, %v7703_v29  }
 0x64b   : > { %v7915_v12 = vpop.permute.xlu1 %2648 }
 0x64c   : > { %10061 = vst [vmem:[#allocation35_spill] sm:$0xff] %v7915_v12 }
 0x650   : > { %6169 = vset.pattern.permute.xlu0 %v10053_v41  ;;  %6133 = vset.pattern.permute.xlu2 %v10042_v16 }
 0x651   : > { %6132 = vset.pattern.permute.xlu1 %v10049_v49 }
 0x652   : > { %v7924_v50 = vpop.permute.xlu2 %2685 }
 0x658   : > { %2994 = vperm.xlu0 %6169, %v7774_v43   ;;  %2776 = vperm.xlu2 %6133, %v7733_v20  }
 0x659   : > { %2770 = vperm.xlu1 %6132, %v7733_v20  }
 0x65b   : > { %v7921_v3 = vpop.permute.xlu1 %2666 }
 0x65c   : > { %10062 = vst [vmem:[#allocation32_spill] sm:$0xff] %v7921_v3 }
 0x660   : > { %6174 = vset.pattern.permute.xlu0 %v7710_v23  ;;  %6136 = vset.pattern.permute.xlu2 %v10044_v1 }
 0x661   : > { %6135 = vset.pattern.permute.xlu1 %v10050_v58 }
 0x662   : > { %v7930_v57 = vpop.permute.xlu2 %2703 }
 0x668   : > { %3024 = vperm.xlu0 %6174, %v7774_v43   ;;  %2794 = vperm.xlu2 %6136, %v7733_v20  }
 0x669   : > { %2788 = vperm.xlu1 %6135, %v7733_v20  }
 0x66b   : > { %v7927_v2 = vpop.permute.xlu1 %2679 }
 0x670   : > { %6179 = vset.pattern.permute.xlu0 %v7727_v4  ;;  %6138 = vset.pattern.permute.xlu2 %v10052_v7 }
 0x671   : > { %6137 = vset.pattern.permute.xlu1 %v10053_v41 }
 0x672   : > { %v7936_v37 = vpop.permute.xlu2 %2715 }
 0x673   : > { %10063 = vst [vmem:[#allocation38_spill] sm:$0xff] %v7936_v37 }
 0x678   : > { %3054 = vperm.xlu0 %6179, %v7774_v43   ;;  %2806 = vperm.xlu2 %6138, %v7733_v20  }
 0x679   : > { %2800 = vperm.xlu1 %6137, %v7733_v20  }
 0x67b   : > { %v7933_v47 = vpop.permute.xlu1 %2697 }
 0x680   : > { %6184 = vset.pattern.permute.xlu0 %v10044_v1  ;;  %6141 = vset.pattern.permute.xlu2 %v7685_v59 }
 0x681   : > { %6140 = vset.pattern.permute.xlu1 %v7697_v44 }
 0x682   : > { %v7942_v6 = vpop.permute.xlu2 %2733 }
 0x683   : > { %10065 = vst [vmem:[#allocation34_spill] sm:$0xff] %v7942_v6 }
 0x688   : > { %3085 = vperm.xlu0 %6184, %v7801_v30   ;;  %2824 = vperm.xlu2 %6141, %v7733_v20  }
 0x689   : > { %2818 = vperm.xlu1 %6140, %v7733_v20  }
 0x68b   : > { %v7939_v53 = vpop.permute.xlu1 %2709 }
 0x68c   : > { %10064 = vst [vmem:[#allocation39_spill] sm:$0xff] %v7939_v53 }
 0x690   : > { %6189 = vset.pattern.permute.xlu0 %v7685_v59  ;;  %6143 = vset.pattern.permute.xlu2 %v7707_v0 }
 0x691   : > { %6142 = vset.pattern.permute.xlu1 %v7710_v23 }
 0x692   : > { %v7948_v14 = vpop.permute.xlu2 %2745 }
 0x693   : > { %10067 = vst [vmem:[#allocation36_spill] sm:$0xff] %v7948_v14 }
 0x698   : > { %3115 = vperm.xlu0 %6189, %v7801_v30   ;;  %2836 = vperm.xlu2 %6143, %v7733_v20  }
 0x699   : > { %2830 = vperm.xlu1 %6142, %v7733_v20  }
 0x69b   : > { %v7945_v33 = vpop.permute.xlu1 %2727 }
 0x69c   : > { %10066 = vst [vmem:[#allocation37_spill] sm:$0xff] %v7945_v33 }
 0x6a0   : > { %6194 = vset.pattern.permute.xlu0 %v7691_v18  ;;  %6146 = vset.pattern.permute.xlu2 %v7691_v18 }
 0x6a1   : > { %6145 = vset.pattern.permute.xlu1 %v7717_v48 }
 0x6a2   : > { %v7954_v63 = vpop.permute.xlu2 %2763 }
 0x6a3   : > { %10069 = vst [vmem:[#allocation27_spill] sm:$0xff] %v7954_v63 }
 0x6a8   : > { %3145 = vperm.xlu0 %6194, %v7801_v30   ;;  %2854 = vperm.xlu2 %6146, %v7733_v20  }
 0x6a9   : > { %2848 = vperm.xlu1 %6145, %v7733_v20  }
 0x6ab   : > { %v7951_v56 = vpop.permute.xlu1 %2739 }
 0x6ac   : > { %10068 = vst [vmem:[#allocation28_spill] sm:$0xff] %v7951_v56 }
 0x6b0   : > { %6199 = vset.pattern.permute.xlu0 %v10050_v58  ;;  %6148 = vset.pattern.permute.xlu2 %v10049_v49 }
 0x6b1   : > { %6147 = vset.pattern.permute.xlu1 %v7727_v4 }
 0x6b2   : > { %v7960_v45 = vpop.permute.xlu2 %2776 }
 0x6b8   : > { %3176 = vperm.xlu0 %6199, %v7822_v13   ;;  %2867 = vperm.xlu2 %6148, %v7753_v26  }
 0x6b9   : > { %2860 = vperm.xlu1 %6147, %v7733_v20  }
 0x6bb   : > { %v7957_v32 = vpop.permute.xlu1 %2757 }
 0x6bc   : > { %10070 = vst [vmem:[#allocation21_spill] sm:$0xff] %v7957_v32 }
 0x6c0   : > { %6204 = vset.pattern.permute.xlu0 %v7697_v44  ;;  %6151 = vset.pattern.permute.xlu2 %v10050_v58 }
 0x6c1   : > { %6150 = vset.pattern.permute.xlu1 %v10051_v5 }
 0x6c2   : > { %v7966_v35 = vpop.permute.xlu2 %2794 }
 0x6c8   : > { %3206 = vperm.xlu0 %6204, %v7822_v13   ;;  %2885 = vperm.xlu2 %6151, %v7753_v26  }
 0x6c9   : > { %2879 = vperm.xlu1 %6150, %v7753_v26  }
 0x6cb   : > { %v7963_v31 = vpop.permute.xlu1 %2770 }
 0x6d0   : > { %6209 = vset.pattern.permute.xlu0 %v7717_v48  ;;  %6153 = vset.pattern.permute.xlu2 %v10053_v41 }
 0x6d1   : > { %6152 = vset.pattern.permute.xlu1 %v10044_v1 }
 0x6d2   : > { %v7972_v11 = vpop.permute.xlu2 %2806 }
 0x6d3   : > { %10071 = vst [vmem:[#allocation19_spill] sm:$0xff] %v7972_v11 }
 0x6d8   : > { %3236 = vperm.xlu0 %6209, %v7822_v13   ;;  %2897 = vperm.xlu2 %6153, %v7753_v26  }
 0x6d9   : > { %2891 = vperm.xlu1 %6152, %v7753_v26  }
 0x6db   : > { %v7969_v34 = vpop.permute.xlu1 %2788 }
 0x6e0   : > { %6214 = vset.pattern.permute.xlu0 %v10051_v5  ;;  %6156 = vset.pattern.permute.xlu2 %v7697_v44 }
 0x6e1   : > { %6155 = vset.pattern.permute.xlu1 %v10054_v10 }
 0x6e2   : > { %v7978_v22 = vpop.permute.xlu2 %2824 }
 0x6e3   : > { %10072 = vst [vmem:[#allocation18_spill] sm:$0xff] %v7978_v22 }
 0x6e8   : > { %3267 = vperm.xlu0 %6214, %v7843_v19   ;;  %2915 = vperm.xlu2 %6156, %v7753_v26  }
 0x6e9   : > { %2909 = vperm.xlu1 %6155, %v7753_v26  }
 0x6eb   : > { %v7975_v52 = vpop.permute.xlu1 %2800 }
 0x6f0   : > { %6219 = vset.pattern.permute.xlu0 %v10054_v10  ;;  %6158 = vset.pattern.permute.xlu2 %v7710_v23 }
 0x6f1   : > { %6157 = vset.pattern.permute.xlu1 %v7685_v59 }
 0x6f2   : > { %v7984_v42 = vpop.permute.xlu2 %2836 }
 0x6f3   : > { %10074 = vst [vmem:[#allocation20_spill] sm:$0xff] %v7984_v42 }
 0x6f8   : > { %3297 = vperm.xlu0 %6219, %v7843_v19   ;;  %2927 = vperm.xlu2 %6158, %v7753_v26  }
 0x6f9   : > { %2921 = vperm.xlu1 %6157, %v7753_v26  }
 0x6fb   : > { %v7981_v17 = vpop.permute.xlu1 %2818 }
 0x6fc   : > { %10073 = vst [vmem:[#allocation23_spill] sm:$0xff] %v7981_v17 }
 0x700   : > { %6224 = vset.pattern.permute.xlu0 %v7720_v60  ;;  %6161 = vset.pattern.permute.xlu2 %v7717_v48 }
 0x701   : > { %6160 = vset.pattern.permute.xlu1 %v7720_v60 }
 0x702   : > { %v7990_v9 = vpop.permute.xlu2 %2854 }
 0x703   : > { %10076 = vst [vmem:[#allocation22_spill] sm:$0xff] %v7990_v9 }
 0x708   : > { %3327 = vperm.xlu0 %6224, %v7843_v19   ;;  %2945 = vperm.xlu2 %6161, %v7753_v26  }
 0x709   : > { %2939 = vperm.xlu1 %6160, %v7753_v26  }
 0x70b   : > { %v7987_v46 = vpop.permute.xlu1 %2830 }
 0x70c   : > { %10075 = vst [vmem:[#allocation25_spill] sm:$0xff] %v7987_v46 }
 0x710   : > { %6163 = vset.pattern.permute.xlu2 %v7727_v4  ;;  %6228 = vset.pattern.permute.xlu0 %v7727_v4 }
 0x711   : > { %6162 = vset.pattern.permute.xlu1 %v7691_v18 }
 0x712   : > { %v7996_v62 = vpop.permute.xlu2 %2867 }
 0x718   : > { %2957 = vperm.xlu2 %6163, %v7753_v26  }
 0x719   : > { %2951 = vperm.xlu1 %6162, %v7753_v26  }
 0x71b   : > { %v7993_v51 = vpop.permute.xlu1 %2848 }
 0x71c   : > { %10077 = vst [vmem:[#allocation24_spill] sm:$0xff] %v7993_v51 }
 0x720   : > { %6166 = vset.pattern.permute.xlu2 %v10051_v5 }
 0x721   : > { %6165 = vset.pattern.permute.xlu1 %v10042_v16 }
 0x722   : > { %v8002_v20 = vpop.permute.xlu2 %2885 }
 0x728   : > { %2976 = vperm.xlu2 %6166, %v7774_v43  }
 0x729   : > { %2970 = vperm.xlu1 %6165, %v7774_v43  }
 0x72b   : > { %v7999_v29 = vpop.permute.xlu1 %2860 }
 0x72c   : > { %10078 = vst [vmem:[#allocation43_spill] sm:$0xff] %v7999_v29 }
 0x730   : > { %6168 = vset.pattern.permute.xlu2 %v10044_v1 }
 0x731   : > { %6167 = vset.pattern.permute.xlu1 %v10050_v58 }
 0x732   : > { %v8008_v26 = vpop.permute.xlu2 %2897 }
 0x738   : > { %2988 = vperm.xlu2 %6168, %v7774_v43  }
 0x739   : > { %2982 = vperm.xlu1 %6167, %v7774_v43  }
 0x740   : > { %6171 = vset.pattern.permute.xlu2 %v10054_v10 }
 0x741   : > { %6170 = vset.pattern.permute.xlu1 %v10052_v7 }
 0x748   : > { %3006 = vperm.xlu2 %6171, %v7774_v43  }
 0x749   : > { %3000 = vperm.xlu1 %6170, %v7774_v43  }
 0x750   : > { %6173 = vset.pattern.permute.xlu2 %v7685_v59 }
 0x751   : > { %6172 = vset.pattern.permute.xlu1 %v7697_v44 }
 0x758   : > { %3018 = vperm.xlu2 %6173, %v7774_v43  }
 0x759   : > { %3012 = vperm.xlu1 %6172, %v7774_v43  }
 0x760   : > { %6176 = vset.pattern.permute.xlu2 %v7720_v60 }
 0x761   : > { %6175 = vset.pattern.permute.xlu1 %v7707_v0 }
 0x768   : > { %3036 = vperm.xlu2 %6176, %v7774_v43  }
 0x769   : > { %3030 = vperm.xlu1 %6175, %v7774_v43  }
 0x770   : > { %6178 = vset.pattern.permute.xlu2 %v7691_v18 }
 0x771   : > { %6177 = vset.pattern.permute.xlu1 %v7717_v48 }
 0x778   : > { %3048 = vperm.xlu2 %6178, %v7774_v43  }
 0x779   : > { %3042 = vperm.xlu1 %6177, %v7774_v43  }
 0x780   : > { %6181 = vset.pattern.permute.xlu2 %v10042_v16 }
 0x781   : > { %6180 = vset.pattern.permute.xlu1 %v10049_v49 }
 0x788   : > { %3067 = vperm.xlu2 %6181, %v7801_v30  }
 0x789   : > { %3061 = vperm.xlu1 %6180, %v7801_v30  }
 0x790   : > { %6183 = vset.pattern.permute.xlu2 %v10050_v58 }
 0x791   : > { %6182 = vset.pattern.permute.xlu1 %v10051_v5 }
 0x798   : > { %3079 = vperm.xlu2 %6183, %v7801_v30  }
 0x799   : > { %3073 = vperm.xlu1 %6182, %v7801_v30  }
 0x7a0   : > { %6186 = vset.pattern.permute.xlu2 %v10052_v7 }
 0x7a1   : > { %6185 = vset.pattern.permute.xlu1 %v10053_v41 }
 0x7a8   : > { %3097 = vperm.xlu2 %6186, %v7801_v30  }
 0x7a9   : > { %3091 = vperm.xlu1 %6185, %v7801_v30  }
 0x7b0   : > { %6188 = vset.pattern.permute.xlu2 %v7697_v44 }
 0x7b1   : > { %6187 = vset.pattern.permute.xlu1 %v10054_v10 }
 0x7b8   : > { %3109 = vperm.xlu2 %6188, %v7801_v30  }
 0x7b9   : > { %3103 = vperm.xlu1 %6187, %v7801_v30  }
 0x7c0   : > { %6191 = vset.pattern.permute.xlu2 %v7707_v0 }
 0x7c1   : > { %6190 = vset.pattern.permute.xlu1 %v7710_v23 }
 0x7c8   : > { %3127 = vperm.xlu2 %6191, %v7801_v30  }
 0x7c9   : > { %3121 = vperm.xlu1 %6190, %v7801_v30  }
 0x7d0   : > { %6193 = vset.pattern.permute.xlu2 %v7717_v48 }
 0x7d1   : > { %6192 = vset.pattern.permute.xlu1 %v7720_v60 }
 0x7d8   : > { %3139 = vperm.xlu2 %6193, %v7801_v30  }
 0x7d9   : > { %3133 = vperm.xlu1 %6192, %v7801_v30  }
 0x7e0   : > { %6196 = vset.pattern.permute.xlu2 %v10049_v49 }
 0x7e1   : > { %6195 = vset.pattern.permute.xlu1 %v7727_v4 }
 0x7e8   : > { %3158 = vperm.xlu2 %6196, %v7822_v13  }
 0x7e9   : > { %3151 = vperm.xlu1 %6195, %v7801_v30   ;;  %v8014_v30 = vpop.permute.xlu2 %2915 }
 0x7ea   : > { %10079 = vst [vmem:[#allocation44_spill] sm:$0xff] %v8014_v30 }
 0x7f0   : > { %6198 = vset.pattern.permute.xlu2 %v10051_v5  ;;  %v8005_v5 = vpop.permute.xlu1 %2879 }
 0x7f1   : > { %6197 = vset.pattern.permute.xlu1 %v10042_v16  ;;  %v8020_v29 = vpop.permute.xlu2 %2927 }
 0x7f2   : > { %10081 = vst [vmem:[#allocation46_spill] sm:$0xff] %v8020_v29 }
 0x7f8   : > { %3170 = vperm.xlu2 %6198, %v7822_v13   ;;  %v8011_v43 = vpop.permute.xlu1 %2891 }
 0x7f9   : > { %3164 = vperm.xlu1 %6197, %v7822_v13   ;;  %v8026_v9 = vpop.permute.xlu2 %2945 }
 0x7fa   : > { %10083 = vst [vmem:[#allocation48_spill] sm:$0xff] %v8026_v9  ;;  %v8043_v9 = vpop.permute.xlu0 %2600 }
 0x800   : > { %6201 = vset.pattern.permute.xlu2 %v10053_v41  ;;  %v8017_v3 = vpop.permute.xlu1 %2909 }
 0x801   : > { %6200 = vset.pattern.permute.xlu1 %v10044_v1  ;;  %10080 = vst [vmem:[#allocation45_spill] sm:$0xff] %v8017_v3  ;;  %v8032_v32 = vpop.permute.xlu2 %2957 }
 0x802   : > { %10085 = vst [vmem:[#allocation50_spill] sm:$0xff] %v8032_v32 }
 0x808   : > { %3188 = vperm.xlu2 %6201, %v7822_v13   ;;  %v8023_v63 = vpop.permute.xlu1 %2921 }
 0x809   : > { %3182 = vperm.xlu1 %6200, %v7822_v13   ;;  %10082 = vst [vmem:[#allocation47_spill] sm:$0xff] %v8023_v63  ;;  %v8038_v51 = vpop.permute.xlu2 %2976 }
 0x810   : > { %6203 = vset.pattern.permute.xlu2 %v10054_v10  ;;  %v8029_v10 = vpop.permute.xlu1 %2939 }
 0x811   : > { %6202 = vset.pattern.permute.xlu1 %v10052_v7  ;;  %10084 = vst [vmem:[#allocation49_spill] sm:$0xff] %v8029_v10  ;;  %v8046_v14 = vpop.permute.xlu2 %2988  ;;  %v8051_v10 = vpop.permute.xlu0 %2630 }
 0x812   : > { %10087 = vst [vmem:[#allocation52_spill] sm:$0xff] %v8051_v10 }
 0x818   : > { %3200 = vperm.xlu2 %6203, %v7822_v13   ;;  %v8035_v21 = vpop.permute.xlu1 %2951 }
 0x819   : > { %3194 = vperm.xlu1 %6202, %v7822_v13   ;;  %10086 = vst [vmem:[#allocation51_spill] sm:$0xff] %v8035_v21  ;;  %v8059_v55 = vpop.permute.xlu0 %2660 }
 0x81a   : > { %10090 = vst [vmem:[#allocation55_spill] sm:$0xff] %v8059_v55 }
 0x820   : > { %6206 = vset.pattern.permute.xlu2 %v7710_v23  ;;  %v8041_v12 = vpop.permute.xlu1 %2970 }
 0x821   : > { %6205 = vset.pattern.permute.xlu1 %v7685_v59  ;;  %v8067_v25 = vpop.permute.xlu0 %2691 }
 0x828   : > { %3218 = vperm.xlu2 %6206, %v7822_v13   ;;  %v8049_v32 = vpop.permute.xlu1 %2982 }
 0x829   : > { %3212 = vperm.xlu1 %6205, %v7822_v13   ;;  %v8075_v29 = vpop.permute.xlu0 %2721 }
 0x82a   : > { %10095 = vst [vmem:[#allocation60_spill] sm:$0xff] %v8075_v29 }
 0x830   : > { %6208 = vset.pattern.permute.xlu2 %v7720_v60  ;;  %v8054_v60 = vpop.permute.xlu2 %3006  ;;  %v8057_v21 = vpop.permute.xlu1 %3000 }
 0x831   : > { %6207 = vset.pattern.permute.xlu1 %v7707_v0  ;;  %10088 = vst [vmem:[#allocation53_spill] sm:$0xff] %v8054_v60 }
 0x832   : > { %10089 = vst [vmem:[#allocation54_spill] sm:$0xff] %v8057_v21 }
 0x838   : > { %3230 = vperm.xlu2 %6208, %v7822_v13   ;;  %v8062_v56 = vpop.permute.xlu2 %3018  ;;  %v8065_v42 = vpop.permute.xlu1 %3012 }
 0x839   : > { %3224 = vperm.xlu1 %6207, %v7822_v13   ;;  %10091 = vst [vmem:[#allocation56_spill] sm:$0xff] %v8062_v56  ;;  %v8083_v56 = vpop.permute.xlu0 %2751 }
 0x83a   : > { %10092 = vst [vmem:[#allocation57_spill] sm:$0xff] %v8065_v42 }
 0x83b   : > { %10098 = vst [vmem:[#allocation63_spill] sm:$0xff] %v8083_v56 }
 0x840   : > { %6211 = vset.pattern.permute.xlu2 %v7727_v4  ;;  %v8070_v6 = vpop.permute.xlu2 %3036  ;;  %v8073_v46 = vpop.permute.xlu1 %3030 }
 0x841   : > { %6210 = vset.pattern.permute.xlu1 %v7691_v18  ;;  %10093 = vst [vmem:[#allocation58_spill] sm:$0xff] %v8070_v6  ;;  %v8091_v6 = vpop.permute.xlu0 %2782 }
 0x842   : > { %10094 = vst [vmem:[#allocation59_spill] sm:$0xff] %v8073_v46 }
 0x848   : > { %3248 = vperm.xlu2 %6211, %v7822_v13   ;;  %v8078_v55 = vpop.permute.xlu2 %3048 }
 0x849   : > { %3242 = vperm.xlu1 %6210, %v7822_v13   ;;  %10096 = vst [vmem:[#allocation61_spill] sm:$0xff] %v8078_v55  ;;  %v8081_v13 = vpop.permute.xlu1 %3042 }
 0x84a   : > { %10097 = vst [vmem:[#allocation62_spill] sm:$0xff] %v8081_v13  ;;  %v8099_v13 = vpop.permute.xlu0 %2812 }
 0x84b   : > { %10099 = vst [vmem:[#allocation64_spill] sm:$0xff] %v8099_v13 }
 0x850   : > { %6213 = vset.pattern.permute.xlu2 %v10042_v16  ;;  %v8086_v16 = vpop.permute.xlu2 %3067 }
 0x851   : > { %6212 = vset.pattern.permute.xlu1 %v10049_v49  ;;  %v8089_v49 = vpop.permute.xlu1 %3061 }
 0x852   : > { %v8107_v56 = vpop.permute.xlu0 %2842  ;;  %v3385_v11 = vrot.slane %v8089_v49, 4 }
 0x853   : > { %10102 = vst [vmem:[#allocation67_spill] sm:$0xff] %v8107_v56 }
 0x858   : > { %3261 = vperm.xlu2 %6213, %v7843_v19   ;;  %v8094_v46 = vpop.permute.xlu2 %3079 }
 0x859   : > { %3255 = vperm.xlu1 %6212, %v7843_v19   ;;  %v8097_v55 = vpop.permute.xlu1 %3073 }
 0x85a   : > { %v8115_v22 = vpop.permute.xlu0 %2873 }
 0x860   : > { %6216 = vset.pattern.permute.xlu2 %v10044_v1  ;;  %v8102_v1 = vpop.permute.xlu2 %3097 }
 0x861   : > { %6215 = vset.pattern.permute.xlu1 %v10050_v58  ;;  %10100 = vst [vmem:[#allocation65_spill] sm:$0xff] %v8102_v1  ;;  %v8105_v58 = vpop.permute.xlu1 %3091 }
 0x862   : > { %10101 = vst [vmem:[#allocation66_spill] sm:$0xff] %v8105_v58  ;;  %v8123_v63 = vpop.permute.xlu0 %2903 }
 0x863   : > { %10107 = vst [vmem:[#allocation72_spill] sm:$0xff] %v8123_v63 }
 0x868   : > { %3279 = vperm.xlu2 %6216, %v7843_v19   ;;  %v8110_v10 = vpop.permute.xlu2 %3109 }
 0x869   : > { %3273 = vperm.xlu1 %6215, %v7843_v19   ;;  %10103 = vst [vmem:[#allocation68_spill] sm:$0xff] %v8110_v10  ;;  %v8113_v33 = vpop.permute.xlu1 %3103 }
 0x86a   : > { %10104 = vst [vmem:[#allocation69_spill] sm:$0xff] %v8113_v33  ;;  %v8131_v42 = vpop.permute.xlu0 %2933  ;;  %v3347_v33 = vrot.slane %v7963_v31, 4 }
 0x86b   : > { %10110 = vst [vmem:[#allocation75_spill] sm:$0xff] %v8131_v42 }
 0x870   : > { %6218 = vset.pattern.permute.xlu2 %v10052_v7  ;;  %v8118_v7 = vpop.permute.xlu2 %3127 }
 0x871   : > { %6217 = vset.pattern.permute.xlu1 %v10053_v41  ;;  %10105 = vst [vmem:[#allocation70_spill] sm:$0xff] %v8118_v7  ;;  %v8121_v41 = vpop.permute.xlu1 %3121 }
 0x872   : > { %10106 = vst [vmem:[#allocation71_spill] sm:$0xff] %v8121_v41  ;;  %v2965_v7 = vpop.permute.xlu0 %2964 }
 0x878   : > { %3291 = vperm.xlu2 %6218, %v7843_v19   ;;  %v8126_v56 = vpop.permute.xlu2 %3139 }
 0x879   : > { %3285 = vperm.xlu1 %6217, %v7843_v19   ;;  %10108 = vst [vmem:[#allocation73_spill] sm:$0xff] %v8126_v56  ;;  %v8129_v10 = vpop.permute.xlu1 %3133 }
 0x87a   : > { %10109 = vst [vmem:[#allocation74_spill] sm:$0xff] %v8129_v10  ;;  %v8143_v29 = vpop.permute.xlu0 %2994 }
 0x87b   : > { %10112 = vst [vmem:[#allocation77_spill] sm:$0xff] %v8143_v29 }
 0x880   : > { %6221 = vset.pattern.permute.xlu2 %v7685_v59  ;;  %v3159_v59 = vpop.permute.xlu2 %3158 }
 0x881   : > { %6220 = vset.pattern.permute.xlu1 %v7697_v44  ;;  %v8135_v44 = vpop.permute.xlu1 %3151 }
 0x882   : > { %10111 = vst [vmem:[#allocation76_spill] sm:$0xff] %v8135_v44 }
 0x888   : > { %3309 = vperm.xlu2 %6221, %v7843_v19   ;;  %v8138_v41 = vpop.permute.xlu2 %3170 }
 0x889   : > { %3303 = vperm.xlu1 %6220, %v7843_v19   ;;  %v8141_v56 = vpop.permute.xlu1 %3164 }
 0x890   : > { %6223 = vset.pattern.permute.xlu2 %v7707_v0  ;;  %v8146_v10 = vpop.permute.xlu2 %3188 }
 0x891   : > { %6222 = vset.pattern.permute.xlu1 %v7710_v23  ;;  %v8149_v0 = vpop.permute.xlu1 %3182  ;;  %v8151_v23 = vpop.permute.xlu0 %3024 }
 0x892   : > { %10113 = vst [vmem:[#allocation78_spill] sm:$0xff] %v8151_v23 }
 0x898   : > { %3321 = vperm.xlu2 %6223, %v7843_v19   ;;  %v8154_v42 = vpop.permute.xlu2 %3200 }
 0x899   : > { %3315 = vperm.xlu1 %6222, %v7843_v19   ;;  %10114 = vst [vmem:[#allocation79_spill] sm:$0xff] %v8154_v42  ;;  %v8157_v39 = vpop.permute.xlu1 %3194  ;;  %v8159_v30 = vpop.permute.xlu0 %3054  ;;  %v3359_v42 = vrot.slane %v7996_v62, 4 }
 0x89a   : > { %10115 = vst [vmem:[#allocation80_spill] sm:$0xff] %v8157_v39 }
 0x8a0   : > { %6226 = vset.pattern.permute.xlu2 %v7691_v18  ;;  %v8161_v17 = vpop.permute.xlu2 %3218 }
 0x8a1   : > { %6225 = vset.pattern.permute.xlu1 %v7717_v48  ;;  %10116 = vst [vmem:[#allocation81_spill] sm:$0xff] %v8161_v17  ;;  %v8164_v18 = vpop.permute.xlu1 %3212  ;;  %v8166_v48 = vpop.permute.xlu0 %3085  ;;  %v3360_v17 = vsel %vm761_vm0, %v3359_v42, %v7918_v61  ;;  %v3362_v42 = vsel %vm761_vm0, %v7996_v62, %v3361_v54  ;;  %v3459_v54 = vrot.slane %v7960_v45, 4 }
 0x8a2   : > { %10117 = vst [vmem:[#allocation82_spill] sm:$0xff] %v8164_v18  ;;  %v3366_v13 = vperm.slane %v3360_v17, %v6745_v8  ;;  %v3349_v17 = vrot.slane %v7885_v28, 4 }
 0x8a4   : > { %v3350_v62 = vsel %vm761_vm0, %v7963_v31, %v3349_v17 }
 0x8a8   : > { %3339 = vperm.xlu2 %6226, %v7843_v19   ;;  %v8168_v60 = vpop.permute.xlu2 %3230 }
 0x8a9   : > { %3333 = vperm.xlu1 %6225, %v7843_v19   ;;  %10118 = vst [vmem:[#allocation83_spill] sm:$0xff] %v8168_v60  ;;  %v8174_v36 = vpop.permute.xlu0 %3115  ;;  %v3371_v60 = vrot.slane %v3159_v59, 4 }
 0x8aa   : > { %10120 = vst [vmem:[#allocation85_spill] sm:$0xff] %v8174_v36 }
 0x8ab   : > { %v8171_v23 = vpop.permute.xlu1 %3224  ;;  %v3372_v53 = vsel %vm761_vm0, %v3371_v60, %v2965_v7 }
 0x8ac   : > { %10119 = vst [vmem:[#allocation84_spill] sm:$0xff] %v8171_v23 }
 0x8b0   : > { %v8177_v37 = vpop.permute.xlu2 %3248 }
 0x8b1   : > { %6227 = vset.pattern.permute.xlu1 %v7727_v4  ;;  %v3348_v4 = vsel %vm761_vm0, %v3347_v33, %v7885_v28  ;;  %v8187_v3 = vpop.permute.xlu0 %3145 }
 0x8b2   : > { %v3354_v23 = vperm.slane %v3348_v4, %v6745_v8  ;;  %10122 = vst [vmem:[#allocation87_spill] sm:$0xff] %v8187_v3  ;;  %v3471_v3 = vrot.slane %v8115_v22, 4 }
 0x8b4   : > { %v3397_v33 = vrot.slane %v3354_v23, 4 }
 0x8b6   : > { %v3398_v61 = vsel %vm761_vm0, %v3366_v13, %v3397_v33 }
 0x8b8   : > { %v3262_v21 = vpop.permute.xlu2 %3261 }
 0x8b9   : > { %3345 = vperm.xlu1 %6227, %v7843_v19   ;;  %v3373_v19 = vrot.slane %v2965_v7, 4  ;;  %v3495_v60 = vrot.slane %v3262_v21, 4  ;;  %v8206_v39 = vpop.permute.xlu0 %3176 }
 0x8bb   : > { %v8183_v18 = vpop.permute.xlu1 %3242  ;;  %v3374_v36 = vsel %vm761_vm0, %v3159_v59, %v3373_v19  ;;  %v3378_v59 = vperm.slane %v3372_v53, %v6745_v8 }
 0x8bc   : > { %10121 = vst [vmem:[#allocation86_spill] sm:$0xff] %v8183_v18  ;;  %v3395_v18 = vrot.slane %v3366_v13, 4  ;;  %v3382_v4 = vperm.slane %v3374_v36, %v6745_v8  ;;  %v3370_v36 = vperm.slane %v3362_v42, %v6745_v8  ;;  %v3406_v13 = vperm.slane %v3398_v61, %v6777_v15 }
 0x8bd   : > { %v3358_v42 = vperm.slane %v3350_v62, %v6745_v8 }
 0x8be   : > { %v3433_v1 = vrot.slane %v3382_v4, 4  ;;  %v3396_v33 = vsel %vm761_vm0, %v3395_v18, %v3354_v23  ;;  %v3407_v58 = vrot.slane %v3370_v36, 4  ;;  %v3483_v18 = vrot.slane %v8141_v56, 4 }
 0x8bf   : > { %v8221_v23 = vperm.slane %v3396_v33, %v6777_v15  ;;  %v3449_v62 = vrot.slane %v3406_v13, 4  ;;  %v3409_v29 = vrot.slane %v3358_v42, 4 }
 0x8cb   : > { %v3256_v19 = vpop.permute.xlu1 %3255 }
 0x8cc   : > { %v3383_v7 = vrot.slane %v3256_v19, 4  ;;  %v3386_v63 = vsel %vm761_vm0, %v3256_v19, %v3385_v11  ;;  %v3472_v11 = vsel %vm761_vm0, %v3471_v3, %v7927_v2  ;;  %v3421_v19 = vrot.slane %v3378_v59, 4 }
 0x8cd   : > { %v3394_v28 = vperm.slane %v3386_v63, %v6745_v8  ;;  %v3496_v63 = vsel %vm761_vm0, %v3495_v60, %v8086_v16  ;;  %v3460_v3 = vsel %vm761_vm0, %v3459_v54, %v7882_v27  ;;  %v3497_v60 = vrot.slane %v8086_v16, 4 }
 0x8ce   : > { %v3384_v53 = vsel %vm761_vm0, %v3383_v7, %v8089_v49  ;;  %v3445_v16 = vrot.slane %v8221_v23, 4 }
 0x8cf   : > { %v3390_v31 = vperm.slane %v3384_v53, %v6745_v8  ;;  %v3431_v17 = vrot.slane %v3394_v28, 4  ;;  %v3434_v44 = vsel %vm761_vm0, %v3394_v28, %v3433_v1  ;;  %v3502_v53 = vperm.slane %v3496_v63, %v6745_v8 }
 0x8d0   : > { %v8230_v1 = vperm.slane %v3434_v44, %v6777_v15  ;;  %v3408_v44 = vsel %vm761_vm0, %v3407_v58, %v3358_v42  ;;  %v3466_v63 = vperm.slane %v3460_v3, %v6745_v8 }
 0x8d1   : > { %v3419_v49 = vrot.slane %v3390_v31, 4  ;;  %v3422_v61 = vsel %vm761_vm0, %v3390_v31, %v3421_v19  ;;  %v3432_v54 = vsel %vm761_vm0, %v3431_v17, %v3382_v4  ;;  %v3531_v17 = vrot.slane %v3502_v53, 4 }
 0x8d2   : > { %v3430_v7 = vperm.slane %v3422_v61, %v6777_v15  ;;  %v3478_v61 = vperm.slane %v3472_v11, %v6745_v8  ;;  %v3438_v58 = vperm.slane %v3432_v54, %v6777_v15  ;;  %v3455_v42 = vrot.slane %v8230_v1, 4 }
 0x8d3   : > { %v3420_v28 = vsel %vm761_vm0, %v3419_v49, %v3378_v59  ;;  %v8243_v59 = vpop.permute.xlu0 %3206  ;;  %v3484_v49 = vsel %vm761_vm0, %v3483_v18, %v8041_v12  ;;  %v3414_v3 = vperm.slane %v3408_v44, %v6777_v15  ;;  %v3461_v54 = vrot.slane %v7882_v27, 4 }
 0x8d4   : > { %v3450_v33 = vsel %vm761_vm0, %v3430_v7, %v3449_v62  ;;  %v3447_v19 = vrot.slane %v3430_v7, 4  ;;  %v8235_v31 = vperm.slane %v3420_v28, %v6777_v15  ;;  %v3498_v7 = vsel %vm761_vm0, %v3262_v21, %v3497_v60 }
 0x8d5   : > { %5148 = vrot.lane.b32.xlu1 %v3450_v33, %s9958_s16  ;;  %v3410_v62 = vsel %vm761_vm0, %v3370_v36, %v3409_v29  ;;  %v3507_v18 = vrot.slane %v3478_v61, 4  ;;  %v3490_v21 = vperm.slane %v3484_v49, %v6745_v8  ;;  %v3485_v60 = vrot.slane %v8041_v12, 4  ;;  %s10131_s16 = smov 36  }
 0x8d6   : > { %v3448_v4 = vsel %vm761_vm0, %v3447_v19, %v3406_v13  ;;  %v3446_v11 = vsel %vm761_vm0, %v8235_v31, %v3445_v16  ;;  %v3506_v13 = vperm.slane %v3498_v7, %v6745_v8  ;;  %v3418_v28 = vperm.slane %v3410_v62, %v6777_v15 }
 0x8d7   : > { %5144 = vrot.lane.b32.xlu0 %v3448_v4, %s9957_s27  ;;  %5140 = vrot.lane.b32.xlu2 %v3446_v11, %s9956_s28  ;;  %v3473_v33 = vrot.slane %v7927_v2, 4  ;;  %v3451_v29 = vrot.slane %v3438_v58, 4  ;;  %v3508_v36 = vsel %vm761_vm0, %v3507_v18, %v3466_v63  ;;  %v3532_v19 = vsel %vm761_vm0, %v3531_v17, %v3490_v21  ;;  %s10129_s28 = smov 28   ;;  %s10130_s27 = smov 26  }
 0x8d8   : > { %v3486_v16 = vsel %vm761_vm0, %v8141_v56, %v3485_v60  ;;  %v3456_v44 = vsel %vm761_vm0, %v3455_v42, %v3418_v28  ;;  %v3453_v49 = vrot.slane %v3414_v3, 4  ;;  %v3543_v7 = vrot.slane %v3506_v13, 4 }
 0x8d9   : > { %v3474_v12 = vsel %vm761_vm0, %v8115_v22, %v3473_v33  ;;  %v3462_v2 = vsel %vm761_vm0, %v7960_v45, %v3461_v54  ;;  %v3514_v27 = vperm.slane %v3508_v36, %v6777_v15  ;;  %v3538_v56 = vperm.slane %v3532_v19, %v6777_v15 }
 0x8da   : > { %v3454_v17 = vsel %vm761_vm0, %v3438_v58, %v3453_v49  ;;  %v3494_v11 = vperm.slane %v3486_v16, %v6745_v8  ;;  %v3452_v22 = vsel %vm761_vm0, %v3451_v29, %v3414_v3  ;;  %v3482_v62 = vperm.slane %v3474_v12, %v6745_v8 }
 0x8db   : > { %v8273_v4 = vpop.permute.xlu0 %3236  ;;  %v3470_v45 = vperm.slane %v3462_v2, %v6745_v8  ;;  %v3509_v42 = vrot.slane %v3466_v63, 4  ;;  %v3595_v58 = vrot.slane %v8138_v41, 4  ;;  %v3533_v60 = vrot.slane %v3490_v21, 4 }
 0x8dc   : > { %v3544_v18 = vsel %vm761_vm0, %v3543_v7, %v3494_v11  ;;  %v3557_v33 = vrot.slane %v3514_v27, 4  ;;  %v3555_v36 = vrot.slane %v3538_v56, 4  ;;  %v3519_v29 = vrot.slane %v3482_v62, 4 }
 0x8dd   : > { %5160 = vrot.lane.b32.xlu1 %v3456_v44, %s9955_s24  ;;  %v8288_v54 = vperm.slane %v3544_v18, %v6777_v15  ;;  %v3534_v3 = vsel %vm761_vm0, %v3502_v53, %v3533_v60  ;;  %v3521_v16 = vrot.slane %v3470_v45, 4  ;;  %v3457_v44 = vrot.slane %v3418_v28, 4  ;;  %s10128_s24 = smov 30  }
 0x8de   : > { %v3558_v19 = vsel %vm761_vm0, %v3538_v56, %v3557_v33  ;;  %v3510_v63 = vsel %vm761_vm0, %v3478_v61, %v3509_v42  ;;  %v3583_v49 = vrot.slane %v8005_v5, 4  ;;  %v3596_v21 = vsel %vm761_vm0, %v3595_v58, %v8038_v51 }
 0x8df   : > { %5156 = vrot.lane.b32.xlu0 %v3454_v17, %s9954_s26  ;;  %5152 = vrot.lane.b32.xlu2 %v3452_v22, %s9953_s14  ;;  %v3556_v7 = vsel %vm761_vm0, %v3555_v36, %v3514_v27  ;;  %v3458_v53 = vsel %vm761_vm0, %v8230_v1, %v3457_v44  ;;  %v3520_v2 = vsel %vm761_vm0, %v3519_v29, %v3470_v45  ;;  %v3571_v28 = vrot.slane %v8091_v6, 4  ;;  %s10126_s14 = smov 22   ;;  %s10127_s26 = smov 20  }
 0x8e0   : > { %v3542_v17 = vperm.slane %v3534_v3, %v6777_v15  ;;  %v3563_v61 = vrot.slane %v8288_v54, 4  ;;  %v3518_v56 = vperm.slane %v3510_v63, %v6777_v15  ;;  %v3602_v27 = vperm.slane %v3596_v21, %v6745_v8  ;;  %v8327_v21 = vpop.permute.xlu1 %3273 }
 0x8e1   : > { %v3545_v42 = vrot.slane %v3494_v11, 4  ;;  %v3522_v18 = vsel %vm761_vm0, %v3482_v62, %v3521_v16  ;;  %v3584_v1 = vsel %vm761_vm0, %v3583_v49, %v7924_v50  ;;  %v3526_v45 = vperm.slane %v3520_v2, %v6777_v15 }
 0x8e2   : > { %v3585_v58 = vrot.slane %v7924_v50, 4  ;;  %v3559_v36 = vrot.slane %v3542_v17, 4  ;;  %v3561_v3 = vrot.slane %v3518_v56, 4  ;;  %v3530_v11 = vperm.slane %v3522_v18, %v6777_v15 }
 0x8e3   : > { %v3268_v12 = vpop.permute.xlu0 %3267  ;;  %v3546_v33 = vsel %vm761_vm0, %v3506_v13, %v3545_v42  ;;  %v3572_v62 = vsel %vm761_vm0, %v3571_v28, %v7891_v38  ;;  %v3590_v16 = vperm.slane %v3584_v1, %v6745_v8  ;;  %v3645_v50 = vrot.slane %v3602_v27, 4 }
 0x8e4   : > { %v3607_v22 = vrot.slane %v3268_v12, 4  ;;  %v3586_v29 = vsel %vm761_vm0, %v8005_v5, %v3585_v58  ;;  %v3609_v44 = vrot.slane %v8097_v55, 4  ;;  %v3562_v63 = vsel %vm761_vm0, %v3542_v17, %v3561_v3 }
 0x8e5   : > { %5172 = vrot.lane.b32.xlu1 %v3558_v19, %s9952_s25  ;;  %v3564_v19 = vsel %vm761_vm0, %v3563_v61, %v3526_v45  ;;  %s10125_s25 = smov 24   ;;  %v3554_v49 = vperm.slane %v3546_v33, %v6777_v15  ;;  %v3573_v5 = vrot.slane %v7891_v38, 4  ;;  %v3569_v2 = vrot.slane %v3530_v11, 4 }
 0x8e6   : > { %v3608_v60 = vsel %vm761_vm0, %v3607_v22, %v8097_v55  ;;  %v3594_v55 = vperm.slane %v3586_v29, %v6745_v8  ;;  %v3619_v28 = vrot.slane %v3590_v16, 4  ;;  %v3597_v17 = vrot.slane %v8038_v51, 4 }
 0x8e7   : > { %5168 = vrot.lane.b32.xlu0 %v3556_v7, %s10123_s21  ;;  %5164 = vrot.lane.b32.xlu2 %v3458_v53, %s10124_s17  ;;  %v3614_v13 = vperm.slane %v3608_v60, %v6745_v8  ;;  %v3560_v7 = vsel %vm761_vm0, %v3559_v36, %v3518_v56  ;;  %v3578_v53 = vperm.slane %v3572_v62, %v6745_v8  ;;  %v3719_v18 = vrot.slane %v8327_v21, 4 }
 0x8e8   : > { %v3610_v22 = vsel %vm761_vm0, %v3268_v12, %v3609_v44  ;;  %v3567_v56 = vrot.slane %v3554_v49, 4  ;;  %v3574_v38 = vsel %vm761_vm0, %v8091_v6, %v3573_v5  ;;  %v3598_v1 = vsel %vm761_vm0, %v8138_v41, %v3597_v17 }
 0x8e9   : > { %v3646_v61 = vsel %vm761_vm0, %v3614_v13, %v3645_v50  ;;  %v3643_v42 = vrot.slane %v3614_v13, 4  ;;  %v3570_v58 = vsel %vm761_vm0, %v3554_v49, %v3569_v2  ;;  %v3621_v33 = vrot.slane %v3578_v53, 4 }
 0x8ea   : > { %v8345_v60 = vperm.slane %v3646_v61, %v6777_v15  ;;  %v3618_v12 = vperm.slane %v3610_v22, %v6745_v8  ;;  %v3565_v36 = vrot.slane %v3526_v45, 4  ;;  %v3695_v6 = vrot.slane %v8002_v20, 4 }
 0x8eb   : > { %v3644_v51 = vsel %vm761_vm0, %v3643_v42, %v3602_v27  ;;  %v3631_v3 = vrot.slane %v3594_v55, 4  ;;  %v3720_v41 = vsel %vm761_vm0, %v3719_v18, %v8094_v46  ;;  %v3568_v62 = vsel %vm761_vm0, %v3567_v56, %v3530_v11 }
 0x8ec   : > { %v3606_v29 = vperm.slane %v3598_v1, %v6745_v8  ;;  %v3566_v27 = vsel %vm761_vm0, %v8288_v54, %v3565_v36  ;;  %v3622_v50 = vsel %vm761_vm0, %v3590_v16, %v3621_v33  ;;  %v3650_v45 = vperm.slane %v3644_v51, %v6777_v15 }
 0x8ed   : > { %5184 = vrot.lane.b32.xlu1 %v3564_v19, %s10125_s25  ;;  %v3620_v19 = vsel %vm761_vm0, %v3619_v28, %v3578_v53  ;;  %v3671_v44 = vrot.slane %v8345_v60, 4  ;;  %v3655_v11 = vrot.slane %v3618_v12, 4  ;;  %v3726_v49 = vperm.slane %v3720_v41, %v6745_v8 }
 0x8ee   : > { %v3626_v13 = vperm.slane %v3620_v19, %v6777_v15  ;;  %v3630_v5 = vperm.slane %v3622_v50, %v6777_v15  ;;  %v3696_v54 = vsel %vm761_vm0, %v3695_v6, %v8067_v25  ;;  %v3667_v16 = vrot.slane %v3650_v45, 4 }
 0x8ef   : > { %5180 = vrot.lane.b32.xlu0 %v3562_v63, %s10126_s14  ;;  %5176 = vrot.lane.b32.xlu2 %v3560_v7, %s10127_s26  ;;  %v3582_v63 = vperm.slane %v3574_v38, %v6745_v8  ;;  %v3707_v7 = vrot.slane %v8206_v39, 4  ;;  %v3656_v2 = vsel %vm761_vm0, %v3655_v11, %v3606_v29  ;;  %v3683_v28 = vrot.slane %v7969_v34, 4 }
 0x8f0   : > { %v3672_v61 = vsel %vm761_vm0, %v3671_v44, %v3630_v5  ;;  %v3669_v22 = vrot.slane %v3626_v13, 4  ;;  %v3755_v42 = vrot.slane %v3726_v49, 4  ;;  %v3702_v18 = vperm.slane %v3696_v54, %v6745_v8 }
 0x8f1   : > { %v3632_v53 = vsel %vm761_vm0, %v3631_v3, %v3582_v63  ;;  %v3708_v17 = vsel %vm761_vm0, %v3707_v7, %v8049_v32  ;;  %v3662_v1 = vperm.slane %v3656_v2, %v6777_v15  ;;  %v3668_v51 = vsel %vm761_vm0, %v3667_v16, %v3626_v13 }
 0x8f2   : > { %v3670_v56 = vsel %vm761_vm0, %v3650_v45, %v3669_v22  ;;  %v3638_v38 = vperm.slane %v3632_v53, %v6777_v15  ;;  %v3684_v33 = vsel %vm761_vm0, %v3683_v28, %v7888_v24  ;;  %v3657_v36 = vrot.slane %v3606_v29, 4  ;;  %v3280_v28 = vpop.permute.xlu2 %3279 }
 0x8f3   : > { %v3633_v19 = vrot.slane %v3582_v63, 4  ;;  %v3731_v3 = vrot.slane %v3702_v18, 4  ;;  %v3709_v45 = vrot.slane %v8049_v32, 4  ;;  %v3673_v63 = vrot.slane %v3630_v5, 4 }
 0x8f4   : > { %v3677_v41 = vrot.slane %v3638_v38, 4  ;;  %v3658_v29 = vsel %vm761_vm0, %v3618_v12, %v3657_v36  ;;  %v3685_v11 = vrot.slane %v7888_v24, 4  ;;  %v3697_v53 = vrot.slane %v8067_v25, 4 }
 0x8f5   : > { %5196 = vrot.lane.b32.xlu1 %v3570_v58, %s10128_s24  ;;  %v3714_v58 = vperm.slane %v3708_v17, %v6745_v8  ;;  %v3634_v50 = vsel %vm761_vm0, %v3594_v55, %v3633_v19  ;;  %v3721_v55 = vrot.slane %v8094_v46, 4  ;;  %v3674_v32 = vsel %vm761_vm0, %v8345_v60, %v3673_v63 }
 0x8f6   : > { %v3678_v44 = vsel %vm761_vm0, %v3662_v1, %v3677_v41  ;;  %v3642_v16 = vperm.slane %v3634_v50, %v6777_v15  ;;  %v3666_v12 = vperm.slane %v3658_v29, %v6777_v15  ;;  %v3710_v24 = vsel %vm761_vm0, %v8206_v39, %v3709_v45 }
 0x8f7   : > { %5192 = vrot.lane.b32.xlu0 %v3568_v62, %s10129_s28  ;;  %5188 = vrot.lane.b32.xlu2 %v3566_v27, %s10130_s27  ;;  %v3756_v6 = vsel %vm761_vm0, %v3755_v42, %v3714_v58  ;;  %v3675_v62 = vrot.slane %v3662_v1, 4  ;;  %v3690_v27 = vperm.slane %v3684_v33, %v6745_v8  ;;  %v3757_v46 = vrot.slane %v3714_v58, 4  ;;  %v8420_v42 = vpop.permute.xlu1 %3285 }
 0x8f8   : > { %v8393_v13 = vperm.slane %v3756_v6, %v6777_v15  ;;  %v3722_v17 = vsel %vm761_vm0, %v8327_v21, %v3721_v55  ;;  %v3686_v60 = vsel %vm761_vm0, %v7969_v34, %v3685_v11  ;;  %v3718_v39 = vperm.slane %v3710_v24, %v6745_v8 }
 0x8f9   : > { %v3676_v7 = vsel %vm761_vm0, %v3675_v62, %v3638_v38  ;;  %v3732_v54 = vsel %vm761_vm0, %v3731_v3, %v3690_v27  ;;  %v3733_v5 = vrot.slane %v3690_v27, 4  ;;  %v3679_v38 = vrot.slane %v3666_v12, 4 }
 0x8fa   : > { %v3779_v2 = vrot.slane %v8393_v13, 4  ;;  %v3738_v25 = vperm.slane %v3732_v54, %v6777_v15  ;;  %v3758_v1 = vsel %vm761_vm0, %v3726_v49, %v3757_v46  ;;  %v3807_v21 = vrot.slane %v8011_v43, 4  ;;  %v8442_v29 = vpop.permute.xlu2 %3291 }
 0x8fb   : > { %v3734_v22 = vsel %vm761_vm0, %v3702_v18, %v3733_v5  ;;  %v3831_v58 = vrot.slane %v3280_v28, 4  ;;  %v3730_v34 = vperm.slane %v3722_v17, %v6745_v8  ;;  %v3766_v36 = vperm.slane %v3758_v1, %v6777_v15 }
 0x8fc   : > { %v3742_v33 = vperm.slane %v3734_v22, %v6777_v15  ;;  %v3694_v19 = vperm.slane %v3686_v60, %v6745_v8  ;;  %v3769_v49 = vrot.slane %v3718_v39, 4  ;;  %v3680_v6 = vsel %vm761_vm0, %v3679_v38, %v3642_v16 }
 0x8fd   : > { %5208 = vrot.lane.b32.xlu1 %v3672_v61, %s10131_s16  ;;  %v3698_v61 = vsel %vm761_vm0, %v8002_v20, %v3697_v53  ;;  %v3808_v3 = vsel %vm761_vm0, %v3807_v21, %v7933_v47  ;;  %v3832_v41 = vsel %vm761_vm0, %v3831_v58, %v8166_v48  ;;  %v3767_v62 = vrot.slane %v3730_v34, 4 }
 0x8fe   : > { %v3706_v20 = vperm.slane %v3698_v61, %v6745_v8  ;;  %v3795_v27 = vrot.slane %v7966_v35, 4  ;;  %v3770_v45 = vsel %vm761_vm0, %v3730_v34, %v3769_v49  ;;  %v3785_v63 = vrot.slane %v3742_v33, 4 }
 0x8ff   : > { %5204 = vrot.lane.b32.xlu0 %v3670_v56, %s10132_s22  ;;  %5200 = vrot.lane.b32.xlu2 %v3668_v51, %s10133_s0  ;;  %v3681_v56 = vrot.slane %v3642_v16, 4  ;;  %v3780_v51 = vsel %vm761_vm0, %v3779_v2, %v3738_v25  ;;  %v3783_v11 = vrot.slane %v3766_v36, 4  ;;  %v8445_v54 = vperm.slane %v3808_v3, %v6745_v8 }
 0x900   : > { %v3743_v50 = vrot.slane %v3706_v20, 4  ;;  %v8448_v55 = vperm.slane %v3832_v41, %v6745_v8  ;;  %v3833_v16 = vrot.slane %v8166_v48, 4  ;;  %v3786_v53 = vsel %vm761_vm0, %v3766_v36, %v3785_v63 }
 0x901   : > { %v3682_v18 = vsel %vm761_vm0, %v3666_v12, %v3681_v56  ;;  %v8454_v12 = vperm.slane %v3770_v45, %v6777_v15  ;;  %v3768_v5 = vsel %vm761_vm0, %v3767_v62, %v3718_v39  ;;  %v3796_v24 = vsel %vm761_vm0, %v3795_v27, %v8043_v9 }
 0x902   : > { %v3781_v2 = vrot.slane %v3738_v25, 4  ;;  %v3744_v46 = vsel %vm761_vm0, %v3743_v50, %v3694_v19  ;;  %v3834_v48 = vsel %vm761_vm0, %v3280_v28, %v3833_v16  ;;  %v3784_v60 = vsel %vm761_vm0, %v3783_v11, %v3742_v33 }
 0x903   : > { %v3843_v22 = vrot.slane %v8445_v54, 4  ;;  %v3867_v39 = vrot.slane %v8448_v55, 4  ;;  %v3774_v56 = vperm.slane %v3768_v5, %v6777_v15  ;;  %v3791_v38 = vrot.slane %v8454_v12, 4 }
 0x904   : > { %v3782_v25 = vsel %vm761_vm0, %v8393_v13, %v3781_v2  ;;  %v3750_v28 = vperm.slane %v3744_v46, %v6777_v15  ;;  %v3797_v1 = vrot.slane %v8043_v9, 4  ;;  %v3802_v21 = vperm.slane %v3796_v24, %v6745_v8 }
 0x905   : > { %5220 = vrot.lane.b32.xlu1 %v3678_v44, %s10134_s1  ;;  %v3819_v44 = vrot.slane %v8149_v0, 4  ;;  %v8480_v34 = vperm.slane %v3834_v48, %v6745_v8  ;;  %v3821_v13 = vrot.slane %v8046_v14, 4  ;;  %v3787_v9 = vrot.slane %v3774_v56, 4 }
 0x906   : > { %v3798_v33 = vsel %vm761_vm0, %v7966_v35, %v3797_v1  ;;  %v3789_v3 = vrot.slane %v3750_v28, 4  ;;  %v3921_v63 = vrot.slane %v7930_v57, 4  ;;  %v3845_v11 = vrot.slane %v3802_v21, 4 }
 0x907   : > { %5216 = vrot.lane.b32.xlu0 %v3676_v7, %s10135_s2  ;;  %5212 = vrot.lane.b32.xlu2 %v3674_v32, %s10136_s3  ;;  %v3745_v7 = vrot.slane %v3694_v19, 4  ;;  %v8450_v32 = vpop.permute.xlu1 %3303  ;;  %v3820_v17 = vsel %vm761_vm0, %v3819_v44, %v8046_v14  ;;  %v3844_v19 = vsel %vm761_vm0, %v3843_v22, %v3802_v21  ;;  %v3879_v41 = vrot.slane %v8480_v34, 4  ;;  %v10146_v21 = vld [vmem:[#allocation77_spill] sm:$0xff] }
 0x908   : > { %v3826_v58 = vperm.slane %v3820_v17, %v6745_v8  ;;  %v3806_v35 = vperm.slane %v3798_v33, %v6745_v8  ;;  %v3790_v62 = vsel %vm761_vm0, %v3774_v56, %v3789_v3  ;;  %v3850_v27 = vperm.slane %v3844_v19, %v6777_v15 }
 0x909   : > { %v3746_v61 = vsel %vm761_vm0, %v3706_v20, %v3745_v7  ;;  %v8484_v20 = vpop.permute.xlu2 %3309  ;;  %v3788_v44 = vsel %vm761_vm0, %v3787_v9, %v3750_v28  ;;  %v3919_v7 = vrot.slane %v8008_v26, 4  ;;  %v3931_v16 = vrot.slane %v8146_v10, 4 }
 0x90a   : > { %v3868_v49 = vsel %vm761_vm0, %v3867_v39, %v3826_v58  ;;  %v3869_v5 = vrot.slane %v3826_v58, 4  ;;  %v5051_v24 = vrot.slane %v8177_v37, 4  ;;  %v3893_v46 = vrot.slane %v3850_v27, 4 }
 0x90b   : > { %v3874_v50 = vperm.slane %v3868_v49, %v6777_v15  ;;  %v3857_v48 = vrot.slane %v3806_v35, 4  ;;  %v3920_v1 = vsel %vm761_vm0, %v3919_v7, %v7930_v57  ;;  %v3932_v58 = vsel %vm761_vm0, %v3931_v16, %v10146_v21 }
 0x90c   : > { %v3870_v28 = vsel %vm761_vm0, %v8448_v55, %v3869_v5  ;;  %v5052_v9 = vsel %vm761_vm0, %v5051_v24, %v8159_v30 }
 0x90d   : > { %5232 = vrot.lane.b32.xlu1 %v3780_v51, %s10137_s4  ;;  %v3809_v51 = vrot.slane %v7933_v47, 4  ;;  %v3822_v47 = vsel %vm761_vm0, %v8149_v0, %v3821_v13  ;;  %v3891_v17 = vrot.slane %v3874_v50, 4 }
 0x90e   : > { %v3830_v0 = vperm.slane %v3822_v47, %v6745_v8 }
 0x90f   : > { %5228 = vrot.lane.b32.xlu0 %v3682_v18, %s10138_s5  ;;  %5224 = vrot.lane.b32.xlu2 %v3680_v6, %s10139_s6  ;;  %v3754_v18 = vperm.slane %v3746_v61, %v6777_v15  ;;  %v8489_v36 = vpop.permute.xlu1 %3315  ;;  %v3810_v6 = vsel %vm761_vm0, %v8011_v43, %v3809_v51  ;;  %v3907_v43 = vrot.slane %v7975_v52, 4  ;;  %v3943_v51 = vrot.slane %v8420_v42, 4 }
 0x910   : > { %v3818_v45 = vperm.slane %v3810_v6, %v6745_v8  ;;  %v3892_v55 = vsel %vm761_vm0, %v3891_v17, %v3850_v27  ;;  %v10151_v27 = vld [vmem:[#allocation76_spill] sm:$0xff] }
 0x911   : > { %v3792_v14 = vsel %vm761_vm0, %v3791_v38, %v3754_v18  ;;  %v8515_v2 = vpop.permute.xlu2 %3321  ;;  %v3908_v61 = vsel %vm761_vm0, %v3907_v43, %v7897_v40  ;;  %v3846_v38 = vsel %vm761_vm0, %v8445_v54, %v3845_v11  ;;  %v3793_v13 = vrot.slane %v3754_v18, 4 }
 0x912   : > { %v3855_v22 = vrot.slane %v3818_v45, 4  ;;  %v3858_v33 = vsel %vm761_vm0, %v3818_v45, %v3857_v48  ;;  %v3854_v49 = vperm.slane %v3846_v38, %v6777_v15  ;;  %v3878_v18 = vperm.slane %v3870_v28, %v6777_v15 }
 0x913   : > { %v3794_v57 = vsel %vm761_vm0, %v8454_v12, %v3793_v13  ;;  %v8549_v6 = vperm.slane %v3908_v61, %v6745_v8  ;;  %v5058_v12 = vperm.slane %v5052_v9, %v6745_v8  ;;  %v3866_v45 = vperm.slane %v3858_v33, %v6777_v15 }
 0x914   : > { %v3856_v19 = vsel %vm761_vm0, %v3855_v22, %v3806_v35  ;;  %v3897_v11 = vrot.slane %v3854_v49, 4  ;;  %v3895_v7 = vrot.slane %v3878_v18, 4  ;;  %v3443_v22 = vrot.slane %v8235_v31, 4 }
 0x915   : > { %5244 = vrot.lane.b32.xlu1 %v3786_v53, %s10140_s7  ;;  %v3880_v53 = vsel %vm761_vm0, %v3879_v41, %v3830_v0  ;;  %v10150_v41 = vld [vmem:[#allocation66_spill] sm:$0xff]  ;;  %v3862_v43 = vperm.slane %v3856_v19, %v6777_v15  ;;  %v5101_v17 = vrot.slane %v5058_v12, 4  ;;  %v4055_v19 = vrot.slane %v8442_v29, 4 }
 0x916   : > { %v8524_v56 = vperm.slane %v3880_v53, %v6777_v15  ;;  %v3944_v35 = vsel %vm761_vm0, %v3943_v51, %v10150_v41  ;;  %v3898_v61 = vsel %vm761_vm0, %v3878_v18, %v3897_v11  ;;  %v3444_v18 = vsel %vm761_vm0, %v3443_v22, %v8221_v23  ;;  %v10156_v11 = vld [vmem:[#allocation65_spill] sm:$0xff] }
 0x917   : > { %5240 = vrot.lane.b32.xlu0 %v3784_v60, %s10141_s18  ;;  %5236 = vrot.lane.b32.xlu2 %v3782_v25, %s10142_s11  ;;  %v5053_v60 = vrot.slane %v8159_v30, 4  ;;  %v3894_v25 = vsel %vm761_vm0, %v3874_v50, %v3893_v46  ;;  %v3922_v30 = vsel %vm761_vm0, %v8008_v26, %v3921_v63  ;;  %v5065_v50 = vrot.slane %v10151_v27, 4 }
 0x918   : > { %v3899_v47 = vrot.slane %v8524_v56, 4  ;;  %v3950_v16 = vperm.slane %v3944_v35, %v6745_v8  ;;  %v8588_v51 = vperm.slane %v3922_v30, %v6745_v8  ;;  %v3905_v30 = vrot.slane %v3866_v45, 4 }
 0x919   : > { %v5054_v54 = vsel %vm761_vm0, %v8177_v37, %v5053_v60  ;;  %v3938_v37 = vperm.slane %v3932_v58, %v6745_v8  ;;  %v8564_v26 = vpop.permute.xlu2 %3339  ;;  %v3896_v58 = vsel %vm761_vm0, %v3895_v7, %v3854_v49  ;;  %v3933_v35 = vrot.slane %v10146_v21, 4 }
 0x91a   : > { %v5062_v3 = vperm.slane %v5054_v54, %v6745_v8  ;;  %v3900_v24 = vsel %vm761_vm0, %v3899_v47, %v3862_v43  ;;  %v3979_v33 = vrot.slane %v3950_v16, 4  ;;  %v3909_v47 = vrot.slane %v7897_v40, 4 }
 0x91b   : > { %v8520_v39 = vpop.permute.xlu1 %3333  ;;  %v3981_v46 = vrot.slane %v3938_v37, 4  ;;  %v3967_v21 = vrot.slane %v8588_v51, 4  ;;  %v4056_v7 = vsel %vm761_vm0, %v4055_v19, %v10156_v11 }
 0x91c   : > { %v5113_v48 = vrot.slane %v5062_v3, 4  ;;  %v3980_v23 = vsel %vm761_vm0, %v3979_v33, %v3938_v37  ;;  %v3910_v40 = vsel %vm761_vm0, %v7975_v52, %v3909_v47 }
 0x91d   : > { %5256 = vrot.lane.b32.xlu1 %v3792_v14, %s10143_s10  ;;  %v3881_v14 = vrot.slane %v3830_v0, 4  ;;  %v3945_v0 = vrot.slane %v10150_v41, 4 }
 0x91f   : > { %5252 = vrot.lane.b32.xlu0 %v3790_v62, %s10144_s15  ;;  %5248 = vrot.lane.b32.xlu2 %v3788_v44, %s10145_s20  ;;  %v8561_v62 = vperm.slane %v3920_v1, %v6745_v8  ;;  %v3882_v44 = vsel %vm761_vm0, %v8480_v34, %v3881_v14  ;;  %v3946_v31 = vsel %vm761_vm0, %v8420_v42, %v3945_v0  ;;  %v3957_v0 = vrot.slane %v8549_v6, 4 }
 0x920   : > { %v3954_v14 = vperm.slane %v3946_v31, %v6745_v8 }
 0x921   : > { %v3955_v13 = vrot.slane %v8561_v62, 4 }
 0x925   : > { %5268 = vrot.lane.b32.xlu1 %v3894_v25, %s10147_s30  ;;  %v3890_v25 = vperm.slane %v3882_v44, %v6777_v15  ;;  %v3901_v44 = vrot.slane %v3862_v43, 4  ;;  %v3958_v43 = vsel %vm761_vm0, %v8561_v62, %v3957_v0  ;;  %v10160_v62 = vld [vmem:[#allocation72_spill] sm:$0xff] }
 0x927   : > { %5264 = vrot.lane.b32.xlu0 %v3892_v55, %s10148_s12  ;;  %5260 = vrot.lane.b32.xlu2 %v3794_v57, %s10149_s9  ;;  %v3982_v55 = vsel %vm761_vm0, %v3950_v16, %v3981_v46  ;;  %v3903_v42 = vrot.slane %v3890_v25, 4  ;;  %v3991_v16 = vrot.slane %v3954_v14, 4  ;;  %v3902_v52 = vsel %vm761_vm0, %v8524_v56, %v3901_v44  ;;  %v8641_v46 = vpop.permute.xlu0 %3297 }
 0x928   : > { %v8645_v56 = vperm.slane %v4056_v7, %v6745_v8 }
 0x929   : > { %v3904_v37 = vsel %vm761_vm0, %v3903_v42, %v3866_v45  ;;  %v3918_v45 = vperm.slane %v3910_v40, %v6745_v8  ;;  %v10165_v42 = vld [vmem:[#allocation26_spill] sm:$0xff] }
 0x92b   : > { %v3346_v63 = vpop.permute.xlu1 %3345 }
 0x92c   : > { %v5063_v53 = vrot.slane %v3346_v63, 4  ;;  %v5066_v5 = vsel %vm761_vm0, %v3346_v63, %v5065_v50  ;;  %v8615_v50 = vperm.slane %v3982_v55, %v6777_v15  ;;  %v3934_v63 = vsel %vm761_vm0, %v8146_v10, %v3933_v35  ;;  %v10164_v55 = vld [vmem:[#allocation39_spill] sm:$0xff] }
 0x92d   : > { %v5074_v60 = vperm.slane %v5066_v5, %v6745_v8  ;;  %5280 = vrot.lane.b32.xlu1 %v3900_v24, %s10152_s19 }
 0x92e   : > { %v5064_v34 = vsel %vm761_vm0, %v5063_v53, %v10151_v27  ;;  %v3906_v27 = vsel %vm761_vm0, %v3890_v25, %v3905_v30  ;;  %v10158_v53 = vld [vmem:[#allocation80_spill] sm:$0xff]  ;;  %v4007_v10 = vrot.slane %v8615_v50, 4 }
 0x92f   : > { %v5070_v38 = vperm.slane %v5064_v34, %v6745_v8  ;;  %v5111_v28 = vrot.slane %v5074_v60, 4  ;;  %v8583_v1 = vsel %vm761_vm0, %v5074_v60, %v5113_v48  ;;  %5276 = vrot.lane.b32.xlu0 %v3898_v61, %s10153_s8  ;;  %5272 = vrot.lane.b32.xlu2 %v3896_v58, %s10154_s29  ;;  %v4043_v5 = vrot.slane %v10158_v53, 4  ;;  %v10161_v61 = vld [vmem:[#allocation19_spill] sm:$0xff]  ;;  %v10162_v58 = vld [vmem:[#allocation54_spill] sm:$0xff]  ;;  %s10167_s29 = smov 80   ;;  %v8671_v40 = vpop.permute.xlu0 %3327 }
 0x930   : > { %v4031_v48 = vrot.slane %v10160_v62, 4  ;;  %v3966_v34 = vperm.slane %v3958_v43, %v6777_v15  ;;  %v4019_v22 = vrot.slane %v10161_v61, 4 }
 0x931   : > { %v5099_v9 = vrot.slane %v5070_v38, 4  ;;  %v8595_v54 = vsel %vm761_vm0, %v5111_v28, %v5062_v3  ;;  %v8599_v57 = vsel %vm761_vm0, %v5070_v38, %v5101_v17  ;;  %v5141_v49 = vpop.permute.xlu2 %5140  ;;  %v3942_v17 = vperm.slane %v3934_v63, %v6745_v8 }
 0x932   : > { %v8607_v3 = vsel %vm1909_vm3, %v3444_v18, %v5141_v49  ;;  %v3968_v38 = vsel %vm761_vm0, %v3967_v21, %v3918_v45  ;;  %v4008_v31 = vsel %vm761_vm0, %v4007_v10, %v3966_v34  ;;  %v4032_v19 = vsel %vm761_vm0, %v4031_v48, %v10164_v55 }
 0x933   : > { %v8610_v41 = vsel %vm761_vm0, %v5099_v9, %v5058_v12  ;;  %v3956_v12 = vsel %vm761_vm0, %v3955_v13, %v8549_v6  ;;  %v3986_v6 = vperm.slane %v3980_v23, %v6777_v15  ;;  %v3992_v28 = vsel %vm761_vm0, %v3991_v16, %v3942_v17 }
 0x934   : > { %v3962_v24 = vperm.slane %v3956_v12, %v6777_v15  ;;  %v4044_v13 = vsel %vm761_vm0, %v4043_v5, %v10162_v58  ;;  %v4091_v9 = vrot.slane %v8645_v56, 4  ;;  %v3974_v18 = vperm.slane %v3968_v38, %v6777_v15 }
 0x935   : > { %5292 = vrot.lane.b32.xlu1 %v3906_v27, %s10155_s13  ;;  %s10159_s13 = smov 74   ;;  %v4003_v25 = vrot.slane %v3986_v6, 4  ;;  %v3998_v30 = vperm.slane %v3992_v28, %v6777_v15  ;;  %v4020_v47 = vsel %vm761_vm0, %v4019_v22, %v10165_v42  ;;  %v4050_v35 = vperm.slane %v4044_v13, %v6745_v8 }
 0x936   : > { %v4005_v33 = vrot.slane %v3962_v24, 4  ;;  %v4038_v23 = vperm.slane %v4032_v19, %v6745_v8  ;;  %v4026_v44 = vperm.slane %v4020_v47, %v6745_v8  ;;  %v3993_v12 = vrot.slane %v3942_v17, 4 }
 0x937   : > { %5288 = vrot.lane.b32.xlu0 %v3904_v37, %s10157_s23  ;;  %5284 = vrot.lane.b32.xlu2 %v3902_v52, %s10159_s13  ;;  %s10163_s13 = smov 84   ;;  %s10166_s23 = smov 82   ;;  %v4004_v27 = vsel %vm761_vm0, %v4003_v25, %v3962_v24  ;;  %v4092_v0 = vsel %vm761_vm0, %v4091_v9, %v4050_v35  ;;  %v4013_v63 = vrot.slane %v3974_v18, 4  ;;  %v4011_v7 = vrot.slane %v3998_v30, 4 }
 0x938   : > { %v4006_v49 = vsel %vm761_vm0, %v3986_v6, %v4005_v33  ;;  %v3969_v37 = vrot.slane %v3918_v45, 4  ;;  %v3994_v16 = vsel %vm761_vm0, %v3954_v14, %v3993_v12  ;;  %v8680_v43 = vperm.slane %v4092_v0, %v6777_v15  ;;  %v10172_v0 = vld [vmem:[#allocation64_spill] sm:$0xff] }
 0x939   : > { %v8648_v60 = vpop.permute.xlu2 %5152  ;;  %v4014_v52 = vsel %vm761_vm0, %v3998_v30, %v4013_v63  ;;  %v4021_v6 = vrot.slane %v10165_v42, 4  ;;  %v4067_v5 = vrot.slane %v4038_v23, 4  ;;  %v4009_v24 = vrot.slane %v3966_v34, 4 }
 0x93a   : > { %v3970_v10 = vsel %vm761_vm0, %v8588_v51, %v3969_v37  ;;  %v4033_v17 = vrot.slane %v10164_v55, 4  ;;  %v4069_v48 = vrot.slane %v4026_v44, 4  ;;  %v4045_v45 = vrot.slane %v10162_v58, 4  ;;  %v10171_v55 = vld [vmem:[#allocation45_spill] sm:$0xff]  ;;  %v10174_v37 = vld [vmem:[#allocation38_spill] sm:$0xff] }
 0x93b   : > { %v4012_v14 = vsel %vm761_vm0, %v4011_v7, %v3974_v18  ;;  %v4057_v22 = vrot.slane %v10156_v11, 4  ;;  %v4010_v25 = vsel %vm761_vm0, %v8615_v50, %v4009_v24  ;;  %v4068_v51 = vsel %vm761_vm0, %v4067_v5, %v4026_v44 }
 0x93c   : > { %v4002_v28 = vperm.slane %v3994_v16, %v6777_v15  ;;  %v4046_v34 = vsel %vm761_vm0, %v10158_v53, %v4045_v45  ;;  %v4115_v58 = vrot.slane %v8680_v43, 4  ;;  %v3978_v13 = vperm.slane %v3970_v10, %v6777_v15 }
 0x93d   : > { %5304 = vrot.lane.b32.xlu1 %v4008_v31, %s10163_s13  ;;  %v4034_v11 = vsel %vm761_vm0, %v10160_v62, %v4033_v17  ;;  %v4022_v50 = vsel %vm761_vm0, %v10161_v61, %v4021_v6  ;;  %v4093_v31 = vrot.slane %v4050_v35, 4  ;;  %v4058_v33 = vsel %vm761_vm0, %v8442_v29, %v4057_v22 }
 0x93e   : > { %v4143_v19 = vrot.slane %v10171_v55, 4  ;;  %v4074_v18 = vperm.slane %v4068_v51, %v6777_v15  ;;  %v4070_v30 = vsel %vm761_vm0, %v4038_v23, %v4069_v48  ;;  %v4054_v62 = vperm.slane %v4046_v34, %v6745_v8  ;;  %v10178_v48 = vld [vmem:[#allocation40_spill] sm:$0xff] }
 0x93f   : > { %5300 = vrot.lane.b32.xlu0 %v4006_v49, %s10166_s23  ;;  %5296 = vrot.lane.b32.xlu2 %v4004_v27, %s10167_s29  ;;  %s10168_s29 = smov 90   ;;  %s10169_s23 = smov 88   ;;  %v4015_v42 = vrot.slane %v4002_v28, 4  ;;  %v4094_v29 = vsel %vm761_vm0, %v8645_v56, %v4093_v31  ;;  %v4066_v47 = vperm.slane %v4058_v33, %v6745_v8  ;;  %v4017_v27 = vrot.slane %v3978_v13, 4  ;;  %v10180_v33 = vld [vmem:[#allocation53_spill] sm:$0xff] }
 0x940   : > { %v4116_v35 = vsel %vm761_vm0, %v4115_v58, %v4074_v18  ;;  %v4131_v44 = vrot.slane %v10172_v0, 4  ;;  %v4030_v23 = vperm.slane %v4022_v50, %v6745_v8  ;;  %v4078_v12 = vperm.slane %v4070_v30, %v6777_v15 }
 0x941   : > { %v8675_v21 = vpop.permute.xlu2 %5164  ;;  %v4042_v63 = vperm.slane %v4034_v11, %v6745_v8  ;;  %v4018_v56 = vsel %vm761_vm0, %v4002_v28, %v4017_v27  ;;  %v4102_v7 = vperm.slane %v4094_v29, %v6777_v15  ;;  %v4144_v16 = vsel %vm761_vm0, %v4143_v19, %v10174_v37  ;;  %v10179_v28 = vld [vmem:[#allocation69_spill] sm:$0xff] }
 0x942   : > { %v4016_v5 = vsel %vm761_vm0, %v4015_v42, %v3978_v13  ;;  %v4167_v24 = vrot.slane %v8641_v46, 4  ;;  %v4103_v17 = vrot.slane %v4066_v47, 4  ;;  %v4132_v45 = vsel %vm761_vm0, %v4131_v44, %v10178_v48 }
 0x943   : > { %v8739_v51 = vperm.slane %v4144_v16, %v6745_v8  ;;  %v4119_v11 = vrot.slane %v4102_v7, 4  ;;  %v4079_v50 = vrot.slane %v4042_v63, 4  ;;  %v4169_v31 = vrot.slane %v10179_v28, 4 }
 0x944   : > { %v4168_v34 = vsel %vm761_vm0, %v4167_v24, %v10179_v28  ;;  %v4104_v42 = vsel %vm761_vm0, %v4103_v17, %v4054_v62  ;;  %v4138_v27 = vperm.slane %v4132_v45, %v6745_v8  ;;  %v4157_v16 = vrot.slane %v10180_v33, 4 }
 0x945   : > { %5316 = vrot.lane.b32.xlu1 %v4014_v52, %s10168_s29  ;;  %s10170_s29 = smov 86   ;;  %v10175_v52 = vld [vmem:[#allocation79_spill] sm:$0xff]  ;;  %v4080_v29 = vsel %vm761_vm0, %v4079_v50, %v4030_v23  ;;  %v4120_v44 = vsel %vm761_vm0, %v4119_v11, %v4078_v12  ;;  %v4133_v28 = vrot.slane %v10178_v48, 4 }
 0x946   : > { %v4155_v6 = vrot.slane %v10175_v52, 4 }
 0x947   : > { %5312 = vrot.lane.b32.xlu0 %v4012_v14, %s10169_s23  ;;  %v5149_v38 = vpop.permute.xlu1 %5148  ;;  %5308 = vrot.lane.b32.xlu2 %v4010_v25, %s10170_s29  ;;  %s10173_s29 = smov 96   ;;  %s10176_s23 = smov 94   ;;  %v4081_v14 = vrot.slane %v4030_v23, 4  ;;  %v4134_v48 = vsel %vm761_vm0, %v10172_v0, %v4133_v28  ;;  %v10199_v28 = vld [vmem:[#allocation60_spill] sm:$0xff] }
 0x949   : > { %v5145_v9 = vpop.permute.xlu0 %5144  ;;  %v8709_v49 = vpop.permute.xlu2 %5176 }
 0x94a   : > { %v5644_v53 = vsel %vm1911_vm4, %v8607_v3, %v5145_v9  ;;  %v4156_v9 = vsel %vm761_vm0, %v4155_v6, %v10180_v33  ;;  %v4170_v6 = vsel %vm761_vm0, %v8641_v46, %v4169_v31 }
 0x94b   : > { %v5645_v61 = vsel %vm1913_vm1, %v5644_v53, %v5149_v38  ;;  %v4121_v38 = vrot.slane %v4078_v12, 4  ;;  %v8789_v45 = vperm.slane %v4170_v6, %v6745_v8 }
 0x94c   : > { %v5646_v3 = vsel %vm1915_vm5, %v5645_v61, %v8648_v60  ;;  %v4105_v60 = vrot.slane %v4054_v62, 4  ;;  %v4162_v62 = vperm.slane %v4156_v9, %v6745_v8 }
 0x94d   : > { %5328 = vrot.lane.b32.xlu1 %v4116_v35, %s10173_s29  ;;  %s10177_s29 = smov 92   ;;  %v4122_v30 = vsel %vm761_vm0, %v4102_v7, %v4121_v38  ;;  %v4117_v35 = vrot.slane %v4074_v18, 4  ;;  %v4110_v18 = vperm.slane %v4104_v42, %v6777_v15  ;;  %v4215_v33 = vrot.slane %v8789_v45, 4 }
 0x94e   : > { %v4106_v22 = vsel %vm761_vm0, %v4066_v47, %v4105_v60  ;;  %v8759_v47 = vperm.slane %v4168_v34, %v6745_v8 }
 0x94f   : > { %5324 = vrot.lane.b32.xlu0 %v4018_v56, %s10176_s23  ;;  %v5161_v10 = vpop.permute.xlu1 %5160  ;;  %5320 = vrot.lane.b32.xlu2 %v4016_v5, %s10177_s29  ;;  %v8751_v53 = vperm.slane %v4106_v22, %v6777_v15  ;;  %s10182_s29 = smov 102   ;;  %v4082_v56 = vsel %vm761_vm0, %v4042_v63, %v4081_v14  ;;  %s10183_s23 = smov 100   ;;  %v4118_v23 = vsel %vm761_vm0, %v8680_v43, %v4117_v35  ;;  %v4123_v22 = vrot.slane %v4110_v18, 4 }
 0x950   : > { %v4086_v63 = vperm.slane %v4080_v29, %v6777_v15  ;;  %v4090_v5 = vperm.slane %v4082_v56, %v6777_v15 }
 0x951   : > { %v5157_v25 = vpop.permute.xlu0 %5156  ;;  %v8744_v13 = vpop.permute.xlu2 %5188  ;;  %v4127_v12 = vrot.slane %v8751_v53, 4 }
 0x952   : > { %v5647_v58 = vsel %vm1917_vm6, %v5646_v3, %v5157_v25  ;;  %v4179_v3 = vrot.slane %v8739_v51, 4 }
 0x953   : > { %v5648_v19 = vsel %vm9977_vm7, %v5647_v58, %v5161_v10  ;;  %v4158_v10 = vsel %vm761_vm0, %v10175_v52, %v4157_v16  ;;  %v4128_v38 = vsel %vm761_vm0, %v4127_v12, %v4090_v5  ;;  %vm10187_vm7 = vcmask 162816   ;;  %v10194_v12 = vld [vmem:[#allocation44_spill] sm:$0xff] }
 0x954   : > { %v5649_v61 = vsel %vm10181_vm2, %v5648_v19, %v8675_v21  ;;  %v4145_v21 = vrot.slane %v10174_v37, 4  ;;  %v4203_v37 = vrot.slane %v8759_v47, 4  ;;  %v4180_v17 = vsel %vm761_vm0, %v4179_v3, %v4138_v27 }
 0x955   : > { %5340 = vrot.lane.b32.xlu1 %v4122_v30, %s10182_s29  ;;  %s10184_s29 = smov 98   ;;  %vm10186_vm2 = vcmask 146432   ;;  %v4166_v34 = vperm.slane %v4158_v10, %v6745_v8  ;;  %v4186_v50 = vperm.slane %v4180_v17, %v6777_v15  ;;  %v4205_v19 = vrot.slane %v4162_v62, 4 }
 0x956   : > { %v4146_v43 = vsel %vm761_vm0, %v10171_v55, %v4145_v21  ;;  %v4204_v25 = vsel %vm761_vm0, %v4203_v37, %v4162_v62  ;;  %v4125_v55 = vrot.slane %v4086_v63, 4  ;;  %v4181_v30 = vrot.slane %v4138_v27, 4 }
 0x957   : > { %5336 = vrot.lane.b32.xlu0 %v4120_v44, %s10183_s23  ;;  %v5173_v7 = vpop.permute.xlu1 %5172  ;;  %5332 = vrot.lane.b32.xlu2 %v4118_v23, %s10184_s29  ;;  %s10188_s29 = smov 108   ;;  %v4154_v58 = vperm.slane %v4146_v43, %v6745_v8  ;;  %v4210_v31 = vperm.slane %v4204_v25, %v6777_v15  ;;  %s10189_s23 = smov 106   ;;  %v4216_v29 = vsel %vm761_vm0, %v4215_v33, %v4166_v34  ;;  %v4229_v21 = vrot.slane %v4186_v50, 4 }
 0x958   : > { %v4126_v11 = vsel %vm761_vm0, %v4110_v18, %v4125_v55  ;;  %v4182_v62 = vsel %vm761_vm0, %v8739_v51, %v4181_v30  ;;  %v8822_v16 = vperm.slane %v4216_v29, %v6777_v15  ;;  %v4206_v6 = vsel %vm761_vm0, %v8759_v47, %v4205_v19 }
 0x959   : > { %v5169_v60 = vpop.permute.xlu0 %5168  ;;  %v8785_v46 = vpop.permute.xlu2 %5200  ;;  %v4191_v3 = vrot.slane %v4154_v58, 4  ;;  %v4227_v23 = vrot.slane %v4210_v31, 4  ;;  %v4230_v27 = vsel %vm761_vm0, %v4210_v31, %v4229_v21  ;;  %v4129_v37 = vrot.slane %v4090_v5, 4 }
 0x95a   : > { %v5650_v24 = vsel %vm10185_vm10, %v5649_v61, %v5169_v60  ;;  %v10191_v61 = vld [vmem:[#allocation23_spill] sm:$0xff]  ;;  %vm10193_vm10 = vcmask 211968   ;;  %v10196_v60 = vld [vmem:[#allocation33_spill] sm:$0xff]  ;;  %v4190_v47 = vperm.slane %v4182_v62, %v6777_v15  ;;  %v4267_v5 = vrot.slane %v8243_v59, 4 }
 0x95b   : > { %v5651_v14 = vsel %vm10186_vm2, %v5650_v24, %v5173_v7  ;;  %v4243_v42 = vrot.slane %v10191_v61, 4  ;;  %v4142_v7 = vperm.slane %v4134_v48, %v6745_v8  ;;  %v4228_v51 = vsel %vm761_vm0, %v4227_v23, %v4186_v50  ;;  %v10200_v50 = vld [vmem:[#allocation57_spill] sm:$0xff] }
 0x95c   : > { %v5652_v52 = vsel %vm10187_vm7, %v5651_v14, %v8709_v49  ;;  %v4124_v49 = vsel %vm761_vm0, %v4123_v22, %v4086_v63  ;;  %vm10192_vm7 = vcmask 179200   ;;  %v4255_v63 = vrot.slane %v10194_v12, 4 }
 0x95d   : > { %5352 = vrot.lane.b32.xlu1 %v4128_v38, %s10188_s29  ;;  %s10190_s29 = smov 104   ;;  %v4244_v43 = vsel %vm761_vm0, %v4243_v42, %v10196_v60  ;;  %v4192_v10 = vsel %vm761_vm0, %v4191_v3, %v4142_v7  ;;  %v4217_v24 = vrot.slane %v4166_v34, 4  ;;  %v4214_v14 = vperm.slane %v4206_v6, %v6777_v15 }
 0x95e   : > { %v4193_v22 = vrot.slane %v4142_v7, 4  ;;  %v4279_v25 = vrot.slane %v8450_v32, 4  ;;  %v4235_v38 = vrot.slane %v8822_v16, 4  ;;  %v4245_v55 = vrot.slane %v10196_v60, 4 }
 0x95f   : > { %5348 = vrot.lane.b32.xlu0 %v4126_v11, %s10189_s23  ;;  %v5185_v9 = vpop.permute.xlu1 %5184  ;;  %5344 = vrot.lane.b32.xlu2 %v4124_v49, %s10190_s29  ;;  %s10195_s29 = smov 114   ;;  %s10197_s23 = smov 112   ;;  %v4268_v31 = vsel %vm761_vm0, %v4267_v5, %v10200_v50  ;;  %vm10201_vm2 = vcmask 228352   ;;  %v4233_v19 = vrot.slane %v4190_v47, 4  ;;  %v4231_v30 = vrot.slane %v4214_v14, 4 }
 0x960   : > { %v4194_v11 = vsel %vm761_vm0, %v4154_v58, %v4193_v22  ;;  %v4218_v42 = vsel %vm761_vm0, %v8789_v45, %v4217_v24  ;;  %v4269_v29 = vrot.slane %v10200_v50, 4  ;;  %v4246_v21 = vsel %vm761_vm0, %v10191_v61, %v4245_v55 }
 0x961   : > { %v5181_v35 = vpop.permute.xlu0 %5180  ;;  %v8812_v56 = vpop.permute.xlu2 %5212  ;;  %v4274_v7 = vperm.slane %v4268_v31, %v6745_v8  ;;  %v4202_v45 = vperm.slane %v4194_v11, %v6777_v15  ;;  %v4234_v62 = vsel %vm761_vm0, %v4214_v14, %v4233_v19  ;;  %v4232_v61 = vsel %vm761_vm0, %v4231_v30, %v4190_v47  ;;  %v10208_v47 = vld [vmem:[#allocation47_spill] sm:$0xff] }
 0x962   : > { %v5653_v44 = vsel %vm10192_vm7, %v5652_v52, %v5181_v35  ;;  %v4250_v52 = vperm.slane %v4244_v43, %v6745_v8  ;;  %vm10202_vm7 = vcmask 244736   ;;  %v10203_v35 = vld [vmem:[#allocation68_spill] sm:$0xff]  ;;  %v4270_v43 = vsel %vm761_vm0, %v8243_v59, %v4269_v29 }
 0x963   : > { %v5654_v0 = vsel %vm1931_vm13, %v5653_v44, %v5185_v9  ;;  %v4198_v9 = vperm.slane %v4192_v10, %v6777_v15  ;;  %v4280_v58 = vsel %vm761_vm0, %v4279_v25, %v10203_v35  ;;  %v4317_v10 = vrot.slane %v4274_v7, 4 }
 0x964   : > { %v5655_v18 = vsel %vm10193_vm10, %v5654_v0, %v8744_v13  ;;  %v4130_v13 = vsel %vm761_vm0, %v8751_v53, %v4129_v37  ;;  %v4256_v53 = vsel %vm761_vm0, %v4255_v63, %v10199_v28  ;;  %vm10204_vm10 = vcmask 261120  }
 0x965   : > { %5364 = vrot.lane.b32.xlu1 %v4230_v27, %s10195_s29  ;;  %s10198_s29 = smov 110   ;;  %v4236_v3 = vsel %vm761_vm0, %v4235_v38, %v4198_v9  ;;  %v4262_v23 = vperm.slane %v4256_v53, %v6745_v8  ;;  %v4257_v0 = vrot.slane %v10199_v28, 4  ;;  %v4226_v27 = vperm.slane %v4218_v42, %v6777_v15  ;;  %v10213_v42 = vld [vmem:[#allocation18_spill] sm:$0xff] }
 0x966   : > { %v8875_v63 = vperm.slane %v4246_v21, %v6745_v8  ;;  %v4293_v37 = vrot.slane %v4250_v52, 4  ;;  %v4367_v14 = vrot.slane %v10208_v47, 4  ;;  %v4278_v59 = vperm.slane %v4270_v43, %v6745_v8  ;;  %v10216_v21 = vld [vmem:[#allocation85_spill] sm:$0xff] }
 0x967   : > { %5360 = vrot.lane.b32.xlu0 %v4228_v51, %s10197_s23  ;;  %v5197_v17 = vpop.permute.xlu1 %5196  ;;  %5356 = vrot.lane.b32.xlu2 %v4130_v13, %s10198_s29  ;;  %s10205_s29 = smov 120   ;;  %s10206_s23 = smov 118   ;;  %v4258_v60 = vsel %vm761_vm0, %v10194_v12, %v4257_v0  ;;  %v4291_v51 = vrot.slane %v4262_v23, 4  ;;  %v4239_v25 = vrot.slane %v4226_v27, 4  ;;  %v4237_v31 = vrot.slane %v4198_v9, 4  ;;  %v10215_v9 = vld [vmem:[#allocation37_spill] sm:$0xff] }
 0x968   : > { %v4294_v12 = vsel %vm761_vm0, %v4262_v23, %v4293_v37  ;;  %v4266_v50 = vperm.slane %v4258_v60, %v6745_v8  ;;  %v4355_v29 = vrot.slane %v10213_v42, 4  ;;  %v4393_v0 = vrot.slane %v10216_v21, 4 }
 0x969   : > { %v5193_v34 = vpop.permute.xlu0 %5192  ;;  %v8849_v49 = vpop.permute.xlu2 %5224  ;;  %v4292_v30 = vsel %vm761_vm0, %v4291_v51, %v4250_v52 }
 0x96a   : > { %v5656_v33 = vsel %vm10201_vm2, %v5655_v18, %v5193_v34  ;;  %v4281_v18 = vrot.slane %v10203_v35, 4  ;;  %vm10209_vm2 = vcmask 277504   ;;  %v4305_v35 = vrot.slane %v8875_v63, 4 }
 0x96b   : > { %v5657_v48 = vsel %vm10202_vm7, %v5656_v33, %v5197_v17  ;;  %v4241_v17 = vrot.slane %v4202_v45, 4  ;;  %vm10210_vm7 = vcmask 293888   ;;  %v4240_v33 = vsel %vm761_vm0, %v4239_v25, %v4202_v45  ;;  %v10222_v25 = vld [vmem:[#allocation52_spill] sm:$0xff] }
 0x96c   : > { %v5658_v44 = vsel %vm10204_vm10, %v5657_v48, %v8785_v46  ;;  %v4286_v46 = vperm.slane %v4280_v58, %v6745_v8  ;;  %v4282_v24 = vsel %vm761_vm0, %v8450_v32, %v4281_v18  ;;  %v4391_v32 = vrot.slane %v8484_v20, 4 }
 0x96d   : > { %5376 = vrot.lane.b32.xlu1 %v4236_v3, %s10205_s29  ;;  %s10207_s29 = smov 116   ;;  %v4242_v55 = vsel %vm761_vm0, %v4226_v27, %v4241_v17  ;;  %v4290_v53 = vperm.slane %v4282_v24, %v6745_v8  ;;  %vm10211_vm10 = vcmask 310272   ;;  %v4302_v48 = vperm.slane %v4294_v12, %v6777_v15 }
 0x96e   : > { %v4318_v28 = vsel %vm761_vm0, %v4286_v46, %v4317_v10  ;;  %v4315_v34 = vrot.slane %v4286_v46, 4  ;;  %v4329_v58 = vrot.slane %v4278_v59, 4  ;;  %v4392_v23 = vsel %vm761_vm0, %v4391_v32, %v10216_v21  ;;  %v10218_v46 = vld [vmem:[#allocation82_spill] sm:$0xff] }
 0x96f   : > { %5372 = vrot.lane.b32.xlu0 %v4234_v62, %s10206_s23  ;;  %v5209_v6 = vpop.permute.xlu1 %5208  ;;  %5368 = vrot.lane.b32.xlu2 %v4232_v61, %s10207_s29  ;;  %s10212_s29 = smov 126   ;;  %v4326_v19 = vperm.slane %v4318_v28, %v6777_v15  ;;  %s10214_s23 = smov 124   ;;  %v4327_v45 = vrot.slane %v4290_v53, 4  ;;  %v4303_v62 = vrot.slane %v4266_v50, 4  ;;  %v4379_v61 = vrot.slane %v10218_v46, 4  ;;  %v10224_v28 = vld [vmem:[#allocation56_spill] sm:$0xff] }
 0x970   : > { %v4316_v52 = vsel %vm761_vm0, %v4315_v34, %v4274_v7  ;;  %v4330_v27 = vsel %vm761_vm0, %v4290_v53, %v4329_v58  ;;  %v4345_v60 = vrot.slane %v4302_v48, 4  ;;  %v8927_v7 = vperm.slane %v4392_v23, %v6745_v8 }
 0x971   : > { %v5205_v13 = vpop.permute.xlu0 %5204  ;;  %v8886_v5 = vpop.permute.xlu2 %5236  ;;  %v4343_v43 = vrot.slane %v4326_v19, 4  ;;  %v8931_v24 = vperm.slane %v4316_v52, %v6777_v15  ;;  %v4356_v12 = vsel %vm761_vm0, %v4355_v29, %v10222_v25  ;;  %v4380_v32 = vsel %vm761_vm0, %v4379_v61, %v10224_v28 }
 0x972   : > { %v5659_v22 = vsel %vm10209_vm2, %v5658_v44, %v5205_v13  ;;  %v4368_v44 = vsel %vm761_vm0, %v4367_v14, %v10215_v9  ;;  %vm10219_vm2 = vcmask 326656   ;;  %v8934_v13 = vperm.slane %v4330_v27, %v6777_v15 }
 0x973   : > { %v5660_v38 = vsel %vm10210_vm7, %v5659_v22, %v5209_v6  ;;  %v8924_v51 = vperm.slane %v4368_v44, %v6745_v8  ;;  %vm10220_vm7 = vcmask 343040   ;;  %v4346_v17 = vsel %vm761_vm0, %v4326_v19, %v4345_v60 }
 0x974   : > { %v5661_v11 = vsel %vm10211_vm10, %v5660_v38, %v8812_v56  ;;  %v4238_v56 = vsel %vm761_vm0, %v8822_v16, %v4237_v31  ;;  %v8917_v16 = vperm.slane %v4292_v30, %v6777_v15  ;;  %vm10221_vm10 = vcmask 359424  }
 0x975   : > { %5388 = vrot.lane.b32.xlu1 %v4242_v55, %s10212_s29  ;;  %s10217_s29 = smov 122   ;;  %v4328_v22 = vsel %vm761_vm0, %v4327_v45, %v4278_v59  ;;  %v4304_v55 = vsel %vm761_vm0, %v4303_v62, %v8875_v63  ;;  %v4394_v53 = vsel %vm761_vm0, %v8484_v20, %v4393_v0  ;;  %v4306_v59 = vsel %vm761_vm0, %v4266_v50, %v4305_v35 }
 0x976   : > { %v4341_v38 = vrot.slane %v8917_v16, 4  ;;  %v4403_v34 = vrot.slane %v8924_v51, 4  ;;  %v4351_v20 = vrot.slane %v8934_v13, 4  ;;  %v4362_v50 = vperm.slane %v4356_v12, %v6745_v8 }
 0x977   : > { %5384 = vrot.lane.b32.xlu0 %v4240_v33, %s10214_s23  ;;  %v5221_v3 = vpop.permute.xlu1 %5220  ;;  %5380 = vrot.lane.b32.xlu2 %v4238_v56, %s10217_s29  ;;  %s10223_s29 = smov 6   ;;  %v4334_v33 = vperm.slane %v4328_v22, %v6777_v15  ;;  %s10226_s23 = smov 2   ;;  %v4386_v19 = vperm.slane %v4380_v32, %v6745_v8  ;;  %v8964_v30 = vperm.slane %v4394_v53, %v6745_v8  ;;  %v4369_v35 = vrot.slane %v10215_v9, 4 }
 0x978   : > { %v4342_v31 = vsel %vm761_vm0, %v8931_v24, %v4341_v38  ;;  %v4381_v58 = vrot.slane %v10224_v28, 4  ;;  %v4314_v44 = vperm.slane %v4306_v59, %v6777_v15  ;;  %v4404_v45 = vsel %vm761_vm0, %v4403_v34, %v4362_v50  ;;  %v10232_v59 = vld [vmem:[#allocation81_spill] sm:$0xff] }
 0x979   : > { %v5217_v18 = vpop.permute.xlu0 %5216  ;;  %v8921_v37 = vpop.permute.xlu2 %5248  ;;  %v4347_v23 = vrot.slane %v4334_v33, 4  ;;  %v4370_v0 = vsel %vm761_vm0, %v10208_v47, %v4369_v35  ;;  %v4357_v61 = vrot.slane %v10222_v25, 4  ;;  %v4410_v60 = vperm.slane %v4404_v45, %v6777_v15 }
 0x97a   : > { %v5662_v6 = vsel %vm10219_vm2, %v5661_v11, %v5217_v18  ;;  %v4427_v11 = vrot.slane %v8927_v7, 4  ;;  %vm10227_vm2 = vcmask 375808   ;;  %v4382_v9 = vsel %vm761_vm0, %v10218_v46, %v4381_v58 }
 0x97b   : > { %v5663_v10 = vsel %vm10220_vm7, %v5662_v6, %v5221_v3  ;;  %vm10228_vm7 = vcmask 392192   ;;  %v4352_v62 = vsel %vm761_vm0, %v4351_v20, %v4314_v44  ;;  %v4439_v18 = vrot.slane %v8964_v30, 4 }
 0x97c   : > { %v5664_v14 = vsel %vm10221_vm10, %v5663_v10, %v8849_v49  ;;  %v4344_v49 = vsel %vm761_vm0, %v4343_v43, %v4302_v48  ;;  %v4310_v48 = vperm.slane %v4304_v55, %v6777_v15  ;;  %v4428_v52 = vsel %vm761_vm0, %v4427_v11, %v4386_v19 }
 0x97d   : > { %5400 = vrot.lane.b32.xlu1 %v4346_v17, %s10223_s29  ;;  %s10225_s29 = smov 4   ;;  %v4434_v43 = vperm.slane %v4428_v52, %v6777_v15  ;;  %v4378_v47 = vperm.slane %v4370_v0, %v6745_v8  ;;  %v4390_v10 = vperm.slane %v4382_v9, %v6745_v8  ;;  %v4429_v12 = vrot.slane %v4386_v19, 4  ;;  %v10236_v52 = vld [vmem:[#allocation25_spill] sm:$0xff] }
 0x97e   : > { %v4349_v27 = vrot.slane %v4310_v48, 4  ;;  %v4348_v46 = vsel %vm761_vm0, %v4347_v23, %v4310_v48  ;;  %v4453_v55 = vrot.slane %v4410_v60, 4  ;;  %v4405_v53 = vrot.slane %v4362_v50, 4  ;;  %v10234_v48 = vld [vmem:[#allocation46_spill] sm:$0xff] }
 0x97f   : > { %5396 = vrot.lane.b32.xlu0 %v4344_v49, %s10225_s29  ;;  %v5233_v63 = vpop.permute.xlu1 %5232  ;;  %5392 = vrot.lane.b32.xlu2 %v4342_v31, %s10226_s23  ;;  %s10229_s23 = smov 12   ;;  %s10230_s29 = smov 10   ;;  %v4440_v22 = vsel %vm761_vm0, %v4439_v18, %v4390_v10  ;;  %v4451_v28 = vrot.slane %v4434_v43, 4  ;;  %v4415_v49 = vrot.slane %v4378_v47, 4  ;;  %v4491_v34 = vrot.slane %v10232_v59, 4  ;;  %v10238_v18 = vld [vmem:[#allocation34_spill] sm:$0xff] }
 0x980   : > { %v4350_v6 = vsel %vm761_vm0, %v4334_v33, %v4349_v27  ;;  %v4454_v11 = vsel %vm761_vm0, %v4434_v43, %v4453_v55  ;;  %v4430_v31 = vsel %vm761_vm0, %v8927_v7, %v4429_v12  ;;  %v4353_v33 = vrot.slane %v4314_v44, 4  ;;  %v10235_v44 = vld [vmem:[#allocation78_spill] sm:$0xff] }
 0x981   : > { %v5229_v29 = vpop.permute.xlu0 %5228  ;;  %v8969_v3 = vpop.permute.xlu2 %5260  ;;  %v4406_v20 = vsel %vm761_vm0, %v8924_v51, %v4405_v53  ;;  %v4479_v50 = vrot.slane %v10234_v48, 4  ;;  %v4452_v19 = vsel %vm761_vm0, %v4451_v28, %v4410_v60  ;;  %v4438_v58 = vperm.slane %v4430_v31, %v6777_v15 }
 0x982   : > { %v5665_v56 = vsel %vm10227_vm2, %v5664_v14, %v5229_v29  ;;  %v4358_v14 = vsel %vm761_vm0, %v10213_v42, %v4357_v61  ;;  %v9004_v42 = vperm.slane %v4440_v22, %v6777_v15  ;;  %v4354_v29 = vsel %vm761_vm0, %v8934_v13, %v4353_v33  ;;  %v10237_v13 = vld [vmem:[#allocation71_spill] sm:$0xff] }
 0x983   : > { %v8973_v21 = vsel %vm10228_vm7, %v5665_v56, %v5233_v63  ;;  %v4366_v32 = vperm.slane %v4358_v14, %v6745_v8  ;;  %v4503_v63 = vrot.slane %v8489_v36, 4  ;;  %v4492_v23 = vsel %vm761_vm0, %v4491_v34, %v10235_v44 }
 0x984   : > { %v4459_v51 = vrot.slane %v9004_v42, 4  ;;  %v4414_v45 = vperm.slane %v4406_v20, %v6777_v15  ;;  %v4467_v0 = vrot.slane %v10236_v52, 4  ;;  %v4441_v9 = vrot.slane %v4390_v10, 4 }
 0x985   : > { %5412 = vrot.lane.b32.xlu1 %v4352_v62, %s10229_s23  ;;  %s10231_s23 = smov 8   ;;  %v4416_v7 = vsel %vm761_vm0, %v4415_v49, %v4366_v32  ;;  %v4417_v56 = vrot.slane %v4366_v32, 4  ;;  %v4504_v62 = vsel %vm761_vm0, %v4503_v63, %v10237_v13  ;;  %v4480_v61 = vsel %vm761_vm0, %v4479_v50, %v10238_v18  ;;  %v10239_v32 = vld [vmem:[#allocation29_spill] sm:$0xff] }
 0x986   : > { %v4422_v43 = vperm.slane %v4416_v7, %v6777_v15  ;;  %v4442_v14 = vsel %vm761_vm0, %v8964_v30, %v4441_v9  ;;  %v4455_v22 = vrot.slane %v4438_v58, 4  ;;  %v4481_v10 = vrot.slane %v10238_v18, 4 }
 0x987   : > { %5408 = vrot.lane.b32.xlu0 %v4350_v6, %s10230_s29  ;;  %v8992_v17 = vpop.permute.xlu1 %5244  ;;  %5404 = vrot.lane.b32.xlu2 %v4348_v46, %s10231_s23  ;;  %s10233_s29 = smov 18   ;;  %v4418_v6 = vsel %vm761_vm0, %v4378_v47, %v4417_v56  ;;  %v4498_v46 = vperm.slane %v4492_v23, %v6745_v8  ;;  %v4510_v12 = vperm.slane %v4504_v62, %v6745_v8  ;;  %v4457_v28 = vrot.slane %v4414_v45, 4  ;;  %s10337_s23 = sld [smem:[#allocation96_spill]] }
 0x988   : > { %v4460_v55 = vsel %vm761_vm0, %v4459_v51, %v4422_v43  ;;  %v4468_v47 = vsel %vm761_vm0, %v4467_v0, %v10239_v32  ;;  %v4486_v53 = vperm.slane %v4480_v61, %v6745_v8  ;;  %vm10240_vm10 = vcmask 408576  }
 0x989   : > { %v5241_v25 = vpop.permute.xlu0 %5240  ;;  %v8998_v38 = vpop.permute.xlu2 %5272  ;;  %v5667_v49 = vsel %vm10240_vm10, %v8973_v21, %v8886_v5  ;;  %v4426_v30 = vperm.slane %v4418_v6, %v6777_v15  ;;  %v4505_v34 = vrot.slane %v10237_v13, 4  ;;  %vm10241_vm2 = vcmask 424960  }
 0x98a   : > { %v4458_v31 = vsel %vm761_vm0, %v4438_v58, %v4457_v28  ;;  %v4450_v63 = vperm.slane %v4442_v14, %v6777_v15  ;;  %v4482_v33 = vsel %vm761_vm0, %v10234_v48, %v4481_v10  ;;  %v4541_v20 = vrot.slane %v4498_v46, 4 }
 0x98b   : > { %v4456_v5 = vsel %vm761_vm0, %v4455_v22, %v4414_v45  ;;  %v4469_v50 = vrot.slane %v10239_v32, 4  ;;  %v4515_v7 = vrot.slane %v4486_v53, 4  ;;  %vm10242_vm7 = vcmask 441344  }
 0x98c   : > { %v4542_v56 = vsel %vm761_vm0, %v4510_v12, %v4541_v20  ;;  %v9068_v23 = vperm.slane %v4482_v33, %v6745_v8  ;;  %v4615_v51 = vrot.slane %v8515_v2, 4  ;;  %v4463_v0 = vrot.slane %v4450_v63, 4 }
 0x98d   : > { %5424 = vrot.lane.b32.xlu1 %v4454_v11, %s10233_s29  ;;  %v5668_v11 = vsel %vm10241_vm2, %v5667_v49, %v5241_v25  ;;  %v4539_v25 = vrot.slane %v4510_v12, 4  ;;  %v4493_v9 = vrot.slane %v10235_v44, 4  ;;  %v4470_v13 = vsel %vm761_vm0, %v10236_v52, %v4469_v50  ;;  %v10245_v12 = vld [vmem:[#allocation70_spill] sm:$0xff]  ;;  %v10246_v49 = vld [vmem:[#allocation84_spill] sm:$0xff] }
 0x98e   : > { %v5669_v48 = vsel %vm10242_vm7, %v5668_v11, %v8992_v17  ;;  %vm10243_vm10 = vcmask 457728   ;;  %v9083_v61 = vperm.slane %v4542_v56, %v6777_v15  ;;  %vm10244_vm2 = vcmask 474112   ;;  %v10251_v56 = vld [vmem:[#allocation59_spill] sm:$0xff] }
 0x98f   : > { %5420 = vrot.lane.b32.xlu0 %v4452_v19, %s10123_s21  ;;  %v9017_v35 = vpop.permute.xlu1 %5256  ;;  %5416 = vrot.lane.b32.xlu2 %v4354_v29, %s10124_s17  ;;  %v4506_v19 = vsel %vm761_vm0, %v8489_v36, %v4505_v34  ;;  %v4474_v29 = vperm.slane %v4468_v47, %v6745_v8  ;;  %v4465_v36 = vrot.slane %v4426_v30, 4  ;;  %v5670_v17 = vsel %vm10243_vm10, %v5669_v48, %v8921_v37 }
 0x990   : > { %v9077_v62 = vperm.slane %v4506_v19, %v6745_v8  ;;  %v4540_v6 = vsel %vm761_vm0, %v4539_v25, %v4498_v46  ;;  %v4461_v44 = vrot.slane %v4422_v43, 4  ;;  %v4527_v10 = vrot.slane %v9068_v23, 4 }
 0x991   : > { %v5253_v27 = vpop.permute.xlu0 %5252  ;;  %v9032_v60 = vpop.permute.xlu2 %5284  ;;  %v4466_v18 = vsel %vm761_vm0, %v4450_v63, %v4465_v36  ;;  %v4517_v14 = vrot.slane %v4474_v29, 4  ;;  %v4516_v52 = vsel %vm761_vm0, %v4515_v7, %v4474_v29  ;;  %v4494_v37 = vsel %vm761_vm0, %v10232_v59, %v4493_v9 }
 0x992   : > { %v5671_v22 = vsel %vm10244_vm2, %v5670_v17, %v5253_v27  ;;  %v4464_v28 = vsel %vm761_vm0, %v4463_v0, %v4426_v30  ;;  %v4551_v46 = vrot.slane %v9077_v62, 4  ;;  %v4462_v27 = vsel %vm761_vm0, %v9004_v42, %v4461_v44 }
 0x993   : > { %v4518_v32 = vsel %vm761_vm0, %v4486_v53, %v4517_v14  ;;  %v4546_v47 = vperm.slane %v4540_v6, %v6777_v15  ;;  %v4603_v34 = vrot.slane %v10246_v49, 4  ;;  %vm10247_vm7 = vcmask 490496  }
 0x994   : > { %v5672_v59 = vsel %vm10247_vm7, %v5671_v22, %v9017_v35  ;;  %v4567_v30 = vrot.slane %v9083_v61, 4  ;;  %v4522_v11 = vperm.slane %v4516_v52, %v6777_v15  ;;  %v4478_v42 = vperm.slane %v4470_v13, %v6745_v8  ;;  %v10253_v13 = vld [vmem:[#allocation28_spill] sm:$0xff] }
 0x995   : > { %5436 = vrot.lane.b32.xlu1 %v4460_v55, %s10125_s25  ;;  %v4616_v55 = vsel %vm761_vm0, %v4615_v51, %v10245_v12  ;;  %v4502_v33 = vperm.slane %v4494_v37, %v6745_v8  ;;  %v4526_v35 = vperm.slane %v4518_v32, %v6777_v15  ;;  %vm10250_vm10 = vcmask 506880   ;;  %s10334_s25 = sld [smem:[#allocation42_spill]] }
 0x996   : > { %v9111_v53 = vperm.slane %v4616_v55, %v6745_v8  ;;  %v5673_v25 = vsel %vm10250_vm10, %v5672_v59, %v8969_v3  ;;  %v4563_v29 = vrot.slane %v4546_v47, 4  ;;  %v4528_v7 = vsel %vm761_vm0, %v4527_v10, %v4478_v42  ;;  %v10254_v3 = vld [vmem:[#allocation31_spill] sm:$0xff] }
 0x997   : > { %5432 = vrot.lane.b32.xlu0 %v4458_v31, %s10126_s14  ;;  %v9057_v21 = vpop.permute.xlu1 %5268  ;;  %5428 = vrot.lane.b32.xlu2 %v4456_v5, %s10127_s26  ;;  %v10248_v31 = vld [vmem:[#allocation75_spill] sm:$0xff]  ;;  %v10249_v5 = vld [vmem:[#allocation20_spill] sm:$0xff]  ;;  %v4552_v48 = vsel %vm761_vm0, %v4551_v46, %v4502_v33  ;;  %v4604_v51 = vsel %vm761_vm0, %v4603_v34, %v10251_v56  ;;  %vm10252_vm2 = vcmask 523264   ;;  %v4568_v0 = vsel %vm761_vm0, %v4567_v30, %v4526_v35  ;;  %s10326_s26 = smov 106   ;;  %s10331_s14 = sld [smem:[#allocation13_spill]] }
 0x998   : > { %v4591_v63 = vrot.slane %v10248_v31, 4  ;;  %v4579_v50 = vrot.slane %v10249_v5, 4  ;;  %v4565_v9 = vrot.slane %v4522_v11, 4  ;;  %v4534_v22 = vperm.slane %v4528_v7, %v6777_v15 }
 0x999   : > { %v5265_v58 = vpop.permute.xlu0 %5264  ;;  %v9071_v45 = vpop.permute.xlu2 %5296  ;;  %v4558_v44 = vperm.slane %v4552_v48, %v6777_v15  ;;  %vm10255_vm7 = vcmask 539648   ;;  %v4564_v10 = vsel %vm761_vm0, %v4563_v29, %v4522_v11  ;;  %v4553_v32 = vrot.slane %v4502_v33, 4 }
 0x99a   : > { %v5674_v36 = vsel %vm10252_vm2, %v5673_v25, %v5265_v58  ;;  %v4592_v17 = vsel %vm761_vm0, %v4591_v63, %v10253_v13  ;;  %v4580_v6 = vsel %vm761_vm0, %v4579_v50, %v10254_v3  ;;  %v4566_v14 = vsel %vm761_vm0, %v4546_v47, %v4565_v9 }
 0x99b   : > { %v4610_v58 = vperm.slane %v4604_v51, %v6745_v8  ;;  %v5675_v52 = vsel %vm10255_vm7, %v5674_v36, %v9057_v21  ;;  %v4598_v55 = vperm.slane %v4592_v17, %v6745_v8  ;;  %vm10256_vm10 = vcmask 556032  }
 0x99c   : > { %v5676_v47 = vsel %vm10256_vm10, %v5675_v52, %v8998_v38  ;;  %v4573_v21 = vrot.slane %v4534_v22, 4  ;;  %v4571_v59 = vrot.slane %v4558_v44, 4  ;;  %v4529_v30 = vrot.slane %v4478_v42, 4 }
 0x99d   : > { %5448 = vrot.lane.b32.xlu1 %v4466_v18, %s10128_s24  ;;  %v4651_v18 = vrot.slane %v9111_v53, 4  ;;  %vm10257_vm2 = vcmask 572416   ;;  %v4554_v63 = vsel %vm761_vm0, %v9077_v62, %v4553_v32  ;;  %v4593_v33 = vrot.slane %v10253_v13, 4  ;;  %s10333_s24 = smov 110  }
 0x99e   : > { %v4574_v50 = vsel %vm761_vm0, %v4558_v44, %v4573_v21  ;;  %v4627_v29 = vrot.slane %v4598_v55, 4  ;;  %v4530_v38 = vsel %vm761_vm0, %v9068_v23, %v4529_v30  ;;  %v4569_v7 = vrot.slane %v4526_v35, 4  ;;  %v10264_v30 = vld [vmem:[#allocation36_spill] sm:$0xff] }
 0x99f   : > { %5444 = vrot.lane.b32.xlu0 %v4464_v28, %s10129_s28  ;;  %v5281_v43 = vpop.permute.xlu1 %5280  ;;  %5440 = vrot.lane.b32.xlu2 %v4462_v27, %s10130_s27  ;;  %v4586_v28 = vperm.slane %v4580_v6, %v6745_v8  ;;  %v4652_v27 = vsel %vm761_vm0, %v4651_v18, %v4610_v58  ;;  %vm10258_vm7 = vcmask 588800   ;;  %v4572_v62 = vsel %vm761_vm0, %v4571_v59, %v4534_v22  ;;  %s10327_s27 = smov 104   ;;  %s10330_s28 = smov 114  }
 0x9a0   : > { %v9152_v25 = vperm.slane %v4652_v27, %v6777_v15  ;;  %v4617_v51 = vrot.slane %v10245_v12, 4  ;;  %v4570_v36 = vsel %vm761_vm0, %v9083_v61, %v4569_v7  ;;  %v4562_v9 = vperm.slane %v4554_v63, %v6777_v15  ;;  %v10265_v63 = vld [vmem:[#allocation83_spill] sm:$0xff] }
 0x9a1   : > { %v5277_v20 = vpop.permute.xlu0 %5276  ;;  %v9114_v19 = vpop.permute.xlu2 %5308  ;;  %v4629_v42 = vrot.slane %v4586_v28, 4  ;;  %v4628_v23 = vsel %vm761_vm0, %v4627_v29, %v4586_v28  ;;  %v4581_v35 = vrot.slane %v10254_v3, 4  ;;  %v4538_v12 = vperm.slane %v4530_v38, %v6777_v15 }
 0x9a2   : > { %v5677_v11 = vsel %vm10257_vm2, %v5676_v47, %v5277_v20  ;;  %v4605_v20 = vrot.slane %v10251_v56, 4  ;;  %v4594_v13 = vsel %vm761_vm0, %v10248_v31, %v4593_v33  ;;  %v4653_v61 = vrot.slane %v4610_v58, 4  ;;  %v10261_v31 = vld [vmem:[#allocation49_spill] sm:$0xff] }
 0x9a3   : > { %v5678_v48 = vsel %vm10258_vm7, %v5677_v11, %v5281_v43  ;;  %v4675_v43 = vrot.slane %v9152_v25, 4  ;;  %v4618_v17 = vsel %vm761_vm0, %v8515_v2, %v4617_v51  ;;  %vm10259_vm10 = vcmask 605184  }
 0x9a4   : > { %v4606_v56 = vsel %vm761_vm0, %v10246_v49, %v4605_v20  ;;  %v5679_v18 = vsel %vm10259_vm10, %v5678_v48, %v9032_v60  ;;  %v4582_v49 = vsel %vm761_vm0, %v10249_v5, %v4581_v35  ;;  %vm10260_vm2 = vcmask 621568  }
 0x9a5   : > { %5460 = vrot.lane.b32.xlu1 %v4568_v0, %s10131_s16  ;;  %v4634_v22 = vperm.slane %v4628_v23, %v6777_v15  ;;  %v4630_v44 = vsel %vm761_vm0, %v4598_v55, %v4629_v42  ;;  %v4703_v58 = vrot.slane %v10261_v31, 4  ;;  %v4614_v52 = vperm.slane %v4606_v56, %v6745_v8  ;;  %v10269_v56 = vld [vmem:[#allocation74_spill] sm:$0xff]  ;;  %s10332_s16 = smov 112  }
 0x9a6   : > { %v4575_v2 = vrot.slane %v4562_v9, 4  ;;  %v4654_v60 = vsel %vm761_vm0, %v9111_v53, %v4653_v61  ;;  %v4626_v5 = vperm.slane %v4618_v17, %v6745_v8  ;;  %v4577_v27 = vrot.slane %v4538_v12, 4 }
 0x9a7   : > { %5456 = vrot.lane.b32.xlu0 %v4566_v14, %s10132_s22  ;;  %v5293_v37 = vpop.permute.xlu1 %5292  ;;  %5452 = vrot.lane.b32.xlu2 %v4564_v10, %s10133_s0  ;;  %v10262_v10 = vld [vmem:[#allocation67_spill] sm:$0xff]  ;;  %v4602_v32 = vperm.slane %v4594_v13, %v6745_v8  ;;  %v4590_v47 = vperm.slane %v4582_v49, %v6745_v8  ;;  %vm10263_vm7 = vcmask 637952   ;;  %v4638_v59 = vperm.slane %v4630_v44, %v6777_v15  ;;  %s10289_s0 = smov 68   ;;  %s5921_s22 = sshll.u32 %s10331_s14, 3 }
 0x9a8   : > { %v4691_v28 = vrot.slane %v10262_v10, 4  ;;  %v4578_v21 = vsel %vm761_vm0, %v4562_v9, %v4577_v27  ;;  %v4662_v53 = vperm.slane %v4654_v60, %v6777_v15  ;;  %v4704_v11 = vsel %vm761_vm0, %v4703_v58, %v10264_v30  ;;  %s5787_s29 = scalar_lea.hbm %s10337_s23, %s5921_s22 }
 0x9a9   : > { %v5289_v46 = vpop.permute.xlu0 %5288  ;;  %v9145_v34 = vpop.permute.xlu2 %5320  ;;  %v4665_v33 = vrot.slane %v4614_v52, 4  ;;  %v4576_v29 = vsel %vm761_vm0, %v4575_v2, %v4538_v12  ;;  %v4727_v42 = vrot.slane %v8671_v40, 4  ;;  %v4663_v20 = vrot.slane %v4626_v5, 4 }
 0x9aa   : > { %v5680_v6 = vsel %vm10260_vm2, %v5679_v18, %v5289_v46  ;;  %v4676_v46 = vsel %vm761_vm0, %v4675_v43, %v4634_v22  ;;  %vm10267_vm10 = vcmask 654336   ;;  %v4641_v51 = vrot.slane %v4590_v47, 4  ;;  %v10270_v18 = vld [vmem:[#allocation58_spill] sm:$0xff] }
 0x9ab   : > { %v5681_v55 = vsel %vm10263_vm7, %v5680_v6, %v5293_v37  ;;  %v10266_v37 = vld [vmem:[#allocation35_spill] sm:$0xff]  ;;  %vm10268_vm2 = vcmask 670720   ;;  %v9214_v35 = vperm.slane %v4704_v11, %v6745_v8  ;;  %v4728_v43 = vsel %vm761_vm0, %v4727_v42, %v10269_v56 }
 0x9ac   : > { %v4692_v7 = vsel %vm761_vm0, %v4691_v28, %v10266_v37  ;;  %v5682_v48 = vsel %vm10267_vm10, %v5681_v55, %v9071_v45  ;;  %v4681_v13 = vrot.slane %v4638_v59, 4  ;;  %v4679_v61 = vrot.slane %v4662_v53, 4 }
 0x9ad   : > { %5472 = vrot.lane.b32.xlu1 %v4574_v50, %s10134_s1  ;;  %v4715_v50 = vrot.slane %v10265_v63, 4  ;;  %v4729_v17 = vrot.slane %v10269_v56, 4  ;;  %vm10271_vm7 = vcmask 687104   ;;  %v4664_v58 = vsel %vm761_vm0, %v4663_v20, %v4614_v52  ;;  %s10292_s1 = smov 78  }
 0x9ae   : > { %v4682_v44 = vsel %vm761_vm0, %v4662_v53, %v4681_v13  ;;  %v9231_v2 = vperm.slane %v4692_v7, %v6745_v8  ;;  %v4734_v60 = vperm.slane %v4728_v43, %v6745_v8  ;;  %v4677_v28 = vrot.slane %v4634_v22, 4 }
 0x9af   : > { %5468 = vrot.lane.b32.xlu0 %v4572_v62, %s10135_s2  ;;  %v5305_v0 = vpop.permute.xlu1 %5304  ;;  %5464 = vrot.lane.b32.xlu2 %v4570_v36, %s10136_s3  ;;  %v4639_v62 = vrot.slane %v4602_v32, 4  ;;  %v4666_v36 = vsel %vm761_vm0, %v4626_v5, %v4665_v33  ;;  %v4716_v49 = vsel %vm761_vm0, %v4715_v50, %v10270_v18  ;;  %v4739_v5 = vrot.slane %v9214_v35, 4  ;;  %s10295_s2 = smov 76   ;;  %s10298_s3 = smov 74  }
 0x9b0   : > { %v4642_v27 = vsel %vm761_vm0, %v4602_v32, %v4641_v51  ;;  %vm10272_vm10 = vcmask 703488   ;;  %v4678_v55 = vsel %vm761_vm0, %v9152_v25, %v4677_v28  ;;  %v4670_v22 = vperm.slane %v4664_v58, %v6777_v15 }
 0x9b1   : > { %v5301_v3 = vpop.permute.xlu0 %5300  ;;  %v9182_v14 = vpop.permute.xlu2 %5332  ;;  %v4640_v45 = vsel %vm761_vm0, %v4639_v62, %v4590_v47  ;;  %v4722_v47 = vperm.slane %v4716_v49, %v6745_v8  ;;  %v4717_v53 = vrot.slane %v10270_v18, 4  ;;  %v4730_v32 = vsel %vm761_vm0, %v8671_v40, %v4729_v17 }
 0x9b2   : > { %v5683_v23 = vsel %vm10268_vm2, %v5682_v48, %v5301_v3  ;;  %v9225_v3 = vperm.slane %v4666_v36, %v6777_v15  ;;  %vm10273_vm2 = vcmask 719872   ;;  %v4705_v33 = vrot.slane %v10264_v30, 4 }
 0x9b3   : > { %v5684_v6 = vsel %vm10271_vm7, %v5683_v23, %v5305_v0  ;;  %v4646_v0 = vperm.slane %v4640_v45, %v6777_v15  ;;  %v4718_v25 = vsel %vm761_vm0, %v10265_v63, %v4717_v53  ;;  %v4650_v7 = vperm.slane %v4642_v27, %v6777_v15 }
 0x9b4   : > { %v5685_v52 = vsel %vm10272_vm10, %v5684_v6, %v9114_v19  ;;  %v4687_v11 = vrot.slane %v9225_v3, 4  ;;  %v4763_v19 = vrot.slane %v4734_v60, 4  ;;  %v4740_v40 = vsel %vm761_vm0, %v4739_v5, %v9231_v2 }
 0x9b5   : > { %5484 = vrot.lane.b32.xlu1 %v4676_v46, %s10137_s4  ;;  %v4680_v46 = vsel %vm761_vm0, %v4679_v61, %v4638_v59  ;;  %v9261_v42 = vperm.slane %v4730_v32, %v6745_v8  ;;  %vm10274_vm7 = vcmask 736256   ;;  %v4683_v48 = vrot.slane %v4670_v22, 4  ;;  %s10299_s4 = sld [smem:[#allocation41_spill]] }
 0x9b6   : > { %v4764_v62 = vsel %vm761_vm0, %v4763_v19, %v4722_v47  ;;  %v4706_v30 = vsel %vm761_vm0, %v10261_v31, %v4705_v33  ;;  %v4688_v63 = vsel %vm761_vm0, %v4687_v11, %v4650_v7  ;;  %v4685_v51 = vrot.slane %v4646_v0, 4 }
 0x9b7   : > { %5480 = vrot.lane.b32.xlu0 %v4578_v21, %s10138_s5  ;;  %v5317_v38 = vpop.permute.xlu1 %5316  ;;  %5476 = vrot.lane.b32.xlu2 %v4576_v29, %s10139_s6  ;;  %v4693_v36 = vrot.slane %v10266_v37, 4  ;;  %v4726_v23 = vperm.slane %v4718_v25, %v6745_v8  ;;  %vm10275_vm10 = vcmask 752640   ;;  %v4746_v56 = vperm.slane %v4740_v40, %v6777_v15  ;;  %v10282_v40 = vld [vmem:[#allocation62_spill] sm:$0xff]  ;;  %s10303_s6 = smov 82  }
 0x9b8   : > { %v4770_v43 = vperm.slane %v4764_v62, %v6777_v15  ;;  %v4714_v31 = vperm.slane %v4706_v30, %v6745_v8  ;;  %v4775_v13 = vrot.slane %v9261_v42, 4  ;;  %v4684_v37 = vsel %vm761_vm0, %v4683_v48, %v4646_v0  ;;  %v10283_v30 = vld [vmem:[#allocation73_spill] sm:$0xff] }
 0x9b9   : > { %v5313_v9 = vpop.permute.xlu0 %5312  ;;  %v9218_v12 = vpop.permute.xlu2 %5344  ;;  %v4765_v17 = vrot.slane %v4722_v47, 4  ;;  %v4789_v58 = vrot.slane %v4746_v56, 4  ;;  %v4827_v32 = vrot.slane %v8273_v4, 4 }
 0x9ba   : > { %v5686_v59 = vsel %vm10273_vm2, %v5685_v52, %v5313_v9  ;;  %vm10276_vm2 = vcmask 769024   ;;  %v4776_v18 = vsel %vm761_vm0, %v4775_v13, %v4726_v23  ;;  %v4787_v28 = vrot.slane %v4770_v43, 4  ;;  %v10286_v13 = vld [vmem:[#allocation30_spill] sm:$0xff] }
 0x9bb   : > { %v5687_v20 = vsel %vm10274_vm7, %v5686_v59, %v5317_v38  ;;  %v4686_v38 = vsel %vm761_vm0, %v4670_v22, %v4685_v51  ;;  %vm10277_vm7 = vcmask 785408   ;;  %v4751_v27 = vrot.slane %v4714_v31, 4  ;;  %v10280_v59 = vld [vmem:[#allocation48_spill] sm:$0xff]  ;;  %s5916_s5 = sshll.u32 %s10299_s4, 4 }
 0x9bc   : > { %v5688_v9 = vsel %vm10275_vm10, %v5687_v20, %v9145_v34  ;;  %v4694_v34 = vsel %vm761_vm0, %v10262_v10, %v4693_v36  ;;  %v4790_v0 = vsel %vm761_vm0, %v4770_v43, %v4789_v58  ;;  %v4689_v10 = vrot.slane %v4650_v7, 4  ;;  %v10285_v36 = vld [vmem:[#allocation63_spill] sm:$0xff] }
 0x9bd   : > { %5496 = vrot.lane.b32.xlu1 %v4682_v44, %s10140_s7  ;;  %v4702_v5 = vperm.slane %v4694_v34, %v6745_v8  ;;  %v9292_v47 = vperm.slane %v4776_v18, %v6777_v15  ;;  %v4766_v52 = vsel %vm761_vm0, %v4734_v60, %v4765_v17  ;;  %vm10279_vm10 = vcmask 801792   ;;  %s10304_s7 = smov 80  }
 0x9be   : > { %v4815_v11 = vrot.slane %v10280_v59, 4  ;;  %v4788_v60 = vsel %vm761_vm0, %v4787_v28, %v4746_v56  ;;  %v4690_v33 = vsel %vm761_vm0, %v9225_v3, %v4689_v10  ;;  %v4774_v7 = vperm.slane %v4766_v52, %v6777_v15 }
 0x9bf   : > { %5492 = vrot.lane.b32.xlu0 %v4680_v46, %s10141_s18  ;;  %v5329_v21 = vpop.permute.xlu1 %5328  ;;  %5488 = vrot.lane.b32.xlu2 %v4678_v55, %s10142_s11  ;;  %v4741_v46 = vrot.slane %v9231_v2, 4  ;;  %v10278_v55 = vld [vmem:[#allocation24_spill] sm:$0xff]  ;;  %v4752_v25 = vsel %vm761_vm0, %v4751_v27, %v4702_v5  ;;  %v4828_v20 = vsel %vm761_vm0, %v4827_v32, %v10282_v40  ;;  %v4795_v48 = vrot.slane %v9292_v47, 4  ;;  %s10311_s11 = smov 96   ;;  %s10320_s18 = smov 100  }
 0x9c0   : > { %v4803_v22 = vrot.slane %v10278_v55, 4  ;;  %v4758_v43 = vperm.slane %v4752_v25, %v6777_v15  ;;  %v4791_v34 = vrot.slane %v4774_v7, 4 }
 0x9c1   : > { %v5325_v50 = vpop.permute.xlu0 %5324  ;;  %v9255_v29 = vpop.permute.xlu2 %5356  ;;  %v4742_v2 = vsel %vm761_vm0, %v9214_v35, %v4741_v46  ;;  %v4753_v35 = vrot.slane %v4702_v5, 4 }
 0x9c2   : > { %v5689_v61 = vsel %vm10276_vm2, %v5688_v9, %v5325_v50  ;;  %vm10281_vm2 = vcmask 818176   ;;  %v4777_v50 = vrot.slane %v4726_v23, 4  ;;  %v4750_v62 = vperm.slane %v4742_v2, %v6777_v15 }
 0x9c3   : > { %v5690_v6 = vsel %vm10277_vm7, %v5689_v61, %v5329_v21  ;;  %v4839_v21 = vrot.slane %v8520_v39, 4  ;;  %vm10284_vm7 = vcmask 834560   ;;  %v4817_v23 = vrot.slane %v10285_v36, 4 }
 0x9c4   : > { %v5691_v53 = vsel %vm10279_vm10, %v5690_v6, %v9182_v14  ;;  %v4816_v9 = vsel %vm761_vm0, %v4815_v11, %v10285_v36  ;;  %v4804_v61 = vsel %vm761_vm0, %v4803_v22, %v10286_v13  ;;  %vm10287_vm10 = vcmask 867328  }
 0x9c5   : > { %5508 = vrot.lane.b32.xlu1 %v4688_v63, %s10143_s10  ;;  %v4840_v63 = vsel %vm761_vm0, %v4839_v21, %v10283_v30  ;;  %v4818_v6 = vsel %vm761_vm0, %v10280_v59, %v4817_v23  ;;  %v4822_v58 = vperm.slane %v4816_v9, %v6745_v8  ;;  %v4792_v52 = vsel %vm761_vm0, %v4791_v34, %v4750_v62  ;;  %v10293_v23 = vld [vmem:[#allocation87_spill] sm:$0xff]  ;;  %s10309_s10 = smov 86  }
 0x9c6   : > { %v4846_v17 = vperm.slane %v4840_v63, %v6745_v8  ;;  %v4805_v21 = vrot.slane %v10286_v13, 4 }
 0x9c7   : > { %5504 = vrot.lane.b32.xlu0 %v4686_v38, %s10144_s15  ;;  %v5341_v45 = vpop.permute.xlu1 %5340  ;;  %5500 = vrot.lane.b32.xlu2 %v4684_v37, %s10145_s20  ;;  %v4754_v38 = vsel %vm761_vm0, %v4714_v31, %v4753_v35  ;;  %v4834_v37 = vperm.slane %v4828_v20, %v6745_v8  ;;  %v4796_v31 = vsel %vm761_vm0, %v4795_v48, %v4758_v43  ;;  %v4851_v59 = vrot.slane %v4822_v58, 4  ;;  %s10318_s15 = smov 102   ;;  %s10325_s20 = smov 108  }
 0x9c8   : > { %v4762_v5 = vperm.slane %v4754_v38, %v6777_v15  ;;  %v4875_v2 = vrot.slane %v4846_v17, 4  ;;  %v4806_v63 = vsel %vm761_vm0, %v10278_v55, %v4805_v21  ;;  %v10301_v21 = vld [vmem:[#allocation61_spill] sm:$0xff] }
 0x9c9   : > { %v5337_v49 = vpop.permute.xlu0 %5336  ;;  %v9286_v44 = vpop.permute.xlu2 %5368  ;;  %v4877_v10 = vrot.slane %v4834_v37, 4 }
 0x9ca   : > { %v5692_v19 = vsel %vm10281_vm2, %v5691_v53, %v5337_v49  ;;  %v4793_v49 = vrot.slane %v4750_v62, 4  ;;  %vm10288_vm2 = vcmask 883712  }
 0x9cb   : > { %v5693_v3 = vsel %vm10284_vm7, %v5692_v19, %v5341_v45  ;;  %v4778_v45 = vsel %vm761_vm0, %v9261_v42, %v4777_v50  ;;  %v4841_v42 = vrot.slane %v10283_v30, 4  ;;  %v4801_v19 = vrot.slane %v4762_v5, 4 }
 0x9cc   : > { %v5694_v18 = vsel %vm2011_vm11, %v5693_v3, %v9218_v12  ;;  %v4794_v46 = vsel %vm761_vm0, %v4774_v7, %v4793_v49  ;;  %v4339_v12 = vrot.slane %v8931_v24, 4  ;;  %v4786_v27 = vperm.slane %v4778_v45, %v6777_v15 }
 0x9cd   : > { %5520 = vrot.lane.b32.xlu1 %v4790_v0, %s10147_s30  ;;  %v4810_v0 = vperm.slane %v4804_v61, %v6745_v8  ;;  %v4842_v53 = vsel %vm761_vm0, %v8520_v39, %v4841_v42  ;;  %v9354_v24 = vperm.slane %v4818_v6, %v6745_v8  ;;  %v4829_v50 = vrot.slane %v10282_v40, 4  ;;  %s10308_s30 = smov 88  }
 0x9ce   : > { %v4340_v39 = vsel %vm761_vm0, %v4339_v12, %v8917_v16  ;;  %v4799_v7 = vrot.slane %v4786_v27, 4  ;;  %v9362_v35 = vperm.slane %v4842_v53, %v6745_v8  ;;  %vm10290_vm7 = vcmask 900096  }
 0x9cf   : > { %5516 = vrot.lane.b32.xlu0 %v4788_v60, %s10148_s12  ;;  %v5353_v14 = vpop.permute.xlu1 %5352  ;;  %5512 = vrot.lane.b32.xlu2 %v4690_v33, %s10149_s9  ;;  %v4878_v60 = vsel %vm761_vm0, %v4846_v17, %v4877_v10  ;;  %v4951_v33 = vrot.slane %v8564_v26, 4  ;;  %v4802_v40 = vsel %vm761_vm0, %v4786_v27, %v4801_v19  ;;  %v4876_v16 = vsel %vm761_vm0, %v4875_v2, %v4834_v37  ;;  %v10297_v17 = vld [vmem:[#allocation86_spill] sm:$0xff]  ;;  %s10307_s9 = smov 90   ;;  %s10312_s12 = smov 94  }
 0x9d0   : > { %v9372_v30 = vperm.slane %v4878_v60, %v6777_v15  ;;  %v4863_v3 = vrot.slane %v9354_v24, 4  ;;  %v4830_v36 = vsel %vm761_vm0, %v8273_v4, %v4829_v50  ;;  %v4800_v38 = vsel %vm761_vm0, %v4799_v7, %v4762_v5  ;;  %v10296_v4 = vld [vmem:[#allocation51_spill] sm:$0xff] }
 0x9d1   : > { %v5349_v51 = vpop.permute.xlu0 %5348  ;;  %v9323_v56 = vpop.permute.xlu2 %5380  ;;  %v4952_v9 = vsel %vm761_vm0, %v4951_v33, %v10293_v23  ;;  %v4887_v61 = vrot.slane %v9362_v35, 4  ;;  %v4882_v34 = vperm.slane %v4876_v16, %v6777_v15  ;;  %v4927_v45 = vrot.slane %v10296_v4, 4 }
 0x9d2   : > { %v5695_v28 = vsel %vm10287_vm10, %v5694_v18, %v5349_v51  ;;  %vm10291_vm10 = vcmask 916480   ;;  %v4852_v51 = vsel %vm761_vm0, %v4851_v59, %v4810_v0  ;;  %v4939_v18 = vrot.slane %v10297_v17, 4 }
 0x9d3   : > { %v5696_v32 = vsel %vm10288_vm2, %v5695_v28, %v5353_v14  ;;  %v4853_v14 = vrot.slane %v4810_v0, 4  ;;  %v4858_v49 = vperm.slane %v4852_v51, %v6777_v15  ;;  %v4814_v6 = vperm.slane %v4806_v63, %v6745_v8 }
 0x9d4   : > { %v5697_v20 = vsel %vm10290_vm7, %v5696_v32, %v9255_v29  ;;  %v4797_v29 = vrot.slane %v4758_v43, 4  ;;  %v9400_v28 = vperm.slane %v4952_v9, %v6745_v8  ;;  %v4899_v27 = vrot.slane %v4882_v34, 4  ;;  %v10302_v32 = vld [vmem:[#allocation22_spill] sm:$0xff] }
 0x9d5   : > { %5532 = vrot.lane.b32.xlu1 %v4796_v31, %s10152_s19  ;;  %v4854_v13 = vsel %vm761_vm0, %v4822_v58, %v4853_v14  ;;  %v4903_v31 = vrot.slane %v9372_v30, 4  ;;  %v4838_v58 = vperm.slane %v4830_v36, %v6745_v8  ;;  %v4864_v0 = vsel %vm761_vm0, %v4863_v3, %v4814_v6  ;;  %s10321_s19 = smov 98  }
 0x9d6   : > { %v4798_v43 = vsel %vm761_vm0, %v9292_v47, %v4797_v29  ;;  %v4940_v53 = vsel %vm761_vm0, %v4939_v18, %v10301_v21  ;;  %v4901_v2 = vrot.slane %v4858_v49, 4  ;;  %v4915_v59 = vrot.slane %v10302_v32, 4 }
 0x9d7   : > { %5528 = vrot.lane.b32.xlu0 %v4794_v46, %s10153_s8  ;;  %v5365_v22 = vpop.permute.xlu1 %5364  ;;  %5524 = vrot.lane.b32.xlu2 %v4792_v52, %s10289_s0  ;;  %v4862_v46 = vperm.slane %v4854_v13, %v6777_v15  ;;  %v4888_v10 = vsel %vm761_vm0, %v4887_v61, %v4838_v58  ;;  %v10300_v52 = vld [vmem:[#allocation21_spill] sm:$0xff]  ;;  %v4870_v50 = vperm.slane %v4864_v0, %v6777_v15  ;;  %vm10306_vm2 = vcmask 998400   ;;  %s9442_s8 = scalar_lea.vmem [#allocation5], %s5916_s5  ;;  %s5789_s0 = sshll.u32 %s10334_s25, 4  ;;  %s5790_s0 = int_to_ptr.vmem [resolvable:$true] %s5789_s0 }
 0x9d8   : > { %v4902_v60 = vsel %vm761_vm0, %v4882_v34, %v4901_v2  ;;  %v4894_v33 = vperm.slane %v4888_v10, %v6777_v15  ;;  %v4946_v7 = vperm.slane %v4940_v53, %v6745_v8  ;;  %v4900_v14 = vsel %vm761_vm0, %v4899_v27, %v4858_v49  ;;  %s10341_s5 = smov 118  }
 0x9d9   : > { %v5361_v11 = vpop.permute.xlu0 %5360  ;;  %v5393_v25 = vpop.permute.xlu2 %5392  ;;  %v4889_v51 = vrot.slane %v4838_v58, 4  ;;  %v4905_v34 = vrot.slane %v4862_v46, 4  ;;  %v4941_v18 = vrot.slane %v10301_v21, 4  ;;  %vm10324_vm7 = vcmask 162816  }
 0x9da   : > { %v9367_v48 = vsel %vm1909_vm3, %v4340_v39, %v5393_v25  ;;  %v5698_v62 = vsel %vm10291_vm10, %v5697_v20, %v5361_v11  ;;  %vm10294_vm3 = vcmask 932864   ;;  %v4987_v11 = vrot.slane %v9400_v28, 4 }
 0x9db   : > { %v5699_v55 = vsel %vm10294_vm3, %v5698_v62, %v5365_v22  ;;  %v4928_v22 = vsel %vm761_vm0, %v4927_v45, %v10300_v52  ;;  %v4865_v25 = vrot.slane %v4814_v6, 4  ;;  %v10305_v62 = vld [vmem:[#allocation55_spill] sm:$0xff]  ;;  %v4907_v13 = vrot.slane %v4894_v33, 4 }
 0x9dc   : > { %v5700_v5 = vsel %vm2023_vm15, %v5699_v55, %v9286_v44  ;;  %v4904_v44 = vsel %vm761_vm0, %v4903_v31, %v4862_v46  ;;  %v4934_v39 = vperm.slane %v4928_v22, %v6745_v8  ;;  %v4988_v29 = vsel %vm761_vm0, %v4987_v11, %v4946_v7 }
 0x9dd   : > { %5544 = vrot.lane.b32.xlu1 %v4802_v40, %s10292_s1  ;;  %v4916_v40 = vsel %vm761_vm0, %v4915_v59, %v10305_v62  ;;  %v4866_v16 = vsel %vm761_vm0, %v9354_v24, %v4865_v25  ;;  %v4890_v24 = vsel %vm761_vm0, %v9362_v35, %v4889_v51  ;;  %v4908_v31 = vsel %vm761_vm0, %v4907_v13, %v4870_v50  ;;  %v10315_v51 = vld [vmem:[#allocation43_spill] sm:$0xff]  ;;  %s10339_s1 = smov 120  }
 0x9de   : > { %v4963_v61 = vrot.slane %v4934_v39, 4  ;;  %v4874_v45 = vperm.slane %v4866_v16, %v6777_v15  ;;  %v4953_v35 = vrot.slane %v10293_v23, 4  ;;  %v4906_v49 = vsel %vm761_vm0, %v9372_v30, %v4905_v34 }
 0x9df   : > { %5540 = vrot.lane.b32.xlu0 %v4800_v38, %s10295_s2  ;;  %v5377_v37 = vpop.permute.xlu1 %5376  ;;  %5536 = vrot.lane.b32.xlu2 %v4798_v43, %s10298_s3  ;;  %v4909_v38 = vrot.slane %v4870_v50, 4  ;;  %v4922_v43 = vperm.slane %v4916_v40, %v6745_v8  ;;  %v4917_v27 = vrot.slane %v10305_v62, 4  ;;  %v4989_v0 = vrot.slane %v4946_v7, 4  ;;  %s5791_s3 = sshll.u32 %s5787_s29, 4  ;;  %s5792_s3 = int_to_ptr.hbm [resolvable:$true] %s5791_s3 }
 0x9e0   : > { %v4954_v30 = vsel %vm761_vm0, %v8564_v26, %v4953_v35  ;;  %v4913_v22 = vrot.slane %v4874_v45, 4  ;;  %vm10328_vm10 = vcmask 179200   ;;  %vm10329_vm3 = vcmask 211968  }
 0x9e1   : > { %v5373_v47 = vpop.permute.xlu0 %5372  ;;  %v9404_v42 = vpop.permute.xlu2 %5404  ;;  %v4964_v58 = vsel %vm761_vm0, %v4963_v61, %v4922_v43  ;;  %v4965_v46 = vrot.slane %v4922_v43, 4  ;;  %v4990_v26 = vsel %vm761_vm0, %v9400_v28, %v4989_v0  ;;  %v4918_v25 = vsel %vm761_vm0, %v10302_v32, %v4917_v27 }
 0x9e2   : > { %v5701_v12 = vsel %vm2025_vm8, %v5700_v5, %v5373_v47  ;;  %v4898_v47 = vperm.slane %v4890_v24, %v6777_v15  ;;  %v4929_v5 = vrot.slane %v10300_v52, 4  ;;  %v4998_v7 = vperm.slane %v4990_v26, %v6777_v15 }
 0x9e3   : > { %v5702_v19 = vsel %vm2027_vm9, %v5701_v12, %v5377_v37  ;;  %v9447_v37 = vperm.slane %v4988_v29, %v6777_v15  ;;  %v4942_v12 = vsel %vm761_vm0, %v10297_v17, %v4941_v18  ;;  %v4970_v17 = vperm.slane %v4964_v58, %v6777_v15 }
 0x9e4   : > { %v5703_v3 = vsel %vm10306_vm2, %v5702_v19, %v9323_v56  ;;  %v4910_v56 = vsel %vm761_vm0, %v4894_v33, %v4909_v38  ;;  %v4930_v21 = vsel %vm761_vm0, %v10296_v4, %v4929_v5  ;;  %v4950_v2 = vperm.slane %v4942_v12, %v6745_v8  ;;  %v10310_v19 = vld [vmem:[#allocation50_spill] sm:$0xff] }
 0x9e5   : > { %5556 = vrot.lane.b32.xlu1 %v4904_v44, %s10163_s13  ;;  %v5011_v23 = vrot.slane %v9447_v37, 4  ;;  %v4966_v44 = vsel %vm761_vm0, %v4934_v39, %v4965_v46  ;;  %v4911_v11 = vrot.slane %v4898_v47, 4  ;;  %v4962_v4 = vperm.slane %v4954_v30, %v6745_v8  ;;  %s10314_s13 = smov 92  }
 0x9e6   : > { %v4938_v33 = vperm.slane %v4930_v21, %v6745_v8  ;;  %v4914_v39 = vsel %vm761_vm0, %v4898_v47, %v4913_v22  ;;  %v4974_v28 = vperm.slane %v4966_v44, %v6777_v15  ;;  %v4926_v32 = vperm.slane %v4918_v25, %v6745_v8 }
 0x9e7   : > { %5552 = vrot.lane.b32.xlu0 %v4902_v60, %s10303_s6  ;;  %v5389_v20 = vpop.permute.xlu1 %5388  ;;  %5548 = vrot.lane.b32.xlu2 %v4900_v14, %s10304_s7  ;;  %v5039_v60 = vrot.slane %v10310_v19, 4  ;;  %v5001_v14 = vrot.slane %v4950_v2, 4  ;;  %v4999_v16 = vrot.slane %v4962_v4, 4  ;;  %v5013_v35 = vrot.slane %v4970_v17, 4  ;;  %s5772_s6 = scalar_lea.sflag [#allocation4], %s10299_s4  ;;  %s6247_s7 = sshra.s32 %s5792_s3, 4  ;;  %s6248_s7 = int_to_ptr.hbm [resolvable:$true] %s6247_s7 }
 0x9e8   : > { %v5017_v61 = vrot.slane %v4974_v28, 4  ;;  %vm10336_vm2 = vcmask 244736   ;;  %p6254_p0 = scmp.lt.s32.totalorder %s6248_s7, %s10337_s23 }
 0x9e9   : > { %v5385_v63 = vpop.permute.xlu0 %5384  ;;  %v9436_v9 = vpop.permute.xlu2 %5416  ;;  %v5000_v18 = vsel %vm761_vm0, %v4999_v16, %v4950_v2  ;;  %v5014_v46 = vsel %vm761_vm0, %v9447_v37, %v5013_v35 }
 0x9ea   : > { %v5704_v36 = vsel %vm2031_vm14, %v5703_v3, %v5385_v63  ;;  %v4975_v63 = vrot.slane %v4938_v33, 4  ;;  %v5002_v3 = vsel %vm761_vm0, %v4962_v4, %v5001_v14  ;;  %v5018_v34 = vsel %vm761_vm0, %v4998_v7, %v5017_v61 }
 0x9eb   : > { %v5705_v55 = vsel %vm2033_vm12, %v5704_v36, %v5389_v20  ;;  %v4912_v20 = vsel %vm761_vm0, %v4911_v11, %v4874_v45  ;;  %v5027_v36 = vrot.slane %v10315_v51, 4 }
 0x9ec   : > { %5769 = vst [vmem:[%s9442_s8] sm:$0xff] %v5705_v55  ;;  %v5015_v55 = vrot.slane %v4998_v7, 4 }
 0x9ed   : > { %5568 = vrot.lane.b32.xlu1 %v4910_v56, %s10307_s9  ;;  %v5010_v56 = vperm.slane %v5002_v3, %v6777_v15  ;;  %s6249_s9 = scalar_lea.hbm %s6248_s7, 8 }
 0x9ee   : > { %v5016_v47 = vsel %vm761_vm0, %v5015_v55, %v4974_v28  ;;  %p6250_p11 = scmp.ne.s32.totalorder %s6248_s7, %s6249_s9 }
 0x9ef   : > { %5564 = vrot.lane.b32.xlu0 %v4908_v31, %s10308_s30  ;;  %v5401_v6 = vpop.permute.xlu1 %5400  ;;  %5560 = vrot.lane.b32.xlu2 %v4906_v49, %s10309_s10  ;;  %v4977_v31 = vrot.slane %v4926_v32, 4  ;;  %v4976_v49 = vsel %vm761_vm0, %v4975_v63, %v4926_v32  ;;  %v5023_v27 = vrot.slane %v5010_v56, 4  ;;  %v9550_v63 = vperm.slane %v8595_v54, %v6777_v15 }
 0x9f0   : > { %v4982_v0 = vperm.slane %v4976_v49, %v6777_v15  ;;  %v5110_v54 = vperm.slane %v8599_v57, %v6777_v15  ;;  %p6251_p12 = pnand %p6250_p11, %p6486_p5 }
 0x9f1   : > { %v5397_v10 = vpop.permute.xlu0 %5396  ;;  %v9471_v53 = vpop.permute.xlu2 %5428  ;;  %v4978_v12 = vsel %vm761_vm0, %v4938_v33, %v4977_v31 }
 0x9f2   : > { %v5707_v52 = vsel %vm1911_vm4, %v9367_v48, %v5397_v10  ;;  %v5012_v48 = vsel %vm761_vm0, %v5011_v23, %v4970_v17  ;;  %vm10317_vm4 = vcmask 113664   ;;  %v5006_v23 = vperm.slane %v5000_v18, %v6777_v15  ;;  %p6252_p13 = pneg %p6251_p12 }
 0x9f3   : > { %v5708_v59 = vsel %vm1913_vm1, %v5707_v52, %v5401_v6  ;;  %vm10316_vm1 = vcmask 97280   ;;  %v10319_v6 = vld [vmem:[#allocation32_spill] sm:$0xff]  ;;  %v4986_v37 = vperm.slane %v4978_v12, %v6777_v15  ;;  %v5021_v26 = vrot.slane %v4982_v0, 4 }
 0x9f4   : > { %v5709_v50 = vsel %vm1915_vm5, %v5708_v59, %v9404_v42  ;;  %v10313_v42 = vld [vmem:[#allocation27_spill] sm:$0xff]  ;;  %v5028_v58 = vsel %vm761_vm0, %v5027_v36, %v10319_v6  ;;  %vm10322_vm5 = vcmask 130048   ;;  %v5019_v44 = vrot.slane %v5006_v23, 4 }
 0x9f5   : > { %5580 = vrot.lane.b32.xlu1 %v5012_v48, %s10311_s11  ;;  %v5040_v40 = vsel %vm761_vm0, %v5039_v60, %v10313_v42  ;;  %v5034_v30 = vperm.slane %v5028_v58, %v6745_v8  ;;  %v5041_v22 = vrot.slane %v10313_v42, 4  ;;  %v5024_v11 = vsel %vm761_vm0, %v5023_v27, %v4986_v37  ;;  %s6253_s11 = scalar_lea.hbm %s10337_s23, 16 }
 0x9f6   : > { %v5046_v43 = vperm.slane %v5040_v40, %v6745_v8  ;;  %v5022_v4 = vsel %vm761_vm0, %v5006_v23, %v5021_v26  ;;  %v5127_v57 = vrot.slane %v5110_v54, 4  ;;  %p6255_p1 = scmp.lt.s32.totalorder %s6253_s11, %s6249_s9 }
 0x9f7   : > { %5576 = vrot.lane.b32.xlu0 %v4914_v39, %s10312_s12  ;;  %v5413_v62 = vpop.permute.xlu1 %5412  ;;  %5572 = vrot.lane.b32.xlu2 %v4912_v20, %s10314_s13  ;;  %v5042_v59 = vsel %vm761_vm0, %v10310_v19, %v5041_v22  ;;  %v5020_v19 = vsel %vm761_vm0, %v5019_v44, %v4982_v0  ;;  %v5029_v39 = vrot.slane %v10319_v6, 4 }
 0x9f8   : > { %v5075_v5 = vrot.slane %v5046_v43, 4  ;;  %v5050_v33 = vperm.slane %v5042_v59, %v6745_v8  ;;  %p6256_p2 = por %p6255_p1, %p6254_p0 }
 0x9f9   : > { %v5409_v29 = vpop.permute.xlu0 %5408  ;;  %v5441_v13 = vpop.permute.xlu2 %5440  ;;  %v5030_v28 = vsel %vm761_vm0, %v10315_v51, %v5029_v39 }
 0x9fa   : > { %v5710_v38 = vsel %vm1917_vm6, %v5709_v50, %v5409_v29  ;;  %vm10323_vm6 = vcmask 146432   ;;  %v5076_v2 = vsel %vm761_vm0, %v5075_v5, %v5034_v30  ;;  %v5106_v50 = vperm.slane %v8610_v41, %v6777_v15  ;;  %p6257_p3 = pnand %p6256_p2, %p6252_p13 }
 0x9fb   : > { %v5711_v24 = vsel %vm10316_vm1, %v5710_v38, %v5413_v62  ;;  %v5082_v48 = vperm.slane %v5076_v2, %v6777_v15  ;;  %v5077_v62 = vrot.slane %v5034_v30, 4  ;;  %v5087_v42 = vrot.slane %v5050_v33, 4 }
 0x9fc   : > { %v5712_v45 = vsel %vm10317_vm4, %v5711_v24, %v9436_v9  ;;  %v5123_v20 = vrot.slane %v5106_v50, 4  ;;  %v5038_v3 = vperm.slane %v5030_v28, %v6745_v8  ;;  %v5025_v29 = vrot.slane %v4986_v37, 4 }
 0x9fd   : > { %5592 = vrot.lane.b32.xlu1 %v5018_v34, %s10318_s15  ;;  %v5125_v41 = vrot.slane %v5082_v48, 4  ;;  %v5078_v51 = vsel %vm761_vm0, %v5046_v43, %v5077_v62  ;;  %v5131_v8 = vrot.slane %v9550_v63, 4  ;;  %vm10338_vm1 = vcmask 261120  }
 0x9fe   : > { %v5124_v36 = vsel %vm761_vm0, %v5123_v20, %v5082_v48  ;;  %v5026_v38 = vsel %vm761_vm0, %v5010_v56, %v5025_v29  ;;  %v5086_v55 = vperm.slane %v5078_v51, %v6777_v15  ;;  %v5089_v43 = vrot.slane %v5038_v3, 4 }
 0x9ff   : > { %5588 = vrot.lane.b32.xlu0 %v5016_v47, %s10320_s18  ;;  %v5425_v9 = vpop.permute.xlu1 %5424  ;;  %5584 = vrot.lane.b32.xlu2 %v5014_v46, %s10321_s19  ;;  %v5126_v16 = vsel %vm761_vm0, %v5106_v50, %v5125_v41  ;;  %v5122_v5 = vperm.slane %v8583_v1, %v6777_v15 }
 0xa00   : > { %v5090_v18 = vsel %vm761_vm0, %v5050_v33, %v5089_v43  ;;  %v5129_v49 = vrot.slane %v5086_v55, 4  ;;  %v5128_v46 = vsel %vm761_vm0, %v5127_v57, %v5086_v55 }
 0xa01   : > { %v5421_v10 = vpop.permute.xlu0 %5420  ;;  %v5453_v52 = vpop.permute.xlu2 %5452  ;;  %v5098_v47 = vperm.slane %v5090_v18, %v6777_v15 }
 0xa02   : > { %v5713_v21 = vsel %vm10322_vm5, %v5712_v45, %v5421_v10  ;;  %v5130_v58 = vsel %vm761_vm0, %v5110_v54, %v5129_v49 }
 0xa03   : > { %v5714_v17 = vsel %vm10323_vm6, %v5713_v21, %v5425_v9 }
 0xa04   : > { %v5715_v60 = vsel %vm10324_vm7, %v5714_v17, %v9471_v53 }
 0xa05   : > { %5604 = vrot.lane.b32.xlu1 %v5024_v11, %s10325_s20 }
 0xa07   : > { %5600 = vrot.lane.b32.xlu0 %v5022_v4, %s10326_s26  ;;  %v5437_v25 = vpop.permute.xlu1 %5436  ;;  %5596 = vrot.lane.b32.xlu2 %v5020_v19, %s10327_s27 }
 0xa09   : > { %v5433_v53 = vpop.permute.xlu0 %5432  ;;  %v9543_v14 = vpop.permute.xlu2 %5464 }
 0xa0a   : > { %v5716_v7 = vsel %vm10328_vm10, %v5715_v60, %v5433_v53 }
 0xa0b   : > { %v5717_v40 = vsel %vm1931_vm13, %v5716_v7, %v5437_v25  ;;  %vm10335_vm13 = vcmask 228352  }
 0xa0c   : > { %v5718_v32 = vsel %vm10329_vm3, %v5717_v40, %v5441_v13  ;;  %v5088_v13 = vsel %vm761_vm0, %v5087_v42, %v5038_v3 }
 0xa0d   : > { %5616 = vrot.lane.b32.xlu1 %v5126_v16, %s10330_s28  ;;  %v5094_v45 = vperm.slane %v5088_v13, %v6777_v15 }
 0xa0f   : > { %5612 = vrot.lane.b32.xlu0 %v5124_v36, %s10332_s16  ;;  %v5449_v61 = vpop.permute.xlu1 %5448  ;;  %5608 = vrot.lane.b32.xlu2 %v5026_v38, %s10333_s24  ;;  %v5132_v35 = vsel %vm761_vm0, %v5131_v8, %v5094_v45 }
 0xa11   : > { %v5445_v24 = vpop.permute.xlu0 %5444  ;;  %v5477_v56 = vpop.permute.xlu2 %5476 }
 0xa12   : > { %v5719_v34 = vsel %vm10335_vm13, %v5718_v32, %v5445_v24 }
 0xa13   : > { %v5720_v31 = vsel %vm10336_vm2, %v5719_v34, %v5449_v61 }
 0xa14   : > { %v5721_v6 = vsel %vm10338_vm1, %v5720_v31, %v5453_v52 }
 0xa15   : > { %5628 = vrot.lane.b32.xlu1 %v5132_v35, %s10339_s1 }
 0xa17   : > { %5624 = vrot.lane.b32.xlu0 %v5130_v58, %s10341_s5  ;;  %v5461_v9 = vpop.permute.xlu1 %5460 }
 0xa18   : > { %6260 = shalt.err (!%p6257_p3)
}
 0xa19   : > { %5927 = dma.vmem_to_hbm [thread:$0]  (%p6486_p5), %s5790_s0, 128, %s5792_s3, %s5772_s6   ;;  %v5457_v15 = vpop.permute.xlu0 %5456  ;;  %vm10343_vm4 = vcmask 277504   ;;  %v5489_v12 = vpop.permute.xlu2 %5488  ;;  %v5137_v23 = vrot.slane %v5098_v47, 4  ;;  %v5135_v27 = vrot.slane %v5122_v5, 4  ;;  %vm10344_vm5 = vcmask 293888  }
 0xa1a   : > { %s10342_s15 = smov 116   ;;  %v5722_v1 = vsel %vm10343_vm4, %v5721_v6, %v5457_v15  ;;  %vm10345_vm6 = vcmask 310272   ;;  %s10346_s18 = smov 126   ;;  %v5133_v22 = vrot.slane %v5094_v45, 4  ;;  %vm10349_vm7 = vcmask 326656  }
 0xa1b   : > { %5620 = vrot.lane.b32.xlu2 %v5128_v46, %s10342_s15  ;;  %v5723_v0 = vsel %vm10344_vm5, %v5722_v1, %v5461_v9  ;;  %v5138_v30 = vsel %vm761_vm0, %v5122_v5, %v5137_v23  ;;  %v5136_v21 = vsel %vm761_vm0, %v5135_v27, %v5098_v47  ;;  %s10347_s19 = smov 124   ;;  %s10348_s20 = smov 122   ;;  %vm10350_vm10 = vcmask 343040  }
 0xa1c   : > { %v5724_v10 = vsel %vm10345_vm6, %v5723_v0, %v9543_v14  ;;  %v5134_v52 = vsel %vm761_vm0, %v9550_v63, %v5133_v22  ;;  %vm10351_vm3 = vcmask 359424   ;;  %vm10352_vm13 = vcmask 375808   ;;  %s5926_s26 = sshll.u32 %s10331_s14, 4  ;;  %s10386_s16 = sld [smem:[#allocation97_spill]] }
 0xa1d   : > { %5640 = vrot.lane.b32.xlu1 %v5138_v30, %s10346_s18  ;;  %vm10353_vm2 = vcmask 392192   ;;  %vm10354_vm0 = vcmask 408576   ;;  %vm10355_vm1 = vcmask 424960   ;;  %vm10356_vm4 = vcmask 441344   ;;  %s5804_s25 = sshll.u32 %s9442_s8, 4  ;;  %s5777_s14 = scalar_lea.sflag [#allocation6], %s10299_s4  ;;  %s5805_s25 = int_to_ptr.vmem [resolvable:$true] %s5804_s25 }
 0xa1e   : > { %vm10357_vm5 = vcmask 457728   ;;  %vm10358_vm6 = vcmask 474112  }
 0xa1f   : > { %5636 = vrot.lane.b32.xlu0 %v5136_v21, %s10347_s19  ;;  %v5473_v37 = vpop.permute.xlu1 %5472 }
 0xa21   : > { %v5469_v17 = vpop.permute.xlu0 %5468  ;;  %v5501_v2 = vpop.permute.xlu2 %5500 }
 0xa22   : > { %v5725_v44 = vsel %vm10349_vm7, %v5724_v10, %v5469_v17  ;;  %vm10359_vm7 = vcmask 490496   ;;  %s5802_s24 = scalar_lea.hbm %s10386_s16, %s5926_s26  ;;  %s6281_s1 = scalar_lea.hbm %s10386_s16, 32 }
 0xa23   : > { %5632 = vrot.lane.b32.xlu2 %v5134_v52, %s10348_s20  ;;  %v5726_v59 = vsel %vm10350_vm10, %v5725_v44, %v5473_v37  ;;  %vm10360_vm10 = vcmask 506880   ;;  %s5806_s22 = sshll.u32 %s5802_s24, 4  ;;  %s5807_s22 = int_to_ptr.hbm [resolvable:$true] %s5806_s22 }
 0xa24   : > { %v5727_v11 = vsel %vm10351_vm3, %v5726_v59, %v5477_v56  ;;  %vm10361_vm3 = vcmask 523264   ;;  %s6275_s21 = sshra.s32 %s5807_s22, 4  ;;  %s6276_s21 = int_to_ptr.hbm [resolvable:$true] %s6275_s21 }
 0xa25   : > { %s6277_s17 = scalar_lea.hbm %s6276_s21, 16  ;;  %p6282_p9 = scmp.lt.s32.totalorder %s6276_s21, %s10386_s16 }
 0xa26   : > { %p6278_p4 = scmp.ne.s32.totalorder %s6276_s21, %s6277_s17  ;;  %p6283_p10 = scmp.lt.s32.totalorder %s6281_s1, %s6277_s17 }
 0xa27   : > { %v5485_v26 = vpop.permute.xlu1 %5484 }
 0xa28   : > { %p6279_p7 = pnand %p6278_p4, %p6486_p5  ;;  %p6284_p11 = por %p6283_p10, %p6282_p9 }
 0xa29   : > { %v5481_v60 = vpop.permute.xlu0 %5480  ;;  %v5513_v50 = vpop.permute.xlu2 %5512 }
 0xa2a   : > { %v5728_v4 = vsel %vm10352_vm13, %v5727_v11, %v5481_v60  ;;  %vm10362_vm13 = vcmask 539648   ;;  %p6280_p8 = pneg %p6279_p7 }
 0xa2b   : > { %v5729_v48 = vsel %vm10353_vm2, %v5728_v4, %v5485_v26  ;;  %vm10363_vm2 = vcmask 556032  }
 0xa2c   : > { %v5730_v28 = vsel %vm10354_vm0, %v5729_v48, %v5489_v12  ;;  %vm10364_vm0 = vcmask 572416   ;;  %p6285_p12 = pnand %p6284_p11, %p6280_p8 }
 0xa2f   : > { %v5497_v33 = vpop.permute.xlu1 %5496 }
 0xa31   : > { %v5493_v19 = vpop.permute.xlu0 %5492  ;;  %v5525_v25 = vpop.permute.xlu2 %5524 }
 0xa32   : > { %v5731_v7 = vsel %vm10355_vm1, %v5730_v28, %v5493_v19  ;;  %vm10365_vm1 = vcmask 588800  }
 0xa33   : > { %v5732_v20 = vsel %vm10356_vm4, %v5731_v7, %v5497_v33  ;;  %vm10366_vm4 = vcmask 605184  }
 0xa34   : > { %v5733_v42 = vsel %vm10357_vm5, %v5732_v20, %v5501_v2  ;;  %vm10367_vm5 = vcmask 621568  }
 0xa37   : > { %v5509_v39 = vpop.permute.xlu1 %5508 }
 0xa39   : > { %v5505_v53 = vpop.permute.xlu0 %5504  ;;  %v5537_v41 = vpop.permute.xlu2 %5536 }
 0xa3a   : > { %v5734_v40 = vsel %vm10358_vm6, %v5733_v42, %v5505_v53  ;;  %vm10368_vm6 = vcmask 637952  }
 0xa3b   : > { %v5735_v32 = vsel %vm10359_vm7, %v5734_v40, %v5509_v39  ;;  %vm10369_vm7 = vcmask 654336  }
 0xa3c   : > { %v5736_v29 = vsel %vm10360_vm10, %v5735_v32, %v5513_v50  ;;  %vm10370_vm10 = vcmask 670720  }
 0xa3f   : > { %v5521_v14 = vpop.permute.xlu1 %5520 }
 0xa41   : > { %v5517_v62 = vpop.permute.xlu0 %5516  ;;  %v5549_v3 = vpop.permute.xlu2 %5548 }
 0xa42   : > { %v5737_v51 = vsel %vm10361_vm3, %v5736_v29, %v5517_v62  ;;  %vm10371_vm3 = vcmask 687104  }
 0xa43   : > { %v5738_v36 = vsel %vm10362_vm13, %v5737_v51, %v5521_v14  ;;  %vm10372_vm13 = vcmask 703488  }
 0xa44   : > { %v5739_v13 = vsel %vm10363_vm2, %v5738_v36, %v5525_v25  ;;  %vm10373_vm2 = vcmask 719872  }
 0xa47   : > { %v5533_v16 = vpop.permute.xlu1 %5532 }
 0xa49   : > { %v5529_v63 = vpop.permute.xlu0 %5528  ;;  %v5561_v8 = vpop.permute.xlu2 %5560 }
 0xa4a   : > { %v5740_v54 = vsel %vm10364_vm0, %v5739_v13, %v5529_v63  ;;  %vm10374_vm0 = vcmask 736256  }
 0xa4b   : > { %v5741_v55 = vsel %vm10365_vm1, %v5740_v54, %v5533_v16  ;;  %vm10375_vm1 = vcmask 752640  }
 0xa4c   : > { %v5742_v24 = vsel %vm10366_vm4, %v5741_v55, %v5537_v41  ;;  %vm10376_vm4 = vcmask 769024  }
 0xa4f   : > { %v5545_v38 = vpop.permute.xlu1 %5544 }
 0xa51   : > { %v5541_v61 = vpop.permute.xlu0 %5540  ;;  %v5573_v18 = vpop.permute.xlu2 %5572 }
 0xa52   : > { %v5743_v56 = vsel %vm10367_vm5, %v5742_v24, %v5541_v61  ;;  %vm10377_vm5 = vcmask 785408  }
 0xa53   : > { %v5744_v45 = vsel %vm10368_vm6, %v5743_v56, %v5545_v38  ;;  %vm10378_vm6 = vcmask 801792  }
 0xa54   : > { %v5745_v57 = vsel %vm10369_vm7, %v5744_v45, %v5549_v3  ;;  %vm10379_vm7 = vcmask 818176  }
 0xa57   : > { %v5557_v43 = vpop.permute.xlu1 %5556 }
 0xa59   : > { %v5553_v34 = vpop.permute.xlu0 %5552  ;;  %v5585_v5 = vpop.permute.xlu2 %5584 }
 0xa5a   : > { %v5746_v35 = vsel %vm10370_vm10, %v5745_v57, %v5553_v34  ;;  %vm10380_vm10 = vcmask 834560  }
 0xa5b   : > { %v5747_v6 = vsel %vm10371_vm3, %v5746_v35, %v5557_v43  ;;  %vm10381_vm3 = vcmask 867328  }
 0xa5c   : > { %v5748_v58 = vsel %vm10372_vm13, %v5747_v6, %v5561_v8  ;;  %vm10382_vm13 = vcmask 883712  }
 0xa5f   : > { %v5569_v31 = vpop.permute.xlu1 %5568 }
 0xa61   : > { %v5565_v49 = vpop.permute.xlu0 %5564  ;;  %v5597_v0 = vpop.permute.xlu2 %5596 }
 0xa62   : > { %v5749_v46 = vsel %vm10373_vm2, %v5748_v58, %v5565_v49  ;;  %vm10383_vm2 = vcmask 900096  }
 0xa63   : > { %v5750_v15 = vsel %vm10374_vm0, %v5749_v46, %v5569_v31  ;;  %vm10384_vm0 = vcmask 916480  }
 0xa64   : > { %v5751_v1 = vsel %vm10375_vm1, %v5750_v15, %v5573_v18  ;;  %vm10385_vm1 = vcmask 932864  }
 0xa67   : > { %v5581_v47 = vpop.permute.xlu1 %5580 }
 0xa69   : > { %v5577_v9 = vpop.permute.xlu0 %5576  ;;  %v5609_v17 = vpop.permute.xlu2 %5608 }
 0xa6a   : > { %v5752_v12 = vsel %vm10376_vm4, %v5751_v1, %v5577_v9 }
 0xa6b   : > { %v5753_v30 = vsel %vm10377_vm5, %v5752_v12, %v5581_v47 }
 0xa6c   : > { %v5754_v10 = vsel %vm10378_vm6, %v5753_v30, %v5585_v5 }
 0xa6f   : > { %v5593_v23 = vpop.permute.xlu1 %5592 }
 0xa71   : > { %v5589_v27 = vpop.permute.xlu0 %5588 }
 0xa72   : > { %v5755_v22 = vsel %vm10379_vm7, %v5754_v10, %v5589_v27 }
 0xa73   : > { %v5756_v52 = vsel %vm10380_vm10, %v5755_v22, %v5593_v23 }
 0xa74   : > { %v5757_v44 = vsel %vm2011_vm11, %v5756_v52, %v5597_v0  ;;  %vm10387_vm11 = vcmask 998400  }
 0xa75   : > { %v5621_v48 = vpop.permute.xlu2 %5620 }
 0xa77   : > { %v5605_v21 = vpop.permute.xlu1 %5604 }
 0xa79   : > { %v5601_v37 = vpop.permute.xlu0 %5600 }
 0xa7a   : > { %v5758_v2 = vsel %vm10381_vm3, %v5757_v44, %v5601_v37 }
 0xa7b   : > { %v5759_v11 = vsel %vm10382_vm13, %v5758_v2, %v5605_v21 }
 0xa7c   : > { %v5760_v60 = vsel %vm10383_vm2, %v5759_v11, %v5609_v17 }
 0xa7d   : > { %v5633_v28 = vpop.permute.xlu2 %5632 }
 0xa7f   : > { %v5617_v59 = vpop.permute.xlu1 %5616 }
 0xa81   : > { %v5613_v26 = vpop.permute.xlu0 %5612 }
 0xa82   : > { %v5761_v4 = vsel %vm10384_vm0, %v5760_v60, %v5613_v26 }
 0xa83   : > { %v5762_v50 = vsel %vm10385_vm1, %v5761_v4, %v5617_v59 }
 0xa84   : > { %v5763_v25 = vsel %vm2023_vm15, %v5762_v50, %v5621_v48 }
 0xa87   : > { %v5629_v33 = vpop.permute.xlu1 %5628 }
 0xa89   : > { %v5625_v19 = vpop.permute.xlu0 %5624 }
 0xa8a   : > { %v5764_v39 = vsel %vm2025_vm8, %v5763_v25, %v5625_v19 }
 0xa8b   : > { %v5765_v53 = vsel %vm2027_vm9, %v5764_v39, %v5629_v33 }
 0xa8c   : > { %v5766_v14 = vsel %vm10387_vm11, %v5765_v53, %v5633_v28 }
 0xa8f   : > { %v5641_v41 = vpop.permute.xlu1 %5640 }
 0xa91   : > { %v5637_v7 = vpop.permute.xlu0 %5636 }
 0xa92   : > { %v5767_v20 = vsel %vm2031_vm14, %v5766_v14, %v5637_v7 }
 0xa93   : > { %v5768_v62 = vsel %vm2033_vm12, %v5767_v20, %v5641_v41 }
 0xa94   : > { %5770 = vst [vmem:[%s9442_s8 + $0x8] sm:$0xff] %v5768_v62 }
 0xa95   : > { %6288 = shalt.err (!%p6285_p12)
}
 0xa96   : > { %5928 = dma.vmem_to_hbm [thread:$0]  (%p6486_p5), %s5805_s25, 256, %s5807_s22, %s5777_s14  }
 0xa97 PF: > { %s10388_s4 = sld [smem:[#allocation12_spill]] }
 0xa98   : > { %s10389_s8 = sld [smem:[#allocation9_spill]] }
 0xa9d   : > { %p5938_p13 = scmp.ge.s32.totalorder %s10388_s4, 2 }
 0xa9e   : > { %s5818_s7 = sand.u32 1, %s10389_s8  }
 0xa9f   : > { %p5932_p0 = pnand %p5938_p13, %p6490_p6  ;;  %s5819_s9 = scalar_lea.sflag [#allocation4], %s5818_s7 }
 0xaa1   : > { %p5933_p1 = pneg %p5932_p0 }
 0xaa3   : > { %6306 = dma.done.wait (%p5933_p1), %s5819_s9, 128  }
 0xaa4   : > { %6308 = vsyncadd (%p5933_p1), %s5819_s9, 4294967168  ;;  %s5829_s30 = scalar_lea.sflag [#allocation6], %s5818_s7 }
 0xaa5   : > { %6310 = dma.done.wait (%p5933_p1), %s5829_s30, 256  }
 0xaa6   : > { %6312 = vsyncadd (%p5933_p1), %s5829_s30, 4294967040  ;;  %s10391_s12 = sld [smem:[#allocation14_spill]] }
 0xaa7   : > { %s10392_s30 = sld [smem:[#allocation10_spill]] }
 0xaa8   : > { %s10393_s10 = sld [smem:[#allocation11_spill]] }
 0xaa9   : > { %s10394_s11 = sld [smem:[#allocation15_spill]] }
 0xaac   : > { %p23_p5 = scmp.ge.s32.totalorder %s10391_s12, 4  }
 0xaae   :  { %25 = sbr.rel (!%p23_p5) target bundleno = 16 (0x10), region = 107 }
 0xab3   :  { %5835 = vsyncpa [#allocation4], 1 }
 0xab4   :  { %5837 = vsyncpa [#allocation4 + $0x1], 1 }
 0xab5   :  { %5838 = vsyncpa [#allocation6], 1 }
 0xab6   :  { %5840 = vsyncpa [#allocation6 + $0x1], 1 }

</bundles_post_ra>
